<compile_context>
chip_gen: v7x
topology: tpu7x:2x2x1
jax: 0.10.0
libtpu: 0.0.40
codegen_flags: <defaults>
</compile_context>

<pallas_src>
import functools

import jax
import jax.numpy as jnp
from jax import lax
from jax.experimental import pallas as pl
from jax.experimental.pallas import tpu as pltpu


def _pick_row_tile(H, W, C, staging_budget_bytes=4 << 20):
    """Largest divisor TH of H with TH*W <= cap.

    cap bounds both the MXU M dimension (amortizes weight push / drain) and the
    per-row-tile bf16 lhs staging (3 slabs of (TH*W, 3*C) ~= 18*TH*W*C bytes).
    """
    cap = min(1024, max(W, staging_budget_bytes // (18 * max(C, 1))))
    best = 1
    for th in range(1, H + 1):
        if H % th == 0 and th * W <= cap:
            best = th
    return best


def _pick_cout_tile(C):
    # v6e/v7x MXUs are 256 wide; use 256 where possible.  (v5e's 128x128 MXU
    # would prefer 128 — TODO(synk): pick 128 there via pltpu.get_tpu_info().)
    if C <= 256:
        return C
    for ct in (256, 128):
        if C % ct == 0:
            return ct
    return C


def _basic_block_kernel(x_ref, w1_ref, w2_ref, o_ref, xp_ref, yp_ref, *, TH, CT):
    # x_ref : (1, H, W, C)   one input image (caller dtype, e.g. f32)
    # w1/w2 : (3, 3C, C)     bf16, dx taps folded into the contraction dim:
    #                        w[dy, dx*C + ci, co] == w_hwio[dy, dx, ci, co]
    # o_ref : (1, H, W, C)   conv2(relu(conv1(x))) + x
    # xp/yp : (H+2, W+2, C)  bf16 VMEM scratch: padded input / padded relu(conv1)
    H, W, C = o_ref.shape[1], o_ref.shape[2], o_ref.shape[3]
    NH = H // TH
    NC = C // CT

    # --- Zero only the 1-px halo ring (interiors are fully overwritten below).
    #     Done every grid step (cheap: perimeter only) so it is megacore-safe.
    zrow = jnp.zeros((1, W + 2, C), xp_ref.dtype)
    zcol = jnp.zeros((H, 1, C), xp_ref.dtype)
    for ref in (xp_ref, yp_ref):
        ref[0:1, :, :] = zrow
        ref[H + 1:H + 2, :, :] = zrow
        ref[1:H + 1, 0:1, :] = zcol
        ref[1:H + 1, W + 1:W + 2, :] = zcol

    # --- Load the image into the padded scratch, casting to the MXU-native
    #     bf16 operand dtype (accumulation below stays f32).
    xp_ref[1:H + 1, 1:W + 1, :] = x_ref[0].astype(xp_ref.dtype)

    def conv_pass(src_ref, w_ref, dst_write):
        # 3x3 "same" conv, stride 1.  TH rows batched per matmul (M = TH*W);
        # dx taps folded into K (= 3*C): 3 dots per output tile instead of 9.
        def h_body(ih, carry):
            h0 = pl.multiple_of(ih * TH, TH)
            # Build the 3 per-dy lhs slabs once per row tile (independent of
            # the Cout tile) — pays the dx sublane shifts / concat only once.
            lhs = []
            for dy in range(3):                                   # static taps
                rows = src_ref[pl.ds(h0 + dy, TH), :, :]          # (TH, W+2, C)
                slab = jnp.concatenate(
                    [rows[:, 0:W, :], rows[:, 1:W + 1, :], rows[:, 2:W + 2, :]],
                    axis=-1)                                      # (TH, W, 3C)
                lhs.append(slab.reshape(TH * W, 3 * C))
            for ic in range(NC):                 # tiny static loop (<=2 tiles)
                c0 = ic * CT
                acc = jnp.dot(lhs[0], w_ref[0, :, c0:c0 + CT],
                              preferred_element_type=jnp.float32)
                for dy in (1, 2):
                    acc = acc + jnp.dot(lhs[dy], w_ref[dy, :, c0:c0 + CT],
                                        preferred_element_type=jnp.float32)
                dst_write(h0, c0, acc.reshape(TH, W, CT))
            return carry
        lax.fori_loop(0, NH, h_body, jnp.int32(0), unroll=(NH <= 2))

    # conv1 + fused ReLU -> interior of yp (stays in VMEM, never hits HBM)
    def relu_store(h0, c0, v):
        yp_ref[pl.ds(h0 + 1, TH), 1:W + 1, c0:c0 + CT] = (
            jnp.maximum(v, 0.0).astype(yp_ref.dtype))

    conv_pass(xp_ref, w1_ref, relu_store)

    # conv2 + fused residual add (identity read at full input precision) -> out
    def residual_store(h0, c0, v):
        identity = x_ref[0, pl.ds(h0, TH), :, c0:c0 + CT].astype(jnp.float32)
        o_ref[0, pl.ds(h0, TH), :, c0:c0 + CT] = (v + identity).astype(o_ref.dtype)

    conv_pass(yp_ref, w2_ref, residual_store)


def basic_block_nhwc(x_nhwc, w1_hwio, w2_hwio):
    N, H, W, C = x_nhwc.shape
    assert w1_hwio.shape == (3, 3, C, C) and w2_hwio.shape == (3, 3, C, C), (
        "BasicBlock residual add requires inplanes == planes (stride=1)")

    TH = _pick_row_tile(H, W, C)
    CT = _pick_cout_tile(C)
    assert H % TH == 0 and C % CT == 0

    # Fold dx into the contraction dim: (3,3,Cin,Cout) -> (3, 3*Cin, Cout) with
    # row-block order [dx=0 | dx=1 | dx=2] matching the in-kernel channel
    # concat.  bf16 weights: MXU-native rate, half the VMEM/HBM footprint.
    w1 = w1_hwio.reshape(3, 3 * C, C).astype(jnp.bfloat16)
    w2 = w2_hwio.reshape(3, 3 * C, C).astype(jnp.bfloat16)

    kernel = functools.partial(_basic_block_kernel, TH=TH, CT=CT)

    return pl.pallas_call(
        kernel,
        out_shape=jax.ShapeDtypeStruct((N, H, W, C), x_nhwc.dtype),
        grid=(N,),
        in_specs=[
            pl.BlockSpec((1, H, W, C), lambda n: (n, 0, 0, 0)),
            pl.BlockSpec((3, 3 * C, C), lambda n: (0, 0, 0)),   # constant block
            pl.BlockSpec((3, 3 * C, C), lambda n: (0, 0, 0)),   # constant block
        ],
        out_specs=pl.BlockSpec((1, H, W, C), lambda n: (n, 0, 0, 0)),
        scratch_shapes=[
            pltpu.VMEM((H + 2, W + 2, C), jnp.bfloat16),   # padded input
            pltpu.VMEM((H + 2, W + 2, C), jnp.bfloat16),   # padded relu(conv1)
        ],
        compiler_params=pltpu.CompilerParams(
            dimension_semantics=("parallel",),   # batch axis -> v7x 2 TCs
        ),
    )(x_nhwc, w1, w2)


def basic_block(x_nchw, w1_hwio, w2_hwio):
    """BasicBlock.forward: conv2(relu(conv1(x))) + x, bias-free 3x3 convs."""
    # Public interface is PyTorch NCHW; if the surrounding model is NHWC,
    # call basic_block_nhwc directly and skip both transposes.
    x = jnp.transpose(x_nchw, (0, 2, 3, 1))
    y = basic_block_nhwc(x, w1_hwio, w2_hwio)
    return jnp.transpose(y, (0, 3, 1, 2))


# ----------------------------------------------------------------------------
# Pure-JAX reference with the SAME bf16 rounding points as the kernel
# (conv operands bf16, f32 accumulation, f32 residual add).
# ----------------------------------------------------------------------------
def basic_block_ref(x_nchw, w1_hwio, w2_hwio):
    x = jnp.transpose(x_nchw, (0, 2, 3, 1))

    def conv(v, w):
        return lax.conv_general_dilated(
            v.astype(jnp.bfloat16), w.astype(jnp.bfloat16),
            (1, 1), ((1, 1), (1, 1)),
            dimension_numbers=('NHWC', 'HWIO', 'NHWC'),
            preferred_element_type=jnp.float32)

    out = conv(x, w1_hwio)
    out = jnp.maximum(out, 0.0)
    out = conv(out, w2_hwio)          # conv() re-rounds the relu output to bf16,
    out = out + x                     # matching the bf16 yp scratch in the kernel
    return jnp.transpose(out, (0, 3, 1, 2)).astype(x_nchw.dtype)


if __name__ == "__main__":
    key = jax.random.PRNGKey(0)
    kx, k1, k2 = jax.random.split(key, 3)

    # Small BasicBlock: batch=2, inplanes=planes=64, 16x16 spatial, stride=1.
    N, C, H, W = 2, 64, 16, 16
    x = jax.random.normal(kx, (N, C, H, W), jnp.float32)
    std = (2.0 / (9.0 * C)) ** 0.5                   # He init, bias-free convs
    w1 = jax.random.normal(k1, (3, 3, C, C), jnp.float32) * std   # HWIO
    w2 = jax.random.normal(k2, (3, 3, C, C), jnp.float32) * std

    fwd = jax.jit(basic_block)
    out = jax.block_until_ready(fwd(x, w1, w2))

    ref = basic_block_ref(x, w1, w2)
    assert out.shape == ref.shape and out.dtype == ref.dtype, (out.shape, ref.shape)
    err = float(jnp.max(jnp.abs(out - ref)))
    scale = float(jnp.max(jnp.abs(ref))) + 1e-6
    if err > 1e-2 * scale + 1e-3:
        raise AssertionError(f"Pallas vs reference mismatch: {err} (scale {scale})")

    print("KERNEL_OK")
</pallas_src>

<mosaic_0001>
module attributes {stable_mosaic.version = 11 : i64} {
  func.func @_basic_block_kernel(%arg0: i32, %arg1: memref<1x16x16x64xf32, #tpu.memory_space<vmem>>, %arg2: memref<3x192x64xbf16, #tpu.memory_space<vmem>>, %arg3: memref<3x192x64xbf16, #tpu.memory_space<vmem>>, %arg4: memref<1x16x16x64xf32, #tpu.memory_space<vmem>>, %arg5: memref<18x18x64xbf16, #tpu.memory_space<vmem>>, %arg6: memref<18x18x64xbf16, #tpu.memory_space<vmem>>) attributes {dimension_semantics = [#tpu.dimension_semantics<parallel>], iteration_bounds = array<i64: 2>, scalar_prefetch = 0 : i64, scratch_operands = 2 : i64, tpu.core_type = #tpu.core_type<tc>, window_params = [{transform_indices = @transform_0, window_bounds = array<i64: 1, 16, 16, 64>}, {pipeline_mode = #tpu.pipeline_mode<synchronous>, transform_indices = @transform_1, window_bounds = array<i64: 3, 192, 64>}, {pipeline_mode = #tpu.pipeline_mode<synchronous>, transform_indices = @transform_2, window_bounds = array<i64: 3, 192, 64>}, {transform_indices = @transform_3, window_bounds = array<i64: 1, 16, 16, 64>}]} {
    %cst = arith.constant 0.000000e+00 : bf16
    %0 = vector.broadcast %cst : bf16 to vector<1x18x64xbf16>
    %cst_0 = arith.constant 0.000000e+00 : bf16
    %1 = vector.broadcast %cst_0 : bf16 to vector<16x1x64xbf16>
    %c0 = arith.constant 0 : index
    %c0_1 = arith.constant 0 : index
    %c0_2 = arith.constant 0 : index
    %2 = vector.load %arg5[%c0, %c0_1, %c0_2] : memref<18x18x64xbf16, #tpu.memory_space<vmem>>, vector<1x18x64xbf16>
    tpu.vector_store %arg5[%c0, %c0_1, %c0_2], %0 {strides = array<i32>} : memref<18x18x64xbf16, #tpu.memory_space<vmem>>, vector<1x18x64xbf16>,
    %c17 = arith.constant 17 : index
    %c0_3 = arith.constant 0 : index
    %c0_4 = arith.constant 0 : index
    %3 = vector.load %arg5[%c17, %c0_3, %c0_4] : memref<18x18x64xbf16, #tpu.memory_space<vmem>>, vector<1x18x64xbf16>
    tpu.vector_store %arg5[%c17, %c0_3, %c0_4], %0 {strides = array<i32>} : memref<18x18x64xbf16, #tpu.memory_space<vmem>>, vector<1x18x64xbf16>,
    %c1 = arith.constant 1 : index
    %c0_5 = arith.constant 0 : index
    %c0_6 = arith.constant 0 : index
    %4 = vector.load %arg5[%c1, %c0_5, %c0_6] : memref<18x18x64xbf16, #tpu.memory_space<vmem>>, vector<16x1x64xbf16>
    tpu.vector_store %arg5[%c1, %c0_5, %c0_6], %1 {strides = array<i32>} : memref<18x18x64xbf16, #tpu.memory_space<vmem>>, vector<16x1x64xbf16>,
    %c1_7 = arith.constant 1 : index
    %c17_8 = arith.constant 17 : index
    %c0_9 = arith.constant 0 : index
    %5 = vector.load %arg5[%c1_7, %c17_8, %c0_9] : memref<18x18x64xbf16, #tpu.memory_space<vmem>>, vector<16x1x64xbf16>
    tpu.vector_store %arg5[%c1_7, %c17_8, %c0_9], %1 {strides = array<i32>} : memref<18x18x64xbf16, #tpu.memory_space<vmem>>, vector<16x1x64xbf16>,
    %c0_10 = arith.constant 0 : index
    %c0_11 = arith.constant 0 : index
    %c0_12 = arith.constant 0 : index
    %6 = vector.load %arg6[%c0_10, %c0_11, %c0_12] : memref<18x18x64xbf16, #tpu.memory_space<vmem>>, vector<1x18x64xbf16>
    tpu.vector_store %arg6[%c0_10, %c0_11, %c0_12], %0 {strides = array<i32>} : memref<18x18x64xbf16, #tpu.memory_space<vmem>>, vector<1x18x64xbf16>,
    %c17_13 = arith.constant 17 : index
    %c0_14 = arith.constant 0 : index
    %c0_15 = arith.constant 0 : index
    %7 = vector.load %arg6[%c17_13, %c0_14, %c0_15] : memref<18x18x64xbf16, #tpu.memory_space<vmem>>, vector<1x18x64xbf16>
    tpu.vector_store %arg6[%c17_13, %c0_14, %c0_15], %0 {strides = array<i32>} : memref<18x18x64xbf16, #tpu.memory_space<vmem>>, vector<1x18x64xbf16>,
    %c1_16 = arith.constant 1 : index
    %c0_17 = arith.constant 0 : index
    %c0_18 = arith.constant 0 : index
    %8 = vector.load %arg6[%c1_16, %c0_17, %c0_18] : memref<18x18x64xbf16, #tpu.memory_space<vmem>>, vector<16x1x64xbf16>
    tpu.vector_store %arg6[%c1_16, %c0_17, %c0_18], %1 {strides = array<i32>} : memref<18x18x64xbf16, #tpu.memory_space<vmem>>, vector<16x1x64xbf16>,
    %c1_19 = arith.constant 1 : index
    %c17_20 = arith.constant 17 : index
    %c0_21 = arith.constant 0 : index
    %9 = vector.load %arg6[%c1_19, %c17_20, %c0_21] : memref<18x18x64xbf16, #tpu.memory_space<vmem>>, vector<16x1x64xbf16>
    tpu.vector_store %arg6[%c1_19, %c17_20, %c0_21], %1 {strides = array<i32>} : memref<18x18x64xbf16, #tpu.memory_space<vmem>>, vector<16x1x64xbf16>,
    %c0_22 = arith.constant 0 : index
    %c0_23 = arith.constant 0 : index
    %c0_24 = arith.constant 0 : index
    %c0_25 = arith.constant 0 : index
    %10 = vector.load %arg1[%c0_22, %c0_23, %c0_24, %c0_25] : memref<1x16x16x64xf32, #tpu.memory_space<vmem>>, vector<1x16x16x64xf32>
    %11 = vector.shape_cast %10 : vector<1x16x16x64xf32> to vector<16x16x64xf32>
    %12 = arith.truncf %11 : vector<16x16x64xf32> to vector<16x16x64xbf16>
    %c1_26 = arith.constant 1 : index
    %c1_27 = arith.constant 1 : index
    %c0_28 = arith.constant 0 : index
    %13 = vector.load %arg5[%c1_26, %c1_27, %c0_28] : memref<18x18x64xbf16, #tpu.memory_space<vmem>>, vector<16x16x64xbf16>
    tpu.vector_store %arg5[%c1_26, %c1_27, %c0_28], %12 {strides = array<i32>} : memref<18x18x64xbf16, #tpu.memory_space<vmem>>, vector<16x16x64xbf16>,
    %c0_i32 = arith.constant 0 : i32
    %c16_i32 = arith.constant 16 : i32
    %14 = arith.muli %c0_i32, %c16_i32 : i32
    %15 = tpu.assume_multiple %14, 16 : i32
    %c0_i32_29 = arith.constant 0 : i32
    %16 = arith.addi %15, %c0_i32_29 : i32
    %17 = arith.index_cast %16 : i32 to index
    %c0_30 = arith.constant 0 : index
    %c0_31 = arith.constant 0 : index
    %18 = vector.load %arg5[%17, %c0_30, %c0_31] : memref<18x18x64xbf16, #tpu.memory_space<vmem>>, vector<16x18x64xbf16>
    %19 = vector.extract_strided_slice %18 {offsets = [0, 0, 0], sizes = [16, 16, 64], strides = [1, 1, 1]} : vector<16x18x64xbf16> to vector<16x16x64xbf16>
    %20 = vector.extract_strided_slice %18 {offsets = [0, 1, 0], sizes = [16, 16, 64], strides = [1, 1, 1]} : vector<16x18x64xbf16> to vector<16x16x64xbf16>
    %21 = vector.extract_strided_slice %18 {offsets = [0, 2, 0], sizes = [16, 16, 64], strides = [1, 1, 1]} : vector<16x18x64xbf16> to vector<16x16x64xbf16>
    %22 = tpu.concatenate %19, %20, %21 in 2 : vector<16x16x64xbf16>, vector<16x16x64xbf16>, vector<16x16x64xbf16> -> vector<16x16x192xbf16>
    %23 = vector.shape_cast %22 : vector<16x16x192xbf16> to vector<256x192xbf16>
    %c1_i32 = arith.constant 1 : i32
    %24 = arith.addi %15, %c1_i32 : i32
    %25 = arith.index_cast %24 : i32 to index
    %c0_32 = arith.constant 0 : index
    %c0_33 = arith.constant 0 : index
    %26 = vector.load %arg5[%25, %c0_32, %c0_33] : memref<18x18x64xbf16, #tpu.memory_space<vmem>>, vector<16x18x64xbf16>
    %27 = vector.extract_strided_slice %26 {offsets = [0, 0, 0], sizes = [16, 16, 64], strides = [1, 1, 1]} : vector<16x18x64xbf16> to vector<16x16x64xbf16>
    %28 = vector.extract_strided_slice %26 {offsets = [0, 1, 0], sizes = [16, 16, 64], strides = [1, 1, 1]} : vector<16x18x64xbf16> to vector<16x16x64xbf16>
    %29 = vector.extract_strided_slice %26 {offsets = [0, 2, 0], sizes = [16, 16, 64], strides = [1, 1, 1]} : vector<16x18x64xbf16> to vector<16x16x64xbf16>
    %30 = tpu.concatenate %27, %28, %29 in 2 : vector<16x16x64xbf16>, vector<16x16x64xbf16>, vector<16x16x64xbf16> -> vector<16x16x192xbf16>
    %31 = vector.shape_cast %30 : vector<16x16x192xbf16> to vector<256x192xbf16>
    %c2_i32 = arith.constant 2 : i32
    %32 = arith.addi %15, %c2_i32 : i32
    %33 = arith.index_cast %32 : i32 to index
    %c0_34 = arith.constant 0 : index
    %c0_35 = arith.constant 0 : index
    %34 = vector.load %arg5[%33, %c0_34, %c0_35] : memref<18x18x64xbf16, #tpu.memory_space<vmem>>, vector<16x18x64xbf16>
    %35 = vector.extract_strided_slice %34 {offsets = [0, 0, 0], sizes = [16, 16, 64], strides = [1, 1, 1]} : vector<16x18x64xbf16> to vector<16x16x64xbf16>
    %36 = vector.extract_strided_slice %34 {offsets = [0, 1, 0], sizes = [16, 16, 64], strides = [1, 1, 1]} : vector<16x18x64xbf16> to vector<16x16x64xbf16>
    %37 = vector.extract_strided_slice %34 {offsets = [0, 2, 0], sizes = [16, 16, 64], strides = [1, 1, 1]} : vector<16x18x64xbf16> to vector<16x16x64xbf16>
    %38 = tpu.concatenate %35, %36, %37 in 2 : vector<16x16x64xbf16>, vector<16x16x64xbf16>, vector<16x16x64xbf16> -> vector<16x16x192xbf16>
    %39 = vector.shape_cast %38 : vector<16x16x192xbf16> to vector<256x192xbf16>
    %c0_36 = arith.constant 0 : index
    %c0_37 = arith.constant 0 : index
    %c0_38 = arith.constant 0 : index
    %40 = vector.load %arg2[%c0_36, %c0_37, %c0_38] : memref<3x192x64xbf16, #tpu.memory_space<vmem>>, vector<1x192x64xbf16>
    %41 = vector.shape_cast %40 : vector<1x192x64xbf16> to vector<192x64xbf16>
    %cst_39 = arith.constant dense<0.000000e+00> : vector<256x64xf32>
    %42 = tpu.matmul %23, %41, %cst_39 {dimension_numbers = #tpu.dot_dimension_numbers<[1], [0], [0], [1], [0, 0, 1, 1], [], []>} : vector<256x192xbf16>, vector<192x64xbf16>, vector<256x64xf32> -> vector<256x64xf32>
    %c1_40 = arith.constant 1 : index
    %c0_41 = arith.constant 0 : index
    %c0_42 = arith.constant 0 : index
    %43 = vector.load %arg2[%c1_40, %c0_41, %c0_42] : memref<3x192x64xbf16, #tpu.memory_space<vmem>>, vector<1x192x64xbf16>
    %44 = vector.shape_cast %43 : vector<1x192x64xbf16> to vector<192x64xbf16>
    %cst_43 = arith.constant dense<0.000000e+00> : vector<256x64xf32>
    %45 = tpu.matmul %31, %44, %cst_43 {dimension_numbers = #tpu.dot_dimension_numbers<[1], [0], [0], [1], [0, 0, 1, 1], [], []>} : vector<256x192xbf16>, vector<192x64xbf16>, vector<256x64xf32> -> vector<256x64xf32>
    %46 = arith.addf %42, %45 : vector<256x64xf32>
    %c2 = arith.constant 2 : index
    %c0_44 = arith.constant 0 : index
    %c0_45 = arith.constant 0 : index
    %47 = vector.load %arg2[%c2, %c0_44, %c0_45] : memref<3x192x64xbf16, #tpu.memory_space<vmem>>, vector<1x192x64xbf16>
    %48 = vector.shape_cast %47 : vector<1x192x64xbf16> to vector<192x64xbf16>
    %cst_46 = arith.constant dense<0.000000e+00> : vector<256x64xf32>
    %49 = tpu.matmul %39, %48, %cst_46 {dimension_numbers = #tpu.dot_dimension_numbers<[1], [0], [0], [1], [0, 0, 1, 1], [], []>} : vector<256x192xbf16>, vector<192x64xbf16>, vector<256x64xf32> -> vector<256x64xf32>
    %50 = arith.addf %46, %49 : vector<256x64xf32>
    %51 = vector.shape_cast %50 : vector<256x64xf32> to vector<16x16x64xf32>
    %cst_47 = arith.constant 0.000000e+00 : f32
    %52 = vector.broadcast %cst_47 : f32 to vector<16x16x64xf32>
    %53 = arith.maximumf %51, %52 : vector<16x16x64xf32>
    %54 = arith.truncf %53 : vector<16x16x64xf32> to vector<16x16x64xbf16>
    %c1_i32_48 = arith.constant 1 : i32
    %55 = arith.addi %15, %c1_i32_48 : i32
    %56 = arith.index_cast %55 : i32 to index
    %c1_49 = arith.constant 1 : index
    %c0_50 = arith.constant 0 : index
    %57 = vector.load %arg6[%56, %c1_49, %c0_50] : memref<18x18x64xbf16, #tpu.memory_space<vmem>>, vector<16x16x64xbf16>
    tpu.vector_store %arg6[%56, %c1_49, %c0_50], %54 {strides = array<i32>} : memref<18x18x64xbf16, #tpu.memory_space<vmem>>, vector<16x16x64xbf16>,
    %c1_i32_51 = arith.constant 1 : i32
    %c0_i32_52 = arith.constant 0 : i32
    %c16_i32_53 = arith.constant 16 : i32
    %58 = arith.muli %c0_i32_52, %c16_i32_53 : i32
    %59 = tpu.assume_multiple %58, 16 : i32
    %c0_i32_54 = arith.constant 0 : i32
    %60 = arith.addi %59, %c0_i32_54 : i32
    %61 = arith.index_cast %60 : i32 to index
    %c0_55 = arith.constant 0 : index
    %c0_56 = arith.constant 0 : index
    %62 = vector.load %arg6[%61, %c0_55, %c0_56] : memref<18x18x64xbf16, #tpu.memory_space<vmem>>, vector<16x18x64xbf16>
    %63 = vector.extract_strided_slice %62 {offsets = [0, 0, 0], sizes = [16, 16, 64], strides = [1, 1, 1]} : vector<16x18x64xbf16> to vector<16x16x64xbf16>
    %64 = vector.extract_strided_slice %62 {offsets = [0, 1, 0], sizes = [16, 16, 64], strides = [1, 1, 1]} : vector<16x18x64xbf16> to vector<16x16x64xbf16>
    %65 = vector.extract_strided_slice %62 {offsets = [0, 2, 0], sizes = [16, 16, 64], strides = [1, 1, 1]} : vector<16x18x64xbf16> to vector<16x16x64xbf16>
    %66 = tpu.concatenate %63, %64, %65 in 2 : vector<16x16x64xbf16>, vector<16x16x64xbf16>, vector<16x16x64xbf16> -> vector<16x16x192xbf16>
    %67 = vector.shape_cast %66 : vector<16x16x192xbf16> to vector<256x192xbf16>
    %c1_i32_57 = arith.constant 1 : i32
    %68 = arith.addi %59, %c1_i32_57 : i32
    %69 = arith.index_cast %68 : i32 to index
    %c0_58 = arith.constant 0 : index
    %c0_59 = arith.constant 0 : index
    %70 = vector.load %arg6[%69, %c0_58, %c0_59] : memref<18x18x64xbf16, #tpu.memory_space<vmem>>, vector<16x18x64xbf16>
    %71 = vector.extract_strided_slice %70 {offsets = [0, 0, 0], sizes = [16, 16, 64], strides = [1, 1, 1]} : vector<16x18x64xbf16> to vector<16x16x64xbf16>
    %72 = vector.extract_strided_slice %70 {offsets = [0, 1, 0], sizes = [16, 16, 64], strides = [1, 1, 1]} : vector<16x18x64xbf16> to vector<16x16x64xbf16>
    %73 = vector.extract_strided_slice %70 {offsets = [0, 2, 0], sizes = [16, 16, 64], strides = [1, 1, 1]} : vector<16x18x64xbf16> to vector<16x16x64xbf16>
    %74 = tpu.concatenate %71, %72, %73 in 2 : vector<16x16x64xbf16>, vector<16x16x64xbf16>, vector<16x16x64xbf16> -> vector<16x16x192xbf16>
    %75 = vector.shape_cast %74 : vector<16x16x192xbf16> to vector<256x192xbf16>
    %c2_i32_60 = arith.constant 2 : i32
    %76 = arith.addi %59, %c2_i32_60 : i32
    %77 = arith.index_cast %76 : i32 to index
    %c0_61 = arith.constant 0 : index
    %c0_62 = arith.constant 0 : index
    %78 = vector.load %arg6[%77, %c0_61, %c0_62] : memref<18x18x64xbf16, #tpu.memory_space<vmem>>, vector<16x18x64xbf16>
    %79 = vector.extract_strided_slice %78 {offsets = [0, 0, 0], sizes = [16, 16, 64], strides = [1, 1, 1]} : vector<16x18x64xbf16> to vector<16x16x64xbf16>
    %80 = vector.extract_strided_slice %78 {offsets = [0, 1, 0], sizes = [16, 16, 64], strides = [1, 1, 1]} : vector<16x18x64xbf16> to vector<16x16x64xbf16>
    %81 = vector.extract_strided_slice %78 {offsets = [0, 2, 0], sizes = [16, 16, 64], strides = [1, 1, 1]} : vector<16x18x64xbf16> to vector<16x16x64xbf16>
    %82 = tpu.concatenate %79, %80, %81 in 2 : vector<16x16x64xbf16>, vector<16x16x64xbf16>, vector<16x16x64xbf16> -> vector<16x16x192xbf16>
    %83 = vector.shape_cast %82 : vector<16x16x192xbf16> to vector<256x192xbf16>
    %c0_63 = arith.constant 0 : index
    %c0_64 = arith.constant 0 : index
    %c0_65 = arith.constant 0 : index
    %84 = vector.load %arg3[%c0_63, %c0_64, %c0_65] : memref<3x192x64xbf16, #tpu.memory_space<vmem>>, vector<1x192x64xbf16>
    %85 = vector.shape_cast %84 : vector<1x192x64xbf16> to vector<192x64xbf16>
    %cst_66 = arith.constant dense<0.000000e+00> : vector<256x64xf32>
    %86 = tpu.matmul %67, %85, %cst_66 {dimension_numbers = #tpu.dot_dimension_numbers<[1], [0], [0], [1], [0, 0, 1, 1], [], []>} : vector<256x192xbf16>, vector<192x64xbf16>, vector<256x64xf32> -> vector<256x64xf32>
    %c1_67 = arith.constant 1 : index
    %c0_68 = arith.constant 0 : index
    %c0_69 = arith.constant 0 : index
    %87 = vector.load %arg3[%c1_67, %c0_68, %c0_69] : memref<3x192x64xbf16, #tpu.memory_space<vmem>>, vector<1x192x64xbf16>
    %88 = vector.shape_cast %87 : vector<1x192x64xbf16> to vector<192x64xbf16>
    %cst_70 = arith.constant dense<0.000000e+00> : vector<256x64xf32>
    %89 = tpu.matmul %75, %88, %cst_70 {dimension_numbers = #tpu.dot_dimension_numbers<[1], [0], [0], [1], [0, 0, 1, 1], [], []>} : vector<256x192xbf16>, vector<192x64xbf16>, vector<256x64xf32> -> vector<256x64xf32>
    %90 = arith.addf %86, %89 : vector<256x64xf32>
    %c2_71 = arith.constant 2 : index
    %c0_72 = arith.constant 0 : index
    %c0_73 = arith.constant 0 : index
    %91 = vector.load %arg3[%c2_71, %c0_72, %c0_73] : memref<3x192x64xbf16, #tpu.memory_space<vmem>>, vector<1x192x64xbf16>
    %92 = vector.shape_cast %91 : vector<1x192x64xbf16> to vector<192x64xbf16>
    %cst_74 = arith.constant dense<0.000000e+00> : vector<256x64xf32>
    %93 = tpu.matmul %83, %92, %cst_74 {dimension_numbers = #tpu.dot_dimension_numbers<[1], [0], [0], [1], [0, 0, 1, 1], [], []>} : vector<256x192xbf16>, vector<192x64xbf16>, vector<256x64xf32> -> vector<256x64xf32>
    %94 = arith.addf %90, %93 : vector<256x64xf32>
    %95 = vector.shape_cast %94 : vector<256x64xf32> to vector<16x16x64xf32>
    %c0_75 = arith.constant 0 : index
    %96 = arith.index_cast %59 : i32 to index
    %c0_76 = arith.constant 0 : index
    %c0_77 = arith.constant 0 : index
    %97 = vector.load %arg1[%c0_75, %96, %c0_76, %c0_77] : memref<1x16x16x64xf32, #tpu.memory_space<vmem>>, vector<1x16x16x64xf32>
    %98 = vector.shape_cast %97 : vector<1x16x16x64xf32> to vector<16x16x64xf32>
    %99 = arith.addf %95, %98 : vector<16x16x64xf32>
    %c0_78 = arith.constant 0 : index
    %100 = arith.index_cast %59 : i32 to index
    %c0_79 = arith.constant 0 : index
    %c0_80 = arith.constant 0 : index
    %101 = vector.load %arg4[%c0_78, %100, %c0_79, %c0_80] : memref<1x16x16x64xf32, #tpu.memory_space<vmem>>, vector<1x16x16x64xf32>
    %102 = vector.shape_cast %101 : vector<1x16x16x64xf32> to vector<16x16x64xf32>
    %103 = vector.shape_cast %99 : vector<16x16x64xf32> to vector<1x16x16x64xf32>
    tpu.vector_store %arg4[%c0_78, %100, %c0_79, %c0_80], %103 {strides = array<i32>} : memref<1x16x16x64xf32, #tpu.memory_space<vmem>>, vector<1x16x16x64xf32>,
    %c1_i32_81 = arith.constant 1 : i32
    return
  }
  func.func @transform_0(%arg0: i32) -> (i32, i32, i32, i32) {
    %c0_i32 = arith.constant 0 : i32
    %c0_i32_0 = arith.constant 0 : i32
    %c0_i32_1 = arith.constant 0 : i32
    %c0_i32_2 = arith.constant 0 : i32
    return %arg0, %c0_i32, %c0_i32_0, %c0_i32_1 : i32, i32, i32, i32
  }
  func.func @transform_1(%arg0: i32) -> (i32, i32, i32) {
    %c0_i32 = arith.constant 0 : i32
    %c0_i32_0 = arith.constant 0 : i32
    %c0_i32_1 = arith.constant 0 : i32
    %c0_i32_2 = arith.constant 0 : i32
    return %c0_i32, %c0_i32_0, %c0_i32_1 : i32, i32, i32
  }
  func.func @transform_2(%arg0: i32) -> (i32, i32, i32) {
    %c0_i32 = arith.constant 0 : i32
    %c0_i32_0 = arith.constant 0 : i32
    %c0_i32_1 = arith.constant 0 : i32
    %c0_i32_2 = arith.constant 0 : i32
    return %c0_i32, %c0_i32_0, %c0_i32_1 : i32, i32, i32
  }
  func.func @transform_3(%arg0: i32) -> (i32, i32, i32, i32) {
    %c0_i32 = arith.constant 0 : i32
    %c0_i32_0 = arith.constant 0 : i32
    %c0_i32_1 = arith.constant 0 : i32
    %c0_i32_2 = arith.constant 0 : i32
    return %arg0, %c0_i32, %c0_i32_0, %c0_i32_1 : i32, i32, i32, i32
  }
}

</mosaic_0001>

<bundles_post_ra>
// kernel: basic_block.1
= control target key start
LH: loop header
LB: loop body
LE: loop exit
PB: predicated region body
PF: predicated region fallthrough
CT: control target
= control target key end

     0   :  { %8 = vsyncpa [#allocation5], 0  ;;  %s9937_s0 = inlined_call_operand.vmem [shape: f32[2,16,16,64], index: 0, kind: input, shape index: {}]   ;;  %s9938_s1 = inlined_call_operand.vmem [shape: bf16[3,192,64], index: 1, kind: input, shape index: {}]   ;;  %s9939_s2 = inlined_call_operand.vmem [shape: bf16[3,192,64], index: 2, kind: input, shape index: {}]   ;;  %s9940_s3 = inlined_call_operand.hbm [shape: f32[2,16,16,64], index: 3, kind: output, shape index: {}]  }
   0x1   :  { %10 = vsyncpa [#allocation5 + $0x1], 0  ;;  %s7824_s12 = smov 0   ;;  %s7826_s13 = smov 0  }
   0x2   :  { %s7828_s14 = smov 0   ;;  %s7830_s15 = smov 0  }
   0x3 LB: > { %s7845_s16 = sadd.s32 4294967295, %s7797_s15   ;;  %s6582_s17 = sadd.s32 4294967294, %s7797_s15   ;;  %s7797_s15 = sphi %s7830_s15, %s9995_s15   ;;  %s7793_s14 = sphi %s7828_s14, %s9994_s14   ;;  %s7789_s13 = sphi %s7826_s13, %s9993_s13   ;;  %s7785_s12 = sphi %s7824_s12, %s9992_s12  }
   0x4   : > { %s7849_s18 = sadd.s32 1, %s7797_s15   ;;  %s91_s19 = sadd.s32 1, %s7793_s14 }
   0x5   : > { %s88_s20 = ssub.s32 %s7797_s15, %s7849_s18  ;;  %p101_p0 = scmp.ne.s32.totalorder %s7793_s14, %s7789_s13 }
   0x6   : > { %p89_p1 = scmp.eq.s32.totalorder %s88_s20, 0  ;;  %p102_p2 = scmp.eq.s32.totalorder %s7845_s16, 1 }
   0x7   : > { %p107_p3 = scmp.ne.s32.totalorder %s7789_s13, %s7785_s12  ;;  %p108_p4 = scmp.eq.s32.totalorder %s6582_s17, 1 }
   0x8   : > { %s7860_s21 = scalar_select %p89_p1, %s7793_s14, %s91_s19  }
   0x9   : > { %p7862_p5 = por %p102_p2, %p101_p0  ;;  %p7866_p6 = por %p108_p4, %p107_p3 }
   0xa   : > { %p6585_p7 = scmp.ge.s32.totalorder %s7797_s15, 1  ;;  %p140_p8 = scmp.lt.s32.totalorder %s7797_s15, 3 }
   0xc   : > { %p141_p9 = pnand %p6585_p7, %p140_p8 }
   0xe   : > { %144 = sbr.rel (%p141_p9) target bundleno = 1398 (0x576), region = 32 }
  0x15   : > { %p164_p10 = scmp.lt.s32.totalorder %s7845_s16, 1  ;;  %vm173_vm0 = vcmask 516096   ;;  %vm181_vm1 = vsmask.f32 256  ;;  %v183_v1 = vld [vmem:[#allocation2 + $0xc] sm:$0x1] }
  0x16   : > { %vm7875_vm2 = vmand %vm173_vm0, %vm181_vm1  ;;  %vm231_vm3 = vsmask.f32 7938  ;;  %v233_v2 = vld [vmem:[#allocation2 + $0x14] sm:$0x1]  ;;  %vm170_vm4 = vcmask 519168   ;;  %v9941_v11 = vmov 0  }
  0x17   : > { %s7880_s24 = scalar_select %p164_p10, %s7845_s16, 1  ;;  %v184_v3 = vsel %vm7875_vm2, 0, %v183_v1  ;;  %vm7886_vm5 = vmand %vm173_vm0, %vm231_vm3  ;;  %v186_v6 = vld [vmem:[#allocation2 + $0x18] sm:$0x1]  ;;  %v236_v7 = vld [vmem:[#allocation2 + $0x20] sm:$0x1]  ;;  %2620 = vmatprep.subr.bf16.mxu0 %v9941_v11  ;;  %5623 = vmatprep.subr.bf16.mxu1 %v9941_v11 }
  0x18   : > { %185 = vst [vmem:[#allocation2 + $0xc] sm:$0x1] %v184_v3  ;;  %v234_v5 = vsel %vm7886_vm5, 0, %v233_v2  ;;  %v187_v8 = vsel %vm7875_vm2, 0, %v186_v6  ;;  %v237_v9 = vsel %vm7886_vm5, 0, %v236_v7  ;;  %v7369_v12 = vld [vmem:[%s9938_s1 + $0x60] sm:$0xff]   ;;  %vm7960_vm8 = vmand %vm170_vm4, %vm231_vm3 }
  0x19   : > { %s7114_s25 = sshll.u32 %s7880_s24, 8  ;;  %235 = vst [vmem:[#allocation2 + $0x14] sm:$0x1] %v234_v5  ;;  %v189_v10 = vld [vmem:[#allocation2 + $0x24] sm:$0x1]  ;;  %v7370_v16 = vld [vmem:[%s9938_s1 + $0x68] sm:$0xff]   ;;  %2621 = vmatpush1.bf16.msra.mxu0 %v7369_v12 }
  0x1a   : > { %171 = vst.msk [vmem:[#allocation2] sm:$0xf] %vm170_vm4, %v9941_v11  ;;  %172 = vst.msk [vmem:[#allocation2 + $0x4] sm:$0xf] %vm170_vm4, %v9941_v11  ;;  %s7929_s30 = scalar_lea.vmem %s9937_s0, %s7114_s25  ;;  %v190_v13 = vsel %vm7875_vm2, 0, %v189_v10  ;;  %2622 = vmatprep.subr.bf16.mxu0 %v9941_v11  ;;  %s7800_s6 = smov 64  }
  0x1b   : > { %174 = vst.msk [vmem:[#allocation2 + $0x8] sm:$0x1] %vm173_vm0, %v9941_v11  ;;  %178 = vst.msk [vmem:[#allocation2 + $0xd4] sm:$0x1] %vm173_vm0, %v9941_v11  ;;  %v239_v14 = vld [vmem:[#allocation2 + $0x2c] sm:$0x1] }
  0x1c   : > { %176 = vst.msk [vmem:[#allocation2 + $0xcc] sm:$0xf] %vm170_vm4, %v9941_v11  ;;  %177 = vst.msk [vmem:[#allocation2 + $0xd0] sm:$0xf] %vm170_vm4, %v9941_v11  ;;  %v192_v15 = vld [vmem:[#allocation2 + $0x30] sm:$0x1] }
  0x1d   : > { %281 = vst.msk [vmem:[#allocation3] sm:$0xf] %vm170_vm4, %v9941_v11  ;;  %282 = vst.msk [vmem:[#allocation3 + $0x4] sm:$0xf] %vm170_vm4, %v9941_v11  ;;  %v385_v17 = vld [vmem:[%s7929_s30] sm:$0xff]  ;;  %v386_v18 = vld [vmem:[%s7929_s30 + $0x8] sm:$0xff]  ;;  %2623 = vmatpush1.bf16.msra.mxu0 %v7370_v16 }
  0x1e   : > { %283 = vst.msk [vmem:[#allocation3 + $0x8] sm:$0x1] %vm173_vm0, %v9941_v11  ;;  %287 = vst.msk [vmem:[#allocation3 + $0xd4] sm:$0x1] %vm173_vm0, %v9941_v11  ;;  %v387_v19 = vld [vmem:[%s7929_s30 + $0x10] sm:$0xff]  ;;  %v240_v20 = vsel %vm7886_vm5, 0, %v239_v14  ;;  %v7115_v22 = vpack.c.bf16 %v385_v17, %v385_v17  ;;  %v7116_v23 = vpack.c.bf16 %v386_v18, %v386_v18  ;;  %2624 = vmatprep.subr.bf16.mxu0 %v9941_v11 }
  0x1f   : > { %285 = vst.msk [vmem:[#allocation3 + $0xcc] sm:$0xf] %vm170_vm4, %v9941_v11  ;;  %286 = vst.msk [vmem:[#allocation3 + $0xd0] sm:$0xf] %vm170_vm4, %v9941_v11  ;;  %v193_v21 = vsel %vm7875_vm2, 0, %v192_v15  ;;  %v388_v24 = vld [vmem:[%s7929_s30 + $0x18] sm:$0xff]  ;;  %v7117_v25 = vpack.c.bf16 %v387_v19, %v387_v19 }
  0x20   : > { %188 = vst [vmem:[#allocation2 + $0x18] sm:$0x1] %v187_v8  ;;  %238 = vst [vmem:[#allocation2 + $0x20] sm:$0x1] %v237_v9  ;;  %v389_v26 = vld [vmem:[%s7929_s30 + $0x20] sm:$0xff]  ;;  %v390_v27 = vld [vmem:[%s7929_s30 + $0x28] sm:$0xff]  ;;  %v7118_v28 = vpack.c.bf16 %v388_v24, %v388_v24 }
  0x21   : > { %191 = vst [vmem:[#allocation2 + $0x24] sm:$0x1] %v190_v13  ;;  %241 = vst [vmem:[#allocation2 + $0x2c] sm:$0x1] %v240_v20  ;;  %vm513_vm6 = vsmask.f32 4368  ;;  %v7119_v29 = vpack.c.bf16 %v389_v26, %v389_v26  ;;  %v7947_v30 = vpack.c.bf16 %v390_v27, %v390_v27 }
  0x22   : > { %194 = vst [vmem:[#allocation2 + $0x30] sm:$0x1] %v193_v21  ;;  %v516_v31 = vshrl.u32 %v7115_v22, 16  ;;  %v519_v32 = vshll.u32 %v7115_v22, 16  ;;  %v524_v33 = vshrl.u32 %v7116_v23, 16  ;;  %v527_v34 = vshll.u32 %v7116_v23, 16  ;;  %vm7953_vm7 = vmor %vm181_vm1, %vm513_vm6 }
  0x23   : > { %v391_v35 = vld [vmem:[%s7929_s30 + $0x30] sm:$0xff]  ;;  %v392_v36 = vld [vmem:[%s7929_s30 + $0x38] sm:$0xff]  ;;  %v533_v37 = vshrl.u32 %v7117_v25, 16  ;;  %v536_v38 = vshll.u32 %v7117_v25, 16  ;;  %v541_v39 = vshrl.u32 %v7118_v28, 16  ;;  %v544_v40 = vshll.u32 %v7118_v28, 16 }
  0x24   : > { %v518_v42 = vrot.slane %v516_v31, 7  ;;  %v526_v43 = vrot.slane %v524_v33, 7  ;;  %v550_v44 = vshrl.u32 %v7119_v29, 16  ;;  %v553_v45 = vshll.u32 %v7119_v29, 16  ;;  %v837_v47 = vld [vmem:[#allocation2 + $0xc] sm:$0xf] }
  0x25   : > { %v841_v48 = vld [vmem:[#allocation2 + $0x14] sm:$0x1]  ;;  %v535_v49 = vrot.slane %v533_v37, 7  ;;  %v543_v50 = vrot.slane %v541_v39, 7  ;;  %v7964_v51 = vpack.c.bf16 %v391_v35, %v391_v35  ;;  %v7966_v52 = vpack.c.bf16 %v392_v36, %v392_v36  ;;  %v242_v63 = vld [vmem:[#allocation2 + $0x38] sm:$0x1] }
  0x26   : > { %v521_v53 = vor.u32 %v519_v32, %v518_v42  ;;  %v522_v54 = vrot.slane %v518_v42, 4  ;;  %v529_v55 = vor.u32 %v527_v34, %v526_v43  ;;  %v531_v56 = vrot.slane %v526_v43, 4  ;;  %v195_v6 = vld [vmem:[#allocation2 + $0x3c] sm:$0x1]  ;;  %v245_v13 = vld [vmem:[#allocation2 + $0x44] sm:$0x1] }
  0x27   : > { %v844_v57 = vld [vmem:[#allocation2 + $0x18] sm:$0xf]  ;;  %v848_v58 = vld [vmem:[#allocation2 + $0x20] sm:$0x1]  ;;  %v538_v59 = vor.u32 %v536_v38, %v535_v49  ;;  %v539_v60 = vrot.slane %v535_v49, 4  ;;  %v546_v61 = vor.u32 %v544_v40, %v543_v50  ;;  %v548_v62 = vrot.slane %v543_v50, 4 }
  0x28   : > { %v530_v1 = vsel %vm7953_vm7, %v522_v54, %v529_v55  ;;  %v838_v2 = vsel %vm7960_vm8, %v521_v53, %v837_v47  ;;  %v842_v3 = vsel %vm7875_vm2, %v531_v56, %v841_v48  ;;  %v552_v5 = vrot.slane %v550_v44, 7  ;;  %v851_v12 = vld [vmem:[#allocation2 + $0x24] sm:$0xf]  ;;  %v198_v18 = vld [vmem:[#allocation2 + $0x48] sm:$0x1]  ;;  %v395_v38 = vld [vmem:[%s7929_s30 + $0x50] sm:$0xff] }
  0x29   : > { %839 = vst [vmem:[#allocation2 + $0xc] sm:$0xf] %v838_v2  ;;  %840 = vst.msk [vmem:[#allocation2 + $0x10] sm:$0xf] %vm170_vm4, %v530_v1  ;;  %v547_v7 = vsel %vm7953_vm7, %v539_v60, %v546_v61  ;;  %v845_v8 = vsel %vm7960_vm8, %v538_v59, %v844_v57  ;;  %v849_v9 = vsel %vm7875_vm2, %v548_v62, %v848_v58  ;;  %v558_v10 = vshrl.u32 %v7947_v30, 16  ;;  %v393_v34 = vld [vmem:[%s7929_s30 + $0x40] sm:$0xff] }
  0x2a   : > { %843 = vst [vmem:[#allocation2 + $0x14] sm:$0x1] %v842_v3  ;;  %846 = vst [vmem:[#allocation2 + $0x18] sm:$0xf] %v845_v8  ;;  %v555_v14 = vor.u32 %v553_v45, %v552_v5  ;;  %v556_v15 = vrot.slane %v552_v5, 4  ;;  %v561_v16 = vshll.u32 %v7947_v30, 16  ;;  %v8015_v57 = vpack.c.bf16 %v395_v38, %v395_v38 }
  0x2b   : > { %847 = vst.msk [vmem:[#allocation2 + $0x1c] sm:$0xf] %vm170_vm4, %v547_v7  ;;  %850 = vst [vmem:[#allocation2 + $0x20] sm:$0x1] %v849_v9  ;;  %v243_v17 = vsel %vm7886_vm5, 0, %v242_v63  ;;  %v560_v19 = vrot.slane %v558_v10, 7 }
  0x2c   : > { %244 = vst [vmem:[#allocation2 + $0x38] sm:$0x1] %v243_v17  ;;  %v567_v20 = vshrl.u32 %v7964_v51, 16  ;;  %v570_v21 = vshll.u32 %v7964_v51, 16  ;;  %v575_v22 = vshrl.u32 %v7966_v52, 16  ;;  %v852_v24 = vsel %vm7960_vm8, %v555_v14, %v851_v12  ;;  %v394_v35 = vld [vmem:[%s7929_s30 + $0x48] sm:$0xff] }
  0x2d   : > { %v248_v23 = vld [vmem:[#allocation2 + $0x50] sm:$0x1]  ;;  %v855_v25 = vld [vmem:[#allocation2 + $0x2c] sm:$0x1]  ;;  %v578_v26 = vshll.u32 %v7966_v52, 16  ;;  %v196_v27 = vsel %vm7875_vm2, 0, %v195_v6  ;;  %v563_v29 = vor.u32 %v561_v16, %v560_v19  ;;  %v7123_v52 = vpack.c.bf16 %v393_v34, %v393_v34 }
  0x2e   : > { %v246_v28 = vsel %vm7886_vm5, 0, %v245_v13  ;;  %v565_v30 = vrot.slane %v560_v19, 4  ;;  %853 = vst [vmem:[#allocation2 + $0x24] sm:$0xf] %v852_v24  ;;  %v569_v31 = vrot.slane %v567_v20, 7  ;;  %v577_v32 = vrot.slane %v575_v22, 7 }
  0x2f   : > { %v858_v33 = vld [vmem:[#allocation2 + $0x30] sm:$0xf]  ;;  %197 = vst [vmem:[#allocation2 + $0x3c] sm:$0x1] %v196_v27  ;;  %247 = vst [vmem:[#allocation2 + $0x44] sm:$0x1] %v246_v28  ;;  %v564_v40 = vsel %vm7953_vm7, %v556_v15, %v563_v29  ;;  %v7124_v56 = vpack.c.bf16 %v394_v35, %v394_v35 }
  0x30   : > { %vm1128_vm9 = vsmask.f32 7424  ;;  %v199_v36 = vsel %vm7875_vm2, 0, %v198_v18  ;;  %v249_v37 = vsel %vm7886_vm5, 0, %v248_v23  ;;  %v396_v39 = vld [vmem:[%s7929_s30 + $0x58] sm:$0xff]  ;;  %v856_v42 = vsel %vm7875_vm2, %v565_v30, %v855_v25  ;;  %v397_v45 = vld [vmem:[%s7929_s30 + $0x60] sm:$0xff] }
  0x31   : > { %v572_v43 = vor.u32 %v570_v21, %v569_v31  ;;  %v573_v44 = vrot.slane %v569_v31, 4  ;;  %200 = vst [vmem:[#allocation2 + $0x48] sm:$0x1] %v199_v36  ;;  %250 = vst [vmem:[#allocation2 + $0x50] sm:$0x1] %v249_v37  ;;  %v398_v47 = vld [vmem:[%s7929_s30 + $0x68] sm:$0xff]  ;;  %v580_v48 = vor.u32 %v578_v26, %v577_v32  ;;  %v8020_v1 = vpack.c.bf16 %v396_v39, %v396_v39 }
  0x32   : > { %854 = vst.msk [vmem:[#allocation2 + $0x28] sm:$0xf] %vm170_vm4, %v564_v40  ;;  %857 = vst [vmem:[#allocation2 + $0x2c] sm:$0x1] %v856_v42  ;;  %v7351_v49 = vld [vmem:[#allocation2 + $0xc] sm:$0xff]   ;;  %v7353_v53 = vld [vmem:[#allocation2 + $0x18] sm:$0xff]   ;;  %v8022_v6 = vpack.c.bf16 %v397_v45, %v397_v45  ;;  %v8024_v7 = vpack.c.bf16 %v398_v47, %v398_v47 }
  0x33   : > { %v7352_v50 = vld [vmem:[#allocation2 + $0x14] ss:$0 sps:$4 sm:$0x11]   ;;  %v859_v51 = vsel %vm7960_vm8, %v572_v43, %v858_v33  ;;  %v581_v54 = vsel %vm7953_vm7, %v573_v44, %v580_v48  ;;  %v582_v55 = vrot.slane %v577_v32, 4  ;;  %v400_v59 = vld [vmem:[%s7929_s30 + $0x78] sm:$0xff]  ;;  %v1632_v60 = vshrl.u32 %v7351_v49, 16 }
  0x34   : > { %860 = vst [vmem:[#allocation2 + $0x30] sm:$0xf] %v859_v51  ;;  %v399_v58 = vld [vmem:[%s7929_s30 + $0x70] sm:$0xff]  ;;  %v1634_v61 = vshll.u32 %v7351_v49, 16  ;;  %v1639_v62 = vshll.u32 %v7352_v50, 16  ;;  %v1644_v2 = vshrl.u32 %v7353_v53, 16  ;;  %v8030_v22 = vpack.c.bf16 %v400_v59, %v400_v59 }
  0x35   : > { %v7354_v63 = vld [vmem:[#allocation2 + $0x20] ss:$0 sps:$4 sm:$0x11]   ;;  %861 = vst.msk [vmem:[#allocation2 + $0x34] sm:$0xf] %vm170_vm4, %v581_v54  ;;  %v1646_v3 = vshll.u32 %v7353_v53, 16  ;;  %v8028_v21 = vpack.c.bf16 %v399_v58, %v399_v58 }
  0x36   : > { %v862_v5 = vld [vmem:[#allocation2 + $0x38] sm:$0x1]  ;;  %v1636_v8 = vrot.slane %v1634_v61, 1  ;;  %v1641_v9 = vrot.slane %v1639_v62, 1  ;;  %v1651_v10 = vshll.u32 %v7354_v63, 16  ;;  %v584_v14 = vshrl.u32 %v7123_v52, 16 }
  0x37   : > { %v863_v12 = vsel %vm7875_vm2, %v582_v55, %v862_v5  ;;  %v1648_v13 = vrot.slane %v1646_v3, 1  ;;  %v587_v15 = vshll.u32 %v7123_v52, 16  ;;  %v592_v16 = vshrl.u32 %v7124_v56, 16  ;;  %v865_v20 = vld [vmem:[#allocation2 + $0x3c] sm:$0xf]  ;;  %v7373_v39 = vld [vmem:[%s9938_s1 + $0x70] sm:$0xff]  }
  0x38   : > { %864 = vst [vmem:[#allocation2 + $0x38] sm:$0x1] %v863_v12  ;;  %v1637_v17 = vor.u32 %v1636_v8, %v1632_v60  ;;  %v1653_v18 = vrot.slane %v1651_v10, 1  ;;  %v586_v25 = vrot.slane %v584_v14, 7  ;;  %v595_v27 = vshll.u32 %v7124_v56, 16  ;;  %2625 = vmatpush1.bf16.msra.mxu0 %v7373_v39  ;;  %v7374_v52 = vld [vmem:[%s9938_s1 + $0x78] sm:$0xff]  }
  0x39   : > { %v7355_v19 = vld [vmem:[#allocation2 + $0x24] sm:$0xff]   ;;  %v1649_v23 = vor.u32 %v1648_v13, %v1644_v2  ;;  %v7356_v24 = vld [vmem:[#allocation2 + $0x2c] ss:$0 sps:$4 sm:$0x11]   ;;  %v594_v26 = vrot.slane %v592_v16, 7  ;;  %v601_v32 = vshrl.u32 %v8015_v57, 16  ;;  %2626 = vmatprep.subr.bf16.mxu0 %v9941_v11 }
  0x3a   : > { %v869_v28 = vld [vmem:[#allocation2 + $0x44] sm:$0x1]  ;;  %v1642_v29 = vsel %vm1128_vm9, %v1637_v17, %v1641_v9  ;;  %v1656_v30 = vshrl.u32 %v7355_v19, 16  ;;  %v1658_v31 = vshll.u32 %v7355_v19, 16  ;;  %v1663_v34 = vshll.u32 %v7356_v24, 16  ;;  %s161_s27 = sand.u32 1, %s7789_s13  }
  0x3b   : > { %1823 = vrot.lane.b32.xlu0 %v1642_v29, %s7800_s6  ;;  %v1654_v33 = vsel %vm1128_vm9, %v1649_v23, %v1653_v18  ;;  %v589_v36 = vor.u32 %v587_v15, %v586_v25  ;;  %v590_v37 = vrot.slane %v586_v25, 4  ;;  %v201_v38 = vld [vmem:[#allocation2 + $0x54] sm:$0x1]  ;;  %v597_v42 = vor.u32 %v595_v27, %v594_v26  ;;  %v251_v45 = vld [vmem:[#allocation2 + $0x5c] sm:$0x1]  ;;  %v7377_v18 = vld [vmem:[%s9938_s1 + $0x80] sm:$0xff]  }
  0x3c   : > { %v7357_v35 = vld [vmem:[#allocation2 + $0x30] sm:$0xff]   ;;  %v1660_v40 = vrot.slane %v1658_v31, 1  ;;  %v599_v43 = vrot.slane %v594_v26, 4  ;;  %v603_v44 = vrot.slane %v601_v32, 7  ;;  %v1665_v47 = vrot.slane %v1663_v34, 1  ;;  %2627 = vmatpush1.bf16.msra.mxu0 %v7374_v52  ;;  %v401_v25 = vld [vmem:[%s7929_s30 + $0x80] sm:$0xff] }
  0x3d   : > { %v1668_v48 = vshrl.u32 %v7357_v35, 16  ;;  %v1670_v49 = vshll.u32 %v7357_v35, 16  ;;  %v866_v50 = vsel %vm7960_vm8, %v589_v36, %v865_v20  ;;  %v872_v51 = vld [vmem:[#allocation2 + $0x48] sm:$0xf]  ;;  %v598_v55 = vsel %vm7953_vm7, %v590_v37, %v597_v42  ;;  %v204_v63 = vld [vmem:[#allocation2 + $0x60] sm:$0x1]  ;;  %2628 = vmatprep.subr.bf16.mxu0 %v9941_v11 }
  0x3e   : > { %v1661_v53 = vor.u32 %v1660_v40, %v1656_v30  ;;  %867 = vst [vmem:[#allocation2 + $0x3c] sm:$0xf] %v866_v50  ;;  %v870_v56 = vsel %vm7875_vm2, %v599_v43, %v869_v28  ;;  %v604_v58 = vshll.u32 %v8015_v57, 16  ;;  %868 = vst.msk [vmem:[#allocation2 + $0x40] sm:$0xf] %vm170_vm4, %v598_v55  ;;  %v607_v60 = vrot.slane %v603_v44, 4 }
  0x3f   : > { %v7358_v54 = vld [vmem:[#allocation2 + $0x38] ss:$0 sps:$4 sm:$0x11]   ;;  %1825 = vrot.lane.b32.xlu0 %v1654_v33, %s7800_s6  ;;  %v1672_v59 = vrot.slane %v1670_v49, 1  ;;  %871 = vst [vmem:[#allocation2 + $0x44] sm:$0x1] %v870_v56  ;;  %v8086_v39 = vpack.c.bf16 %v401_v25, %v401_v25 }
  0x40   : > { %v609_v61 = vshrl.u32 %v8020_v1, 16  ;;  %v612_v62 = vshll.u32 %v8020_v1, 16  ;;  %v1666_v2 = vsel %vm1128_vm9, %v1661_v53, %v1665_v47  ;;  %v1675_v3 = vshll.u32 %v7358_v54, 16  ;;  %v254_v1 = vld [vmem:[#allocation2 + $0x68] sm:$0x1]  ;;  %2629 = vmatpush1.bf16.msra.mxu0 %v7377_v18  ;;  %v7381_v56 = vld [vmem:[%s9938_s1 + $0x90] sm:$0xff]  }
  0x41   : > { %v606_v5 = vor.u32 %v604_v58, %v603_v44  ;;  %v202_v57 = vsel %vm7875_vm2, 0, %v201_v38  ;;  %1827 = vrot.lane.b32.xlu1 %v1666_v2, %s7800_s6  ;;  %v1673_v8 = vor.u32 %v1672_v59, %v1668_v48  ;;  %v252_v10 = vsel %vm7886_vm5, 0, %v251_v45  ;;  %v876_v15 = vld [vmem:[#allocation2 + $0x50] sm:$0x1]  ;;  %v402_v29 = vld [vmem:[%s7929_s30 + $0x88] sm:$0xff]  ;;  %2630 = vmatprep.subr.bf16.mxu0 %v9941_v11  ;;  %v7517_v4 = vld [vmem:[%s9939_s2 + $0xa0] sm:$0xff]  }
  0x42   : > { %v611_v9 = vrot.slane %v609_v61, 7  ;;  %203 = vst [vmem:[#allocation2 + $0x54] sm:$0x1] %v202_v57  ;;  %v618_v12 = vshrl.u32 %v8022_v6, 16  ;;  %v1677_v13 = vrot.slane %v1675_v3, 1  ;;  %v621_v16 = vshll.u32 %v8022_v6, 16 }
  0x43   : > { %v873_v14 = vsel %vm7960_vm8, %v606_v5, %v872_v51  ;;  %253 = vst [vmem:[#allocation2 + $0x5c] sm:$0x1] %v252_v10  ;;  %v626_v17 = vshrl.u32 %v8024_v7, 16  ;;  %v629_v24 = vshll.u32 %v8024_v7, 16  ;;  %v205_v6 = vsel %vm7875_vm2, 0, %v204_v63  ;;  %v7378_v35 = vld [vmem:[%s9938_s1 + $0x88] sm:$0xff]  }
  0x44   : > { %v614_v19 = vor.u32 %v612_v62, %v611_v9  ;;  %v616_v20 = vrot.slane %v611_v9, 4  ;;  %874 = vst [vmem:[#allocation2 + $0x48] sm:$0xf] %v873_v14  ;;  %v620_v23 = vrot.slane %v618_v12, 7  ;;  %v1678_v26 = vsel %vm1128_vm9, %v1673_v8, %v1677_v13  ;;  %206 = vst [vmem:[#allocation2 + $0x60] sm:$0x1] %v205_v6  ;;  %2631 = vmatpush1.bf16.msra.mxu0 %v7378_v35 }
  0x45   : > { %v628_v27 = vrot.slane %v626_v17, 7  ;;  %v255_v28 = vsel %vm7886_vm5, 0, %v254_v1  ;;  %1829 = vrot.lane.b32.xlu1 %v1678_v26, %s7800_s6  ;;  %v207_v33 = vld [vmem:[#allocation2 + $0x6c] sm:$0x1]  ;;  %v257_v34 = vld [vmem:[#allocation2 + $0x74] sm:$0x1]  ;;  %v8092_v45 = vpack.c.bf16 %v402_v29, %v402_v29  ;;  %2632 = vmatprep.subr.bf16.mxu0 %v9941_v11 }
  0x46   : > { %v615_v30 = vsel %vm7953_vm7, %v607_v60, %v614_v19  ;;  %v877_v31 = vsel %vm7875_vm2, %v616_v20, %v876_v15  ;;  %v623_v7 = vor.u32 %v621_v16, %v620_v23  ;;  %v624_v32 = vrot.slane %v620_v23, 4  ;;  %256 = vst [vmem:[#allocation2 + $0x68] sm:$0x1] %v255_v28  ;;  %v7359_v36 = vld [vmem:[#allocation2 + $0x3c] sm:$0xff]   ;;  %v210_v61 = vld [vmem:[#allocation2 + $0x78] sm:$0x1] }
  0x47   : > { %875 = vst.msk [vmem:[#allocation2 + $0x4c] sm:$0xf] %vm170_vm4, %v615_v30  ;;  %878 = vst [vmem:[#allocation2 + $0x50] sm:$0x1] %v877_v31  ;;  %v631_v37 = vor.u32 %v629_v24, %v628_v27  ;;  %v633_v38 = vrot.slane %v628_v27, 4  ;;  %v635_v42 = vshrl.u32 %v8028_v21, 16 }
  0x48   : > { %v7360_v40 = vld [vmem:[#allocation2 + $0x44] ss:$0 sps:$4 sm:$0x11]   ;;  %v638_v43 = vshll.u32 %v8028_v21, 16  ;;  %v643_v44 = vshrl.u32 %v8030_v22, 16  ;;  %v1680_v47 = vshrl.u32 %v7359_v36, 16  ;;  %2633 = vmatpush1.bf16.msra.mxu0 %v7381_v56 }
  0x49   : > { %v1682_v48 = vshll.u32 %v7359_v36, 16  ;;  %v632_v49 = vsel %vm7953_vm7, %v624_v32, %v631_v37  ;;  %v879_v50 = vld [vmem:[#allocation2 + $0x54] sm:$0xf]  ;;  %v646_v51 = vshll.u32 %v8030_v22, 16  ;;  %v1687_v52 = vshll.u32 %v7360_v40, 16  ;;  %v7382_v57 = vld [vmem:[%s9938_s1 + $0x98] sm:$0xff]   ;;  %2634 = vmatprep.subr.bf16.mxu0 %v9941_v11 }
  0x4a   : > { %v880_v53 = vsel %vm7960_vm8, %v623_v7, %v879_v50  ;;  %882 = vst.msk [vmem:[#allocation2 + $0x58] sm:$0xf] %vm170_vm4, %v632_v49  ;;  %v883_v21 = vld [vmem:[#allocation2 + $0x5c] sm:$0x1]  ;;  %v637_v54 = vrot.slane %v635_v42, 7  ;;  %v645_v55 = vrot.slane %v643_v44, 7 }
  0x4b   : > { %v1684_v58 = vrot.slane %v1682_v48, 1  ;;  %881 = vst [vmem:[#allocation2 + $0x54] sm:$0xf] %v880_v53  ;;  %v884_v59 = vsel %vm7875_vm2, %v633_v38, %v883_v21  ;;  %v208_v22 = vsel %vm7875_vm2, 0, %v207_v33  ;;  %v258_v60 = vsel %vm7886_vm5, 0, %v257_v34  ;;  %v403_v62 = vld [vmem:[%s7929_s30 + $0x90] sm:$0xff] }
  0x4c   : > { %v1689_v63 = vrot.slane %v1687_v52, 1  ;;  %885 = vst [vmem:[#allocation2 + $0x5c] sm:$0x1] %v884_v59  ;;  %v640_v2 = vor.u32 %v638_v43, %v637_v54  ;;  %v641_v3 = vrot.slane %v637_v54, 4  ;;  %v648_v5 = vor.u32 %v646_v51, %v645_v55  ;;  %209 = vst [vmem:[#allocation2 + $0x6c] sm:$0x1] %v208_v22  ;;  %2635 = vmatpush1.bf16.msra.mxu0 %v7382_v57 }
  0x4d   : > { %259 = vst [vmem:[#allocation2 + $0x74] sm:$0x1] %v258_v60  ;;  %v1685_v8 = vor.u32 %v1684_v58, %v1680_v47  ;;  %v650_v9 = vrot.slane %v645_v55, 4  ;;  %v886_v10 = vld [vmem:[#allocation2 + $0x60] sm:$0xf]  ;;  %v652_v1 = vshrl.u32 %v8086_v39, 16  ;;  %v8120_v18 = vpack.c.bf16 %v403_v62, %v403_v62  ;;  %2636 = vmatprep.subr.bf16.mxu0 %v9941_v11 }
  0x4e   : > { %v890_v12 = vld [vmem:[#allocation2 + $0x68] sm:$0x1]  ;;  %v260_v13 = vld [vmem:[#allocation2 + $0x80] sm:$0x1]  ;;  %v649_v15 = vsel %vm7953_vm7, %v641_v3, %v648_v5  ;;  %v887_v16 = vsel %vm7960_vm8, %v640_v2, %v886_v10  ;;  %v655_v17 = vshll.u32 %v8086_v39, 16  ;;  %v660_v25 = vshrl.u32 %v8092_v45, 16 }
  0x4f   : > { %v7361_v14 = vld [vmem:[#allocation2 + $0x48] sm:$0xff]   ;;  %v1690_v19 = vsel %vm1128_vm9, %v1685_v8, %v1689_v63  ;;  %v7362_v20 = vld [vmem:[#allocation2 + $0x50] ss:$0 sps:$4 sm:$0x11]   ;;  %888 = vst [vmem:[#allocation2 + $0x60] sm:$0xf] %v887_v16  ;;  %v891_v23 = vsel %vm7875_vm2, %v650_v9, %v890_v12 }
  0x50   : > { %889 = vst.msk [vmem:[#allocation2 + $0x64] sm:$0xf] %vm170_vm4, %v649_v15  ;;  %v654_v24 = vrot.slane %v652_v1, 7  ;;  %1831 = vrot.lane.b32.xlu0 %v1690_v19, %s7800_s6  ;;  %v1692_v26 = vshrl.u32 %v7361_v14, 16  ;;  %v1694_v27 = vshll.u32 %v7361_v14, 16  ;;  %v663_v6 = vshll.u32 %v8092_v45, 16 }
  0x51   : > { %892 = vst [vmem:[#allocation2 + $0x68] sm:$0x1] %v891_v23  ;;  %v211_v28 = vsel %vm7875_vm2, 0, %v210_v61  ;;  %v404_v29 = vld [vmem:[%s7929_s30 + $0x98] sm:$0xff]  ;;  %v1699_v30 = vshll.u32 %v7362_v20, 16  ;;  %v662_v32 = vrot.slane %v660_v25, 7 }
  0x52   : > { %v657_v31 = vor.u32 %v655_v17, %v654_v24  ;;  %v658_v7 = vrot.slane %v654_v24, 4  ;;  %212 = vst [vmem:[#allocation2 + $0x78] sm:$0x1] %v211_v28  ;;  %v7385_v33 = vld [vmem:[%s9938_s1 + $0xa0] sm:$0xff]   ;;  %v1696_v34 = vrot.slane %v1694_v27, 1  ;;  %v7363_v35 = vld [vmem:[#allocation2 + $0x54] sm:$0xff]   ;;  %v8141_v44 = vpack.c.bf16 %v404_v29, %v404_v29 }
  0x53   : > { %v261_v36 = vsel %vm7886_vm5, 0, %v260_v13  ;;  %v669_v37 = vshrl.u32 %v8120_v18, 16  ;;  %v405_v38 = vld [vmem:[%s7929_s30 + $0xa0] sm:$0xff]  ;;  %v406_v39 = vld [vmem:[%s7929_s30 + $0xa8] sm:$0xff]  ;;  %v1701_v40 = vrot.slane %v1699_v30, 1  ;;  %v665_v43 = vor.u32 %v663_v6, %v662_v32  ;;  %2637 = vmatpush1.bf16.msra.mxu0 %v7385_v33  ;;  %v407_v12 = vld [vmem:[%s7929_s30 + $0xb0] sm:$0xff] }
  0x54   : > { %v7364_v42 = vld [vmem:[#allocation2 + $0x5c] ss:$0 sps:$4 sm:$0x11]   ;;  %262 = vst [vmem:[#allocation2 + $0x80] sm:$0x1] %v261_v36  ;;  %v1697_v45 = vor.u32 %v1696_v34, %v1692_v26  ;;  %v1704_v47 = vshrl.u32 %v7363_v35, 16  ;;  %v7135_v2 = vpack.c.bf16 %v405_v38, %v405_v38  ;;  %v8158_v3 = vpack.c.bf16 %v406_v39, %v406_v39  ;;  %2638 = vmatprep.subr.bf16.mxu0 %v9941_v11 }
  0x55   : > { %v1706_v48 = vshll.u32 %v7363_v35, 16  ;;  %v667_v49 = vrot.slane %v662_v32, 4  ;;  %v893_v50 = vld [vmem:[#allocation2 + $0x6c] sm:$0xf]  ;;  %v1711_v52 = vshll.u32 %v7364_v42, 16  ;;  %v666_v53 = vsel %vm7953_vm7, %v658_v7, %v665_v43  ;;  %v408_v1 = vld [vmem:[%s7929_s30 + $0xb8] sm:$0xff] }
  0x56   : > { %v7386_v51 = vld [vmem:[%s9938_s1 + $0xa8] sm:$0xff]   ;;  %v894_v21 = vsel %vm7960_vm8, %v657_v31, %v893_v50  ;;  %v897_v54 = vld [vmem:[#allocation2 + $0x74] sm:$0x1]  ;;  %v8151_v55 = vrot.slane %v669_v37, 7  ;;  %v213_v56 = vld [vmem:[#allocation2 + $0x84] sm:$0x1]  ;;  %v1702_v58 = vsel %vm1128_vm9, %v1697_v45, %v1701_v40  ;;  %v7137_v37 = vpack.c.bf16 %v407_v12, %v407_v12 }
  0x57   : > { %v1708_v59 = vrot.slane %v1706_v48, 1  ;;  %v7365_v22 = vld [vmem:[#allocation2 + $0x60] sm:$0xff]   ;;  %895 = vst [vmem:[#allocation2 + $0x6c] sm:$0xf] %v894_v21  ;;  %896 = vst.msk [vmem:[#allocation2 + $0x70] sm:$0xf] %vm170_vm4, %v666_v53  ;;  %v898_v60 = vsel %vm7875_vm2, %v667_v49, %v897_v54  ;;  %1833 = vrot.lane.b32.xlu1 %v1702_v58, %s7800_s6  ;;  %2639 = vmatpush1.bf16.msra.mxu0 %v7386_v51  ;;  %v7138_v38 = vpack.c.bf16 %v408_v1, %v408_v1 }
  0x58   : > { %v263_v61 = vld [vmem:[#allocation2 + $0x8c] sm:$0x1]  ;;  %v1713_v62 = vrot.slane %v1711_v52, 1  ;;  %v7366_v63 = vld [vmem:[#allocation2 + $0x68] ss:$0 sps:$4 sm:$0x11]   ;;  %2640 = vmatprep.subr.bf16.mxu0 %v9941_v11 }
  0x59   : > { %899 = vst [vmem:[#allocation2 + $0x74] sm:$0x1] %v898_v60  ;;  %v1709_v5 = vor.u32 %v1708_v59, %v1704_v47  ;;  %v1716_v57 = vshrl.u32 %v7365_v22, 16  ;;  %v1718_v8 = vshll.u32 %v7365_v22, 16  ;;  %v672_v9 = vshll.u32 %v8120_v18, 16  ;;  %v409_v17 = vld [vmem:[%s7929_s30 + $0xc0] sm:$0xff] }
  0x5a   : > { %v900_v10 = vld [vmem:[#allocation2 + $0x78] sm:$0xf]  ;;  %v1723_v13 = vshll.u32 %v7366_v63, 16  ;;  %v675_v14 = vrot.slane %v8151_v55, 4  ;;  %v677_v15 = vshrl.u32 %v8141_v44, 16  ;;  %v680_v16 = vshll.u32 %v8141_v44, 16 }
  0x5b   : > { %v410_v19 = vld [vmem:[%s7929_s30 + $0xc8] sm:$0xff]  ;;  %v1714_v20 = vsel %vm1128_vm9, %v1709_v5, %v1713_v62  ;;  %v1720_v23 = vrot.slane %v1718_v8, 1  ;;  %v674_v24 = vor.u32 %v672_v9, %v8151_v55  ;;  %v904_v25 = vld [vmem:[#allocation2 + $0x80] sm:$0x1]  ;;  %v214_v18 = vsel %vm7875_vm2, 0, %v213_v56  ;;  %v411_v62 = vld [vmem:[%s7929_s30 + $0xd0] sm:$0xff] }
  0x5c   : > { %1835 = vrot.lane.b32.xlu0 %v1714_v20, %s7800_s6  ;;  %v1725_v26 = vrot.slane %v1723_v13, 1  ;;  %v679_v27 = vrot.slane %v677_v15, 7  ;;  %215 = vst [vmem:[#allocation2 + $0x84] sm:$0x1] %v214_v18  ;;  %v264_v6 = vsel %vm7886_vm5, 0, %v263_v61  ;;  %v686_v28 = vshrl.u32 %v7135_v2, 16 }
  0x5d   : > { %v1721_v29 = vor.u32 %v1720_v23, %v1716_v57  ;;  %v901_v30 = vsel %vm7960_vm8, %v674_v24, %v900_v10  ;;  %265 = vst [vmem:[#allocation2 + $0x8c] sm:$0x1] %v264_v6  ;;  %v689_v31 = vshll.u32 %v7135_v2, 16  ;;  %v694_v7 = vshrl.u32 %v8158_v3, 16  ;;  %v216_v32 = vld [vmem:[#allocation2 + $0x90] sm:$0x1] }
  0x5e   : > { %v266_v33 = vld [vmem:[#allocation2 + $0x98] sm:$0x1]  ;;  %v7367_v34 = vld [vmem:[#allocation2 + $0x6c] sm:$0xff]   ;;  %v682_v35 = vor.u32 %v680_v16, %v679_v27  ;;  %v684_v36 = vrot.slane %v679_v27, 4  ;;  %902 = vst [vmem:[#allocation2 + $0x78] sm:$0xf] %v901_v30  ;;  %v8181_v43 = vpack.c.bf16 %v409_v17, %v409_v17  ;;  %v8183_v44 = vpack.c.bf16 %v410_v19, %v410_v19 }
  0x5f   : > { %v1726_v39 = vsel %vm1128_vm9, %v1721_v29, %v1725_v26  ;;  %v688_v42 = vrot.slane %v686_v28, 7  ;;  %v1728_v45 = vshrl.u32 %v7367_v34, 16  ;;  %v1730_v47 = vshll.u32 %v7367_v34, 16  ;;  %v219_v8 = vld [vmem:[#allocation2 + $0x9c] sm:$0x1]  ;;  %v7389_v9 = vld [vmem:[%s9938_s1 + $0xb0] sm:$0xff]  }
  0x60   : > { %v7368_v40 = vld [vmem:[#allocation2 + $0x74] ss:$0 sps:$4 sm:$0x11]   ;;  %1837 = vrot.lane.b32.xlu1 %v1726_v39, %s7800_s6  ;;  %v683_v48 = vsel %vm7953_vm7, %v675_v14, %v682_v35  ;;  %v905_v49 = vsel %vm7875_vm2, %v684_v36, %v904_v25  ;;  %v696_v53 = vrot.slane %v694_v7, 7  ;;  %v697_v54 = vshll.u32 %v8158_v3, 16  ;;  %v7390_v14 = vld [vmem:[%s9938_s1 + $0xb8] sm:$0xff]   ;;  %2641 = vmatpush1.bf16.msra.mxu0 %v7389_v9 }
  0x61   : > { %v1735_v50 = vshll.u32 %v7368_v40, 16  ;;  %903 = vst.msk [vmem:[#allocation2 + $0x7c] sm:$0xf] %vm170_vm4, %v683_v48  ;;  %906 = vst [vmem:[#allocation2 + $0x80] sm:$0x1] %v905_v49  ;;  %v691_v51 = vor.u32 %v689_v31, %v688_v42  ;;  %v692_v52 = vrot.slane %v688_v42, 4  ;;  %2642 = vmatprep.subr.bf16.mxu0 %v9941_v11  ;;  %v8219_v28 = vpack.c.bf16 %v411_v62, %v411_v62 }
  0x62   : > { %v1732_v21 = vrot.slane %v1730_v47, 1  ;;  %v217_v55 = vsel %vm7875_vm2, 0, %v216_v32  ;;  %v267_v56 = vsel %vm7886_vm5, 0, %v266_v33  ;;  %v701_v59 = vrot.slane %v696_v53, 4  ;;  %v269_v19 = vld [vmem:[#allocation2 + $0xa4] sm:$0x1] }
  0x63   : > { %v1737_v58 = vrot.slane %v1735_v50, 1  ;;  %v907_v22 = vld [vmem:[#allocation2 + $0x84] sm:$0xf]  ;;  %218 = vst [vmem:[#allocation2 + $0x90] sm:$0x1] %v217_v55  ;;  %v703_v60 = vshrl.u32 %v7137_v37, 16  ;;  %v699_v2 = vor.u32 %v697_v54, %v696_v53 }
  0x64   : > { %268 = vst [vmem:[#allocation2 + $0x98] sm:$0x1] %v267_v56  ;;  %v706_v61 = vshll.u32 %v7137_v37, 16  ;;  %v1733_v63 = vor.u32 %v1732_v21, %v1728_v45  ;;  %v908_v5 = vsel %vm7960_vm8, %v691_v51, %v907_v22  ;;  %v911_v3 = vld [vmem:[#allocation2 + $0x8c] sm:$0x1]  ;;  %v711_v57 = vshrl.u32 %v7138_v38, 16  ;;  %2643 = vmatpush1.bf16.msra.mxu0 %v7390_v14 }
  0x65   : > { %909 = vst [vmem:[#allocation2 + $0x84] sm:$0xf] %v908_v5  ;;  %v912_v10 = vsel %vm7875_vm2, %v701_v59, %v911_v3  ;;  %v705_v12 = vrot.slane %v703_v60, 7  ;;  %v714_v1 = vshll.u32 %v7138_v38, 16  ;;  %v220_v13 = vsel %vm7875_vm2, 0, %v219_v8  ;;  %v412_v42 = vld [vmem:[%s7929_s30 + $0xd8] sm:$0xff]  ;;  %2901 = vmatprep.subr.bf16.mxu0 %v9941_v11 }
  0x66   : > { %v1738_v15 = vsel %vm1128_vm9, %v1733_v63, %v1737_v58  ;;  %v700_v16 = vsel %vm7953_vm7, %v692_v52, %v699_v2  ;;  %913 = vst [vmem:[#allocation2 + $0x8c] sm:$0x1] %v912_v10  ;;  %v713_v17 = vrot.slane %v711_v57, 7  ;;  %221 = vst [vmem:[#allocation2 + $0x9c] sm:$0x1] %v220_v13  ;;  %v720_v20 = vshrl.u32 %v8181_v43, 16 }
  0x67   : > { %1839 = vrot.lane.b32.xlu0 %v1738_v15, %s7800_s6  ;;  %910 = vst.msk [vmem:[#allocation2 + $0x88] sm:$0xf] %vm170_vm4, %v700_v16  ;;  %v708_v23 = vor.u32 %v706_v61, %v705_v12  ;;  %v709_v24 = vrot.slane %v705_v12, 4  ;;  %v270_v25 = vsel %vm7886_vm5, 0, %v269_v19  ;;  %v723_v18 = vshll.u32 %v8181_v43, 16  ;;  %v413_v55 = vld [vmem:[%s7929_s30 + $0xe0] sm:$0xff] }
  0x68   : > { %v7371_v26 = vld [vmem:[#allocation2 + $0x78] sm:$0xff]   ;;  %v716_v27 = vor.u32 %v714_v1, %v713_v17  ;;  %v718_v6 = vrot.slane %v713_v17, 4  ;;  %271 = vst [vmem:[#allocation2 + $0xa4] sm:$0x1] %v270_v25  ;;  %v722_v30 = vrot.slane %v720_v20, 7  ;;  %v728_v31 = vshrl.u32 %v8183_v44, 16 }
  0x69   : > { %v7372_v29 = vld [vmem:[#allocation2 + $0x80] ss:$0 sps:$4 sm:$0x11]   ;;  %v731_v7 = vshll.u32 %v8183_v44, 16  ;;  %v1740_v32 = vshrl.u32 %v7371_v26, 16  ;;  %v1742_v33 = vshll.u32 %v7371_v26, 16  ;;  %v7142_v54 = vpack.c.bf16 %v412_v42, %v412_v42 }
  0x6a   : > { %v717_v34 = vsel %vm7953_vm7, %v709_v24, %v716_v27  ;;  %v914_v35 = vld [vmem:[#allocation2 + $0x90] sm:$0xf]  ;;  %v1747_v37 = vshll.u32 %v7372_v29, 16  ;;  %v725_v40 = vor.u32 %v723_v18, %v722_v30  ;;  %v726_v44 = vrot.slane %v722_v30, 4  ;;  %v222_v22 = vld [vmem:[#allocation2 + $0xa8] sm:$0x1] }
  0x6b   : > { %v918_v36 = vld [vmem:[#allocation2 + $0x98] sm:$0x1]  ;;  %v915_v38 = vsel %vm7960_vm8, %v708_v23, %v914_v35  ;;  %917 = vst.msk [vmem:[#allocation2 + $0x94] sm:$0xf] %vm170_vm4, %v717_v34  ;;  %v1744_v43 = vrot.slane %v1742_v33, 1  ;;  %v730_v45 = vrot.slane %v728_v31, 7  ;;  %v7143_v17 = vpack.c.bf16 %v413_v55, %v413_v55 }
  0x6c   : > { %v919_v39 = vsel %vm7875_vm2, %v718_v6, %v918_v36  ;;  %916 = vst [vmem:[#allocation2 + $0x90] sm:$0xf] %v915_v38  ;;  %v737_v47 = vshrl.u32 %v8219_v28, 16  ;;  %v1749_v48 = vrot.slane %v1747_v37, 1  ;;  %v272_v5 = vld [vmem:[#allocation2 + $0xb0] sm:$0x1] }
  0x6d   : > { %920 = vst [vmem:[#allocation2 + $0x98] sm:$0x1] %v919_v39  ;;  %v7376_v49 = vld [vmem:[#allocation2 + $0x8c] ss:$0 sps:$4 sm:$0x11]   ;;  %v1745_v50 = vor.u32 %v1744_v43, %v1740_v32  ;;  %v733_v52 = vor.u32 %v731_v7, %v730_v45  ;;  %v735_v53 = vrot.slane %v730_v45, 4 }
  0x6e   : > { %v7375_v51 = vld [vmem:[#allocation2 + $0x84] sm:$0xff]   ;;  %v921_v21 = vld [vmem:[#allocation2 + $0x9c] sm:$0xf]  ;;  %v1759_v56 = vshll.u32 %v7376_v49, 16  ;;  %v739_v60 = vrot.slane %v737_v47, 7  ;;  %v223_v8 = vsel %vm7875_vm2, 0, %v222_v22 }
  0x6f   : > { %v922_v58 = vsel %vm7960_vm8, %v725_v40, %v921_v21  ;;  %v925_v59 = vld [vmem:[#allocation2 + $0xa4] sm:$0x1]  ;;  %v1750_v61 = vsel %vm1128_vm9, %v1745_v50, %v1749_v48  ;;  %v1752_v62 = vshrl.u32 %v7375_v51, 16  ;;  %v1754_v63 = vshll.u32 %v7375_v51, 16  ;;  %v414_v10 = vld [vmem:[%s7929_s30 + $0xe8] sm:$0xff]  ;;  %s6586_s28 = sshll.u32 %s161_s27, 8 }
  0x70   : > { %v734_v2 = vsel %vm7953_vm7, %v726_v44, %v733_v52  ;;  %923 = vst [vmem:[#allocation2 + $0x9c] sm:$0xf] %v922_v58  ;;  %1841 = vrot.lane.b32.xlu1 %v1750_v61, %s7800_s6  ;;  %v1761_v3 = vrot.slane %v1759_v56, 1  ;;  %v926_v57 = vsel %vm7875_vm2, %v735_v53, %v925_v59  ;;  %v273_v9 = vsel %vm7886_vm5, 0, %v272_v5  ;;  %224 = vst [vmem:[#allocation2 + $0xa8] sm:$0x1] %v223_v8 }
  0x71   : > { %924 = vst.msk [vmem:[#allocation2 + $0xa0] sm:$0xf] %vm170_vm4, %v734_v2  ;;  %v1756_v12 = vrot.slane %v1754_v63, 1  ;;  %927 = vst [vmem:[#allocation2 + $0xa4] sm:$0x1] %v926_v57  ;;  %v740_v1 = vshll.u32 %v8219_v28, 16  ;;  %v7144_v24 = vpack.c.bf16 %v414_v10, %v414_v10 }
  0x72   : > { %274 = vst [vmem:[#allocation2 + $0xb0] sm:$0x1] %v273_v9  ;;  %v743_v13 = vrot.slane %v739_v60, 4  ;;  %v745_v14 = vshrl.u32 %v7142_v54, 16  ;;  %v748_v16 = vshll.u32 %v7142_v54, 16  ;;  %v754_v34 = vshrl.u32 %v7143_v17, 16 }
  0x73   : > { %v7379_v15 = vld [vmem:[#allocation2 + $0x90] sm:$0xff]   ;;  %v1757_v19 = vor.u32 %v1756_v12, %v1752_v62  ;;  %v742_v26 = vor.u32 %v740_v1, %v739_v60  ;;  %v275_v7 = vld [vmem:[#allocation2 + $0xbc] sm:$0x1]  ;;  %v757_v38 = vshll.u32 %v7143_v17, 16  ;;  %v762_v39 = vshrl.u32 %v7144_v24, 16  ;;  %s9759_s29 = scalar_lea.vmem [#allocation4], %s6586_s28 }
  0x74   : > { %v7380_v20 = vld [vmem:[#allocation2 + $0x98] ss:$0 sps:$4 sm:$0x11]   ;;  %v747_v23 = vrot.slane %v745_v14, 7  ;;  %v1764_v25 = vshrl.u32 %v7379_v15, 16  ;;  %v1766_v18 = vshll.u32 %v7379_v15, 16 }
  0x75   : > { %v225_v27 = vld [vmem:[#allocation2 + $0xb4] sm:$0x1]  ;;  %v1762_v6 = vsel %vm1128_vm9, %v1757_v19, %v1761_v3  ;;  %v1771_v29 = vshll.u32 %v7380_v20, 16  ;;  %v276_v33 = vsel %vm7886_vm5, 0, %v275_v7  ;;  %v756_v43 = vrot.slane %v754_v34, 7  ;;  %v8265_v63 = vld [vmem:[#allocation2 + $0xc] sm:$0xff]  }
  0x76   : > { %v750_v30 = vor.u32 %v748_v16, %v747_v23  ;;  %v752_v31 = vrot.slane %v747_v23, 4  ;;  %1843 = vrot.lane.b32.xlu0 %v1762_v6, %s7800_s6  ;;  %v1768_v28 = vrot.slane %v1766_v18, 1  ;;  %v226_v32 = vsel %vm7875_vm2, 0, %v225_v27  ;;  %277 = vst [vmem:[#allocation2 + $0xbc] sm:$0x1] %v276_v33  ;;  %v415_v59 = vld [vmem:[%s7929_s30 + $0xf0] sm:$0xff] }
  0x77   : > { %v1773_v35 = vrot.slane %v1771_v29, 1  ;;  %227 = vst [vmem:[#allocation2 + $0xb4] sm:$0x1] %v226_v32  ;;  %v928_v47 = vld [vmem:[#allocation2 + $0xa8] sm:$0xf]  ;;  %v759_v54 = vor.u32 %v757_v38, %v756_v43  ;;  %v760_v55 = vrot.slane %v756_v43, 4 }
  0x78   : > { %v7383_v36 = vld [vmem:[#allocation2 + $0x9c] sm:$0xff]   ;;  %v751_v37 = vsel %vm7953_vm7, %v743_v13, %v750_v30  ;;  %v1769_v40 = vor.u32 %v1768_v28, %v1764_v25  ;;  %v7384_v42 = vld [vmem:[#allocation2 + $0xa4] ss:$0 sps:$4 sm:$0x11]   ;;  %v929_v51 = vsel %vm7960_vm8, %v742_v26, %v928_v47  ;;  %v764_v56 = vrot.slane %v762_v39, 7  ;;  %s7179_s4 = sshll.u32 %s7845_s16, 12 }
  0x79   : > { %931 = vst.msk [vmem:[#allocation2 + $0xac] sm:$0xf] %vm170_vm4, %v751_v37  ;;  %v1776_v44 = vshrl.u32 %v7383_v36, 16  ;;  %v1778_v45 = vshll.u32 %v7383_v36, 16  ;;  %v932_v48 = vld [vmem:[#allocation2 + $0xb0] sm:$0x1]  ;;  %v7145_v13 = vpack.c.bf16 %v415_v59, %v415_v59  ;;  %s9886_s8 = scalar_lea.hbm %s9940_s3, %s7179_s4 }
  0x7a   : > { %v1774_v49 = vsel %vm1128_vm9, %v1769_v40, %v1773_v35  ;;  %v1783_v50 = vshll.u32 %v7384_v42, 16  ;;  %v933_v52 = vsel %vm7875_vm2, %v752_v31, %v932_v48  ;;  %v228_v53 = vld [vmem:[#allocation2 + $0xc0] sm:$0x1]  ;;  %930 = vst [vmem:[#allocation2 + $0xa8] sm:$0xf] %v929_v51  ;;  %v765_v60 = vshll.u32 %v7144_v24, 16 }
  0x7b   : > { %1845 = vrot.lane.b32.xlu1 %v1774_v49, %s7800_s6  ;;  %v1780_v21 = vrot.slane %v1778_v45, 1  ;;  %934 = vst [vmem:[#allocation2 + $0xb0] sm:$0x1] %v933_v52  ;;  %v278_v58 = vld [vmem:[#allocation2 + $0xc8] sm:$0x1]  ;;  %vm1353_vm10 = vcmask 1046528  }
  0x7c   : > { %v1785_v22 = vrot.slane %v1783_v50, 1  ;;  %vm1402_vm11 = vcmask 523264   ;;  %v769_v62 = vrot.slane %v764_v56, 4  ;;  %v1855_v2 = vrot.slane %v8265_v63, 1  ;;  %v416_v57 = vld [vmem:[%s7929_s30 + $0xf8] sm:$0xff]  ;;  %v7397_v25 = vld [vmem:[#allocation2] sm:$0xff]  }
  0x7d   : > { %v1781_v61 = vor.u32 %v1780_v21, %v1776_v44  ;;  %v7616_v5 = vld [vmem:[#allocation2 + $0x14] ss:$0 sps:$4 sm:$0x11]   ;;  %v767_v8 = vor.u32 %v765_v60, %v764_v56  ;;  %v939_v10 = vld [vmem:[#allocation2 + $0xbc] sm:$0x1]  ;;  %v229_v12 = vsel %vm7875_vm2, 0, %v228_v53  ;;  %v7146_v20 = vpack.c.bf16 %v416_v57, %v416_v57 }
  0x7e   : > { %v1856_v3 = vrot.slane %v7616_v5, 1  ;;  %v935_v9 = vld [vmem:[#allocation2 + $0xb4] sm:$0xf]  ;;  %v279_v1 = vsel %vm7886_vm5, 0, %v278_v58  ;;  %v940_v16 = vsel %vm7875_vm2, %v769_v62, %v939_v10  ;;  %230 = vst [vmem:[#allocation2 + $0xc0] sm:$0x1] %v229_v12 }
  0x7f   : > { %v1786_v14 = vsel %vm1128_vm9, %v1781_v61, %v1785_v22  ;;  %v936_v15 = vsel %vm7960_vm8, %v759_v54, %v935_v9  ;;  %280 = vst [vmem:[#allocation2 + $0xc8] sm:$0x1] %v279_v1  ;;  %v768_v19 = vsel %vm7953_vm7, %v760_v55, %v767_v8  ;;  %941 = vst [vmem:[#allocation2 + $0xbc] sm:$0x1] %v940_v16  ;;  %v771_v23 = vshrl.u32 %v7145_v13, 16  ;;  %v7399_v45 = vld [vmem:[#allocation2 + $0xc] sm:$0xff]  }
  0x80   : > { %v1857_v17 = vsel %vm1353_vm10, %v1855_v2, %v1856_v3  ;;  %1847 = vrot.lane.b32.xlu0 %v1786_v14, %s7800_s6  ;;  %937 = vst [vmem:[#allocation2 + $0xb4] sm:$0xf] %v936_v15  ;;  %v774_v24 = vshll.u32 %v7145_v13, 16  ;;  %938 = vst.msk [vmem:[#allocation2 + $0xb8] sm:$0xf] %vm170_vm4, %v768_v19  ;;  %v779_v6 = vshrl.u32 %v7146_v20, 16 }
  0x81   : > { %6753 = vmatprep.mubr.msk.bf16.mxu0 %vm1402_vm11, %v1857_v17  ;;  %v7387_v18 = vld [vmem:[#allocation2 + $0xa8] sm:$0xff]   ;;  %v773_v26 = vrot.slane %v771_v23, 7  ;;  %v782_v29 = vshll.u32 %v7146_v20, 16  ;;  %v1132_v35 = vshll.u32 %v7397_v25, 16  ;;  %v1130_v39 = vshrl.u32 %v7397_v25, 16  ;;  %v7402_v59 = vld [vmem:[#allocation2 + $0x18] sm:$0xff]  }
  0x82   : > { %v7388_v27 = vld [vmem:[#allocation2 + $0xb0] ss:$0 sps:$4 sm:$0x11]   ;;  %v7398_v30 = vld [vmem:[#allocation2 + $0x8] ss:$0 sps:$4 sm:$0x11]  }
  0x83   : > { %v1788_v31 = vshrl.u32 %v7387_v18, 16  ;;  %v1790_v7 = vshll.u32 %v7387_v18, 16  ;;  %v776_v28 = vor.u32 %v774_v24, %v773_v26  ;;  %v1795_v32 = vshll.u32 %v7388_v27, 16  ;;  %v7400_v58 = vld [vmem:[#allocation2 + $0x14] ss:$0 sps:$4 sm:$0x11]  }
  0x84   : > { %v777_v33 = vrot.slane %v773_v26, 4  ;;  %v781_v34 = vrot.slane %v779_v6, 7  ;;  %v1134_v52 = vrot.slane %v1132_v35, 1  ;;  %v1137_v53 = vshll.u32 %v7398_v30, 16  ;;  %v7405_v25 = vld [vmem:[#allocation2 + $0x24] sm:$0xff]   ;;  %v7408_v35 = vld [vmem:[#allocation2 + $0x30] sm:$0xff]  }
  0x85   : > { %v1792_v36 = vrot.slane %v1790_v7, 1  ;;  %v942_v37 = vld [vmem:[#allocation2 + $0xc0] sm:$0xf]  ;;  %v1797_v40 = vrot.slane %v1795_v32, 1  ;;  %v1144_v62 = vshll.u32 %v7399_v45, 16  ;;  %v1154_v57 = vshrl.u32 %v7402_v59, 16 }
  0x86   : > { %v946_v38 = vld [vmem:[#allocation2 + $0xc8] sm:$0x1]  ;;  %v784_v42 = vor.u32 %v782_v29, %v781_v34  ;;  %v786_v43 = vrot.slane %v781_v34, 4  ;;  %v943_v44 = vsel %vm7960_vm8, %v776_v28, %v942_v37  ;;  %v7392_v49 = vld [vmem:[#allocation2 + $0xbc] ss:$0 sps:$4 sm:$0x11]   ;;  %v1135_v5 = vor.u32 %v1134_v52, %v1130_v39 }
  0x87   : > { %v1793_v47 = vor.u32 %v1792_v36, %v1788_v31  ;;  %v7391_v48 = vld [vmem:[#allocation2 + $0xb4] sm:$0xff]   ;;  %944 = vst [vmem:[#allocation2 + $0xc0] sm:$0xf] %v943_v44  ;;  %v1807_v56 = vshll.u32 %v7392_v49, 16  ;;  %v1139_v61 = vrot.slane %v1137_v53, 1  ;;  %v1156_v8 = vshll.u32 %v7402_v59, 16 }
  0x88   : > { %v785_v50 = vsel %vm7953_vm7, %v777_v33, %v784_v42  ;;  %v947_v51 = vsel %vm7875_vm2, %v786_v43, %v946_v38  ;;  %v1800_v54 = vshrl.u32 %v7391_v48, 16  ;;  %v1802_v55 = vshll.u32 %v7391_v48, 16  ;;  %v7403_v3 = vld [vmem:[#allocation2 + $0x20] ss:$0 sps:$4 sm:$0x11]   ;;  %s6516_s5 = sshll.u32 %s9759_s29, 4  ;;  %s9888_s5 = int_to_ptr.vmem [resolvable:$true] %s6516_s5 }
  0x89   : > { %v1798_v21 = vsel %vm1128_vm9, %v1793_v47, %v1797_v40  ;;  %945 = vst.msk [vmem:[#allocation2 + $0xc4] sm:$0xf] %vm170_vm4, %v785_v50  ;;  %948 = vst [vmem:[#allocation2 + $0xc8] sm:$0x1] %v947_v51  ;;  %v1809_v60 = vrot.slane %v1807_v56, 1  ;;  %v1142_v9 = vshrl.u32 %v7399_v45, 16  ;;  %v1140_v17 = vsel %vm1128_vm9, %v1135_v5, %v1139_v61 }
  0x8a   : > { %1849 = vrot.lane.b32.xlu1 %v1798_v21, %s7800_s6  ;;  %v1804_v22 = vrot.slane %v1802_v55, 1  ;;  %v1149_v10 = vshll.u32 %v7400_v58, 16  ;;  %v1158_v1 = vrot.slane %v1156_v8, 1  ;;  %v1161_v13 = vshll.u32 %v7403_v3, 16  ;;  %v7410_v42 = vld [vmem:[#allocation2 + $0x3c] sm:$0xff]   ;;  %v7413_v21 = vld [vmem:[#allocation2 + $0x48] sm:$0xff]  }
  0x8b   : > { %v1146_v15 = vrot.slane %v1144_v62, 1  ;;  %v7406_v26 = vld [vmem:[#allocation2 + $0x2c] ss:$0 sps:$4 sm:$0x11]   ;;  %v1168_v6 = vshll.u32 %v7405_v25, 16  ;;  %v1166_v32 = vshrl.u32 %v7405_v25, 16 }
  0x8c   : > { %v1805_v2 = vor.u32 %v1804_v22, %v1800_v54  ;;  %v1159_v19 = vor.u32 %v1158_v1, %v1154_v57  ;;  %v1163_v20 = vrot.slane %v1161_v13, 1  ;;  %v1151_v31 = vrot.slane %v1149_v10, 1  ;;  %v7409_v36 = vld [vmem:[#allocation2 + $0x38] ss:$0 sps:$4 sm:$0x11]   ;;  %v7419_v13 = vld [vmem:[#allocation2 + $0x60] sm:$0xff]  }
  0x8d   : > { %v1147_v30 = vor.u32 %v1146_v15, %v1142_v9  ;;  %v1170_v33 = vrot.slane %v1168_v6, 1  ;;  %v1173_v34 = vshll.u32 %v7406_v26, 16  ;;  %v1178_v38 = vshrl.u32 %v7408_v35, 16  ;;  %v7411_v43 = vld [vmem:[#allocation2 + $0x44] ss:$0 sps:$4 sm:$0x11]  }
  0x8e   : > { %v1810_v12 = vsel %vm1128_vm9, %v1805_v2, %v1809_v60  ;;  %v1164_v7 = vsel %vm1128_vm9, %v1159_v19, %v1163_v20  ;;  %v1180_v39 = vshll.u32 %v7408_v35, 16  ;;  %v1185_v40 = vshll.u32 %v7409_v36, 16  ;;  %v7414_v56 = vld [vmem:[#allocation2 + $0x50] ss:$0 sps:$4 sm:$0x11]   ;;  %v7416_v2 = vld [vmem:[#allocation2 + $0x54] sm:$0xff]  }
  0x8f   : > { %1851 = vrot.lane.b32.xlu0 %v1810_v12, %s7800_s6  ;;  %v1152_v44 = vsel %vm1128_vm9, %v1147_v30, %v1151_v31  ;;  %v1171_v45 = vor.u32 %v1170_v33, %v1166_v32  ;;  %v1175_v47 = vrot.slane %v1173_v34, 1  ;;  %v1190_v50 = vshrl.u32 %v7410_v42, 16  ;;  %v7417_v57 = vld [vmem:[#allocation2 + $0x5c] ss:$0 sps:$4 sm:$0x11]   ;;  %v7393_v36 = vld [vmem:[%s9938_s1] sm:$0xff]  }
  0x90   : > { %v7394_v14 = vld [vmem:[#allocation2 + $0xc0] sm:$0xff]   ;;  %v7395_v16 = vld [vmem:[#allocation2 + $0xc8] ss:$0 sps:$4 sm:$0x11]   ;;  %v1182_v48 = vrot.slane %v1180_v39, 1  ;;  %v1187_v49 = vrot.slane %v1185_v40, 1 }
  0x91   : > { %v1812_v23 = vshrl.u32 %v7394_v14, 16  ;;  %v1814_v24 = vshll.u32 %v7394_v14, 16  ;;  %v1819_v18 = vshll.u32 %v7395_v16, 16  ;;  %v1192_v51 = vshll.u32 %v7410_v42, 16  ;;  %v7617_v25 = vld [vmem:[#allocation2 + $0x18] sm:$0xff]   ;;  %s9896_s16 = scalar_lea.sflag [#allocation5], %s161_s27 }
  0x92   : > { %v1197_v52 = vshll.u32 %v7411_v43, 16  ;;  %v1183_v53 = vor.u32 %v1182_v48, %v1178_v38  ;;  %v1176_v58 = vsel %vm1128_vm9, %v1171_v45, %v1175_v47  ;;  %v1202_v22 = vshrl.u32 %v7413_v21, 16  ;;  %v7420_v16 = vld [vmem:[#allocation2 + $0x68] ss:$0 sps:$4 sm:$0x11]   ;;  %v7424_v35 = vld [vmem:[#allocation2 + $0x78] sm:$0xff]  }
  0x93   : > { %v1816_v27 = vrot.slane %v1814_v24, 1  ;;  %1321 = vrot.lane.b32.xlu0 %v1140_v17, %s7800_s6  ;;  %v1821_v29 = vrot.slane %v1819_v18, 1  ;;  %v1194_v54 = vrot.slane %v1192_v51, 1  ;;  %v1204_v60 = vshll.u32 %v7413_v21, 16  ;;  %s7801_s9 = smov [#allocation4]  }
  0x94   : > { %v1199_v55 = vrot.slane %v1197_v52, 1  ;;  %v1188_v59 = vsel %vm1128_vm9, %v1183_v53, %v1187_v49  ;;  %v1209_v62 = vshll.u32 %v7414_v56, 16  ;;  %v1214_v10 = vshrl.u32 %v7416_v2, 16  ;;  %v7422_v6 = vld [vmem:[#allocation2 + $0x74] ss:$0 sps:$4 sm:$0x11]  }
  0x95   : > { %v1817_v28 = vor.u32 %v1816_v27, %v1812_v23  ;;  %v1195_v61 = vor.u32 %v1194_v54, %v1190_v50  ;;  %v1206_v5 = vrot.slane %v1204_v60, 1  ;;  %v1216_v12 = vshll.u32 %v7416_v2, 16  ;;  %v7421_v27 = vld [vmem:[#allocation2 + $0x6c] sm:$0xff]   ;;  %v7425_v40 = vld [vmem:[#allocation2 + $0x80] ss:$0 sps:$4 sm:$0x11]  }
  0x96   : > { %v1211_v3 = vrot.slane %v1209_v62, 1  ;;  %v1221_v1 = vshll.u32 %v7417_v57, 16  ;;  %v1226_v19 = vshrl.u32 %v7419_v13, 16  ;;  %v1228_v20 = vshll.u32 %v7419_v13, 16  ;;  %v7396_v50 = vld [vmem:[%s9938_s1 + $0x8] sm:$0xff]   ;;  %s7739_s10 = sshll.u32 %s7801_s9, 4  ;;  %s7740_s10 = int_to_ptr.vmem [resolvable:$false] %s7739_s10 }
  0x97   : > { %v1822_v37 = vsel %vm1128_vm9, %v1817_v28, %v1821_v29  ;;  %1325 = vrot.lane.b32.xlu0 %v1164_v7, %s7800_s6  ;;  %v1200_v8 = vsel %vm1128_vm9, %v1195_v61, %v1199_v55  ;;  %v1207_v9 = vor.u32 %v1206_v5, %v1202_v22  ;;  %v1218_v15 = vrot.slane %v1216_v12, 1  ;;  %v7618_v29 = vld [vmem:[#allocation2 + $0x20] ss:$0 sps:$4 sm:$0x11]   ;;  %v7427_v52 = vld [vmem:[#allocation2 + $0x84] sm:$0xff]   ;;  %s7741_s11 = scalar_lea.vmem %s7740_s10, 8192  ;;  %p7742_p0 = scmp.lt.s32.totalorder %s9888_s5, %s7740_s10 }
  0x98   : > { %1853 = vrot.lane.b32.xlu1 %v1822_v37, %s7800_s6  ;;  %v1223_v17 = vrot.slane %v1221_v1, 1  ;;  %v1233_v24 = vshll.u32 %v7420_v16, 16  ;;  %v1858_v18 = vrot.slane %v7617_v25, 1  ;;  %v1230_v26 = vrot.slane %v1228_v20, 1  ;;  %v8324_v53 = vld [vmem:[#allocation2 + $0x24] sm:$0xff]  }
  0x99   : > { %v1212_v14 = vsel %vm1128_vm9, %v1207_v9, %v1211_v3  ;;  %v1219_v23 = vor.u32 %v1218_v15, %v1214_v10  ;;  %v1859_v30 = vrot.slane %v7618_v29, 1  ;;  %v1238_v32 = vshrl.u32 %v7421_v27, 16  ;;  %v7428_v56 = vld [vmem:[#allocation2 + $0x8c] ss:$0 sps:$4 sm:$0x11]   ;;  %v7432_v15 = vld [vmem:[#allocation2 + $0x9c] sm:$0xff]  }
  0x9a   : > { %v1235_v7 = vrot.slane %v1233_v24, 1  ;;  %v1231_v28 = vor.u32 %v1230_v26, %v1226_v19  ;;  %v1240_v33 = vshll.u32 %v7421_v27, 16  ;;  %v1245_v34 = vshll.u32 %v7422_v6, 16  ;;  %v7620_v61 = vld [vmem:[#allocation2 + $0x2c] ss:$0 sps:$4 sm:$0x11]  }
  0x9b   : > { %1329 = vrot.lane.b32.xlu0 %v1188_v59, %s7800_s6  ;;  %v1224_v31 = vsel %vm1128_vm9, %v1219_v23, %v1223_v17  ;;  %v1250_v42 = vshrl.u32 %v7424_v35, 16  ;;  %v1252_v43 = vshll.u32 %v7424_v35, 16  ;;  %v1860_v45 = vsel %vm1353_vm10, %v1858_v18, %v1859_v30  ;;  %v7431_v57 = vld [vmem:[#allocation2 + $0x98] ss:$0 sps:$4 sm:$0x11]   ;;  %v7435_v27 = vld [vmem:[#allocation2 + $0xa8] sm:$0xff]  }
  0x9c   : > { %1323 = vrot.lane.b32.xlu1 %v1152_v44, %s7800_s6  ;;  %v1236_v37 = vsel %vm1128_vm9, %v1231_v28, %v1235_v7  ;;  %v1242_v38 = vrot.slane %v1240_v33, 1  ;;  %v1247_v39 = vrot.slane %v1245_v34, 1  ;;  %v1257_v48 = vshll.u32 %v7425_v40, 16  ;;  %v7433_v19 = vld [vmem:[#allocation2 + $0xa4] ss:$0 sps:$4 sm:$0x11]  }
  0x9d   : > { %v1254_v51 = vrot.slane %v1252_v43, 1  ;;  %v1861_v21 = vrot.slane %v8324_v53, 1  ;;  %v1262_v59 = vshrl.u32 %v7427_v52, 16  ;;  %v1264_v22 = vshll.u32 %v7427_v52, 16  ;;  %v7404_v6 = vld [vmem:[%s9938_s1 + $0x18] sm:$0xff]  }
  0x9e   : > { %v1243_v47 = vor.u32 %v1242_v38, %v1238_v32  ;;  %v1259_v55 = vrot.slane %v1257_v48, 1  ;;  %v1862_v62 = vrot.slane %v7620_v61, 1  ;;  %v1269_v2 = vshll.u32 %v7428_v56, 16  ;;  %v7622_v28 = vld [vmem:[#allocation2 + $0x38] ss:$0 sps:$4 sm:$0x11]  }
  0x9f   : > { %1333 = vrot.lane.b32.xlu0 %v1212_v14, %s7800_s6  ;;  %v1266_v3 = vrot.slane %v1264_v22, 1  ;;  %v1281_v14 = vshll.u32 %v7431_v57, 16  ;;  %v1286_v24 = vshrl.u32 %v7432_v15, 16  ;;  %v1288_v18 = vshll.u32 %v7432_v15, 16  ;;  %v8357_v52 = vld [vmem:[#allocation2 + $0x3c] sm:$0xff]   ;;  %v7412_v56 = vld [vmem:[%s9938_s1 + $0x28] sm:$0xff]  }
  0xa0   : > { %1327 = vrot.lane.b32.xlu1 %v1176_v58, %s7800_s6  ;;  %v1248_v54 = vsel %vm1128_vm9, %v1243_v47, %v1247_v39  ;;  %v7430_v58 = vld [vmem:[#allocation2 + $0x90] sm:$0xff]   ;;  %v1271_v9 = vrot.slane %v1269_v2, 1  ;;  %v1863_v16 = vsel %vm1353_vm10, %v1861_v21, %v1862_v62  ;;  %v1865_v32 = vrot.slane %v7622_v28, 1  ;;  %v7439_v47 = vld [vmem:[#allocation2 + $0xbc] ss:$0 sps:$4 sm:$0x11]  }
  0xa1   : > { %v1274_v10 = vshrl.u32 %v7430_v58, 16  ;;  %v1276_v12 = vshll.u32 %v7430_v58, 16  ;;  %v1267_v13 = vor.u32 %v1266_v3, %v1262_v59  ;;  %v1283_v23 = vrot.slane %v1281_v14, 1  ;;  %v7436_v35 = vld [vmem:[#allocation2 + $0xb0] ss:$0 sps:$4 sm:$0x11]  }
  0xa2   : > { %v1290_v29 = vrot.slane %v1288_v18, 1  ;;  %v1298_v38 = vshrl.u32 %v7435_v27, 16  ;;  %v1300_v39 = vshll.u32 %v7435_v27, 16  ;;  %v1305_v40 = vshll.u32 %v7436_v35, 16  ;;  %v7443_v57 = vld [vmem:[#allocation2 + $0x24] sm:$0xff]   ;;  %v7446_v14 = vld [vmem:[#allocation2 + $0x30] sm:$0xff]  }
  0xa3   : > { %1337 = vrot.lane.b32.xlu0 %v1236_v37, %s7800_s6  ;;  %v1278_v17 = vrot.slane %v1276_v12, 1  ;;  %v1272_v20 = vsel %vm1128_vm9, %v1267_v13, %v1271_v9  ;;  %v1867_v21 = vrot.slane %v8357_v52, 1  ;;  %v7442_v22 = vld [vmem:[#allocation2 + $0x20] ss:$0 sps:$4 sm:$0x11]   ;;  %v2144_v13 = vshrl.u32 %v7443_v57, 16 }
  0xa4   : > { %1331 = vrot.lane.b32.xlu1 %v1200_v8, %s7800_s6  ;;  %v7401_v8 = vld [vmem:[%s9938_s1 + $0x10] sm:$0xff]   ;;  %v1291_v37 = vor.u32 %v1290_v29, %v1286_v24  ;;  %v7624_v61 = vld [vmem:[#allocation2 + $0x44] ss:$0 sps:$4 sm:$0x11]   ;;  %v2139_v9 = vshll.u32 %v7442_v22, 16  ;;  %v7625_v24 = vld [vmem:[#allocation2 + $0x48] sm:$0xff]  }
  0xa5   : > { %v1279_v26 = vor.u32 %v1278_v17, %v1274_v10  ;;  %v1868_v62 = vrot.slane %v7624_v61, 1  ;;  %v2146_v17 = vshll.u32 %v7443_v57, 16  ;;  %v1870_v18 = vrot.slane %v7625_v24, 1  ;;  %v7418_v28 = vld [vmem:[%s9938_s1 + $0x38] sm:$0xff]   ;;  %v8402_v22 = vld [vmem:[#allocation2 + $0x48] sm:$0xff]  }
  0xa6   : > { %v2156_v29 = vshrl.u32 %v7446_v14, 16  ;;  %v8406_v61 = vld [vmem:[#allocation2 + $0x50] ss:$0 sps:$4 sm:$0x11]  }
  0xa7   : > { %v1284_v33 = vsel %vm1128_vm9, %v1279_v26, %v1283_v23  ;;  %v2148_v26 = vrot.slane %v2146_v17, 1  ;;  %v2187_v57 = vshll.u32 %v8406_v61, 16  ;;  %v8419_v17 = vld [vmem:[#allocation2 + $0x54] sm:$0xff]  }
  0xa8   : > { %1335 = vrot.lane.b32.xlu1 %v1224_v31, %s7800_s6  ;;  %v7621_v31 = vld [vmem:[#allocation2 + $0x30] sm:$0xff]  }
  0xa9   : > { %v1864_v7 = vrot.slane %v7621_v31, 1 }
  0xab   : > { %v1866_v48 = vsel %vm1353_vm10, %v1864_v7, %v1865_v32  ;;  %v2149_v32 = vor.u32 %v2148_v26, %v2144_v13 }
  0xac   : > { %1339 = vrot.lane.b32.xlu1 %v1248_v54, %s7800_s6 }
  0xad   : > { %v1824_v44 = vpop.permute.xlu0 %1823 }
  0xae   : > { %v1904_v49 = vsel %vm1402_vm11, %v8265_v63, %v1824_v44  ;;  %v1255_v63 = vor.u32 %v1254_v51, %v1250_v42  ;;  %v7438_v42 = vld [vmem:[#allocation2 + $0xb4] sm:$0xff]  }
  0xaf   : > { %2653 = vmatmul.mubr.bf16.vlgmr.msra.gmra.mrb[0].mxu0 %v1904_v49  ;;  %v1307_v49 = vrot.slane %v1305_v40, 1  ;;  %v1312_v51 = vshll.u32 %v7438_v42, 16 }
  0xb0   : > { %2902 = vmatpush1.bf16.msra.mxu0 %v7393_v36  ;;  %6754 = vmatprep.mubr.msk.bf16.mxu0 %vm1402_vm11, %v1860_v45  ;;  %v1260_v5 = vsel %vm1128_vm9, %v1255_v63, %v1259_v55  ;;  %v7407_v36 = vld [vmem:[%s9938_s1 + $0x20] sm:$0xff]   ;;  %v1302_v45 = vrot.slane %v1300_v39, 1  ;;  %v7441_v55 = vld [vmem:[#allocation2 + $0x18] sm:$0xff]  }
  0xb1   : > { %v1826_v60 = vpop.permute.xlu0 %1825  ;;  %2903 = vmatprep.subr.bf16.mxu0 %v9941_v11  ;;  %1341 = vrot.lane.b32.xlu0 %v1260_v5, %s7800_s6  ;;  %v1314_v58 = vrot.slane %v1312_v51, 1  ;;  %v2132_v5 = vshrl.u32 %v7441_v55, 16  ;;  %v2134_v3 = vshll.u32 %v7441_v55, 16  ;;  %v7627_v51 = vld [vmem:[#allocation2 + $0x54] sm:$0xff]  }
  0xb2   : > { %v1907_v1 = vsel %vm1402_vm11, %v7617_v25, %v1826_v60  ;;  %1343 = vrot.lane.b32.xlu1 %v1272_v20, %s7800_s6  ;;  %v1293_v25 = vshll.u32 %v7433_v19, 16  ;;  %v1303_v54 = vor.u32 %v1302_v45, %v1298_v38  ;;  %v1869_v19 = vsel %vm1353_vm10, %v1867_v21, %v1868_v62  ;;  %v7423_v38 = vld [vmem:[%s9938_s1 + $0x40] sm:$0xff]  }
  0xb3   : > { %v1828_v30 = vpop.permute.xlu1 %1827  ;;  %v2136_v12 = vrot.slane %v2134_v3, 1  ;;  %v1873_v21 = vrot.slane %v7627_v51, 1  ;;  %v2182_v62 = vshll.u32 %v8402_v22, 16 }
  0xb4   : > { %2904 = vmatpush1.bf16.msra.mxu0 %v7396_v50  ;;  %v1295_v34 = vrot.slane %v1293_v25, 1  ;;  %v1910_v43 = vsel %vm1402_vm11, %v8324_v53, %v1828_v30  ;;  %v1310_v50 = vshrl.u32 %v7438_v42, 16  ;;  %v1317_v53 = vshll.u32 %v7439_v47, 16 }
  0xb5   : > { %2905 = vmatprep.subr.bf16.mxu0 %v9941_v11  ;;  %1345 = vrot.lane.b32.xlu0 %v1284_v33, %s7800_s6  ;;  %v1308_v63 = vsel %vm1128_vm9, %v1303_v54, %v1307_v49  ;;  %v2137_v20 = vor.u32 %v2136_v12, %v2132_v5  ;;  %v2158_v30 = vshll.u32 %v7446_v14, 16  ;;  %v7628_v54 = vld [vmem:[#allocation2 + $0x5c] ss:$0 sps:$4 sm:$0x11]   ;;  %v2180_v5 = vshrl.u32 %v8402_v22, 16 }
  0xb6   : > { %v1296_v44 = vsel %vm1128_vm9, %v1291_v37, %v1295_v34  ;;  %v1319_v59 = vrot.slane %v1317_v53, 1  ;;  %v1315_v2 = vor.u32 %v1314_v58, %v1310_v50  ;;  %v7449_v37 = vld [vmem:[#allocation2 + $0x3c] sm:$0xff]   ;;  %v1874_v53 = vrot.slane %v7628_v54, 1  ;;  %v8448_v54 = vld [vmem:[#allocation2 + $0x74] ss:$0 sps:$4 sm:$0x11]  }
  0xb7   : > { %2661 = vmatmul.mubr.bf16.gmra.mrb[4].mxu0 %v1907_v1  ;;  %1347 = vrot.lane.b32.xlu1 %v1296_v44, %s7800_s6  ;;  %v1830_v60 = vpop.permute.xlu1 %1829  ;;  %v7444_v1 = vld [vmem:[#allocation2 + $0x2c] ss:$0 sps:$4 sm:$0x11]   ;;  %v2160_v34 = vrot.slane %v2158_v30, 1  ;;  %v2170_v44 = vshll.u32 %v7449_v37, 16  ;;  %v2184_v3 = vrot.slane %v2182_v62, 1 }
  0xb8   : > { %6755 = vmatprep.mubr.msk.bf16.mxu0 %vm1402_vm11, %v1863_v16  ;;  %2906 = vmatpush1.bf16.msra.mxu0 %v7401_v8  ;;  %v7415_v8 = vld [vmem:[%s9938_s1 + $0x30] sm:$0xff]   ;;  %v1320_v10 = vsel %vm1128_vm9, %v1315_v2, %v1319_v59  ;;  %v1913_v15 = vsel %vm1402_vm11, %v7621_v31, %v1830_v60  ;;  %v2141_v16 = vrot.slane %v2139_v9, 1  ;;  %v2151_v23 = vshll.u32 %v7444_v1, 16  ;;  %v7434_v1 = vld [vmem:[%s9938_s1 + $0x58] sm:$0xff]  }
  0xb9   : > { %2907 = vmatprep.subr.bf16.mxu0 %v9941_v11  ;;  %1349 = vrot.lane.b32.xlu0 %v1308_v63, %s7800_s6  ;;  %v7626_v31 = vld [vmem:[#allocation2 + $0x50] ss:$0 sps:$4 sm:$0x11]   ;;  %v2161_v39 = vor.u32 %v2160_v34, %v2156_v29  ;;  %v2172_v49 = vrot.slane %v2170_v44, 1  ;;  %v1875_v2 = vsel %vm1353_vm10, %v1873_v21, %v1874_v53  ;;  %v2185_v13 = vor.u32 %v2184_v3, %v2180_v5 }
  0xba   : > { %v2142_v25 = vsel %vm1128_vm9, %v2137_v20, %v2141_v16  ;;  %v2153_v27 = vrot.slane %v2151_v23, 1  ;;  %v1871_v7 = vrot.slane %v7626_v31, 1  ;;  %v7429_v63 = vld [vmem:[%s9938_s1 + $0x50] sm:$0xff]   ;;  %v2189_v14 = vrot.slane %v2187_v57, 1 }
  0xbb   : > { %1351 = vrot.lane.b32.xlu1 %v1320_v10, %s7800_s6  ;;  %v7630_v10 = vld [vmem:[#allocation2 + $0x68] ss:$0 sps:$4 sm:$0x11]   ;;  %v8423_v20 = vld [vmem:[#allocation2 + $0x5c] ss:$0 sps:$4 sm:$0x11]  }
  0xbc   : > { %2908 = vmatpush1.bf16.msra.mxu0 %v7404_v6  ;;  %v7447_v6 = vld [vmem:[#allocation2 + $0x38] ss:$0 sps:$4 sm:$0x11]   ;;  %v1872_v45 = vsel %vm1353_vm10, %v1870_v18, %v1871_v7  ;;  %v1877_v12 = vrot.slane %v7630_v10, 1  ;;  %v2190_v16 = vsel %vm1128_vm9, %v2185_v13, %v2189_v14  ;;  %v2194_v23 = vshll.u32 %v8419_v17, 16 }
  0xbd   : > { %2909 = vmatprep.subr.bf16.mxu0 %v9941_v11  ;;  %2323 = vrot.lane.b32.xlu0 %v2142_v25, %s7800_s6  ;;  %v2163_v35 = vshll.u32 %v7447_v6, 16  ;;  %v2192_v18 = vshrl.u32 %v8419_v17, 16  ;;  %v2199_v25 = vshll.u32 %v8423_v20, 16  ;;  %v7632_v29 = vld [vmem:[#allocation2 + $0x74] ss:$0 sps:$4 sm:$0x11]  }
  0xbe   : > { %v2196_v26 = vrot.slane %v2194_v23, 1  ;;  %v1880_v30 = vrot.slane %v7632_v29, 1  ;;  %v7634_v44 = vld [vmem:[#allocation2 + $0x80] ss:$0 sps:$4 sm:$0x11]  }
  0xbf   : > { %2669 = vmatmul.mubr.bf16.gmra.mrb[8].mxu0 %v1910_v43  ;;  %v2165_v40 = vrot.slane %v2163_v35, 1  ;;  %v7450_v43 = vld [vmem:[#allocation2 + $0x44] ss:$0 sps:$4 sm:$0x11]   ;;  %v2201_v7 = vrot.slane %v2199_v25, 1 }
  0xc0   : > { %6756 = vmatprep.mubr.msk.bf16.mxu0 %vm1402_vm11, %v1866_v48  ;;  %2910 = vmatpush1.bf16.msra.mxu0 %v7407_v36  ;;  %v2154_v36 = vsel %vm1128_vm9, %v2149_v32, %v2153_v27  ;;  %v2168_v48 = vshrl.u32 %v7449_v37, 16  ;;  %v2175_v50 = vshll.u32 %v7450_v43, 16  ;;  %v7631_v27 = vld [vmem:[#allocation2 + $0x6c] sm:$0xff]   ;;  %v2197_v31 = vor.u32 %v2196_v26, %v2192_v18  ;;  %v8436_v35 = vld [vmem:[#allocation2 + $0x68] ss:$0 sps:$4 sm:$0x11]  }
  0xc1   : > { %2911 = vmatprep.subr.bf16.mxu0 %v9941_v11  ;;  %2325 = vrot.lane.b32.xlu1 %v2154_v36, %s7800_s6  ;;  %v2166_v47 = vsel %vm1128_vm9, %v2161_v39, %v2165_v40  ;;  %v1879_v6 = vrot.slane %v7631_v27, 1  ;;  %v2211_v40 = vshll.u32 %v8436_v35, 16  ;;  %v8460_v10 = vld [vmem:[#allocation2 + $0x80] ss:$0 sps:$4 sm:$0x11]  }
  0xc2   : > { %v1832_v33 = vpop.permute.xlu0 %1831  ;;  %2327 = vrot.lane.b32.xlu0 %v2166_v47, %s7800_s6  ;;  %v2173_v55 = vor.u32 %v2172_v49, %v2168_v48  ;;  %v2202_v32 = vsel %vm1128_vm9, %v2197_v31, %v2201_v7  ;;  %v7638_v23 = vld [vmem:[#allocation2 + $0x98] ss:$0 sps:$4 sm:$0x11]  }
  0xc3   : > { %v1916_v42 = vsel %vm1402_vm11, %v8357_v52, %v1832_v33  ;;  %v7426_v52 = vld [vmem:[%s9938_s1 + $0x48] sm:$0xff]   ;;  %v8432_v33 = vld [vmem:[#allocation2 + $0x60] sm:$0xff]   ;;  %v1881_v37 = vsel %vm1353_vm10, %v1879_v6, %v1880_v30  ;;  %v2213_v48 = vrot.slane %v2211_v40, 1 }
  0xc4   : > { %2912 = vmatpush1.bf16.msra.mxu0 %v7412_v56  ;;  %v2177_v56 = vrot.slane %v2175_v50, 1  ;;  %v2206_v36 = vshll.u32 %v8432_v33, 16  ;;  %v8468_v6 = vld [vmem:[#allocation2 + $0x84] sm:$0xff]   ;;  %v8472_v30 = vld [vmem:[#allocation2 + $0x8c] ss:$0 sps:$4 sm:$0x11]  }
  0xc5   : > { %2913 = vmatprep.subr.bf16.mxu0 %v9941_v11  ;;  %v2242_v31 = vshll.u32 %v8468_v6, 16 }
  0xc6   : > { %v2178_v59 = vsel %vm1128_vm9, %v2173_v55, %v2177_v56  ;;  %2331 = vrot.lane.b32.xlu0 %v2190_v16, %s7800_s6  ;;  %v2208_v39 = vrot.slane %v2206_v36, 1  ;;  %v7637_v16 = vld [vmem:[#allocation2 + $0x90] sm:$0xff]   ;;  %v7639_v36 = vld [vmem:[#allocation2 + $0x9c] sm:$0xff]  }
  0xc7   : > { %2677 = vmatmul.mubr.bf16.gmra.mrb[12].mxu0 %v1913_v15  ;;  %2329 = vrot.lane.b32.xlu1 %v2178_v59, %s7800_s6 }
  0xc8   : > { %6757 = vmatprep.mubr.msk.bf16.mxu0 %vm1402_vm11, %v1869_v19  ;;  %2914 = vmatpush1.bf16.msra.mxu0 %v7415_v8  ;;  %v7629_v8 = vld [vmem:[#allocation2 + $0x60] sm:$0xff]  }
  0xc9   : > { %2915 = vmatprep.subr.bf16.mxu0 %v9941_v11  ;;  %v1834_v58 = vpop.permute.xlu1 %1833  ;;  %v1876_v9 = vrot.slane %v7629_v8, 1 }
  0xca   : > { %v1919_v60 = vsel %vm1402_vm11, %v7625_v24, %v1834_v58  ;;  %v2223_v58 = vshll.u32 %v8448_v54, 16 }
  0xcb   : > { %v1878_v24 = vsel %vm1353_vm10, %v1876_v9, %v1877_v12  ;;  %2333 = vrot.lane.b32.xlu1 %v2202_v32, %s7800_s6  ;;  %v2244_v32 = vrot.slane %v2242_v31, 1  ;;  %v8508_v31 = vld [vmem:[#allocation2 + $0xb0] ss:$0 sps:$4 sm:$0x11]  }
  0xcc   : > { %2916 = vmatpush1.bf16.msra.mxu0 %v7418_v28  ;;  %v2225_v5 = vrot.slane %v2223_v58, 1  ;;  %v7642_v58 = vld [vmem:[#allocation2 + $0xb0] ss:$0 sps:$4 sm:$0x11]  }
  0xcd   : > { %2917 = vmatprep.subr.bf16.mxu0 %v9941_v11 }
  0xce   : > { %v1836_v15 = vpop.permute.xlu0 %1835 }
  0xcf   : > { %2685 = vmatmul.mubr.bf16.gmra.mrb[16].mxu0 %v1916_v42  ;;  %v1922_v19 = vsel %vm1402_vm11, %v7627_v51, %v1836_v15  ;;  %v7633_v42 = vld [vmem:[#allocation2 + $0x78] sm:$0xff]   ;;  %v8444_v51 = vld [vmem:[#allocation2 + $0x6c] sm:$0xff]   ;;  %v2235_v15 = vshll.u32 %v8460_v10, 16 }
  0xd0   : > { %6758 = vmatprep.mubr.msk.bf16.mxu0 %vm1402_vm11, %v1872_v45  ;;  %2918 = vmatpush1.bf16.msra.mxu0 %v7423_v38  ;;  %v2204_v38 = vshrl.u32 %v8432_v33, 16  ;;  %v1882_v43 = vrot.slane %v7633_v42, 1  ;;  %v1883_v45 = vrot.slane %v7634_v44, 1  ;;  %v2218_v53 = vshll.u32 %v8444_v51, 16 }
  0xd1   : > { %2919 = vmatprep.subr.bf16.mxu0 %v9941_v11  ;;  %v2216_v55 = vshrl.u32 %v8444_v51, 16  ;;  %v2237_v26 = vrot.slane %v2235_v15, 1 }
  0xd2   : > { %v1838_v28 = vpop.permute.xlu1 %1837  ;;  %v2209_v47 = vor.u32 %v2208_v39, %v2204_v38  ;;  %v2220_v56 = vrot.slane %v2218_v53, 1  ;;  %v7640_v38 = vld [vmem:[#allocation2 + $0xa4] ss:$0 sps:$4 sm:$0x11]  }
  0xd3   : > { %v1925_v34 = vsel %vm1402_vm11, %v7629_v8, %v1838_v28  ;;  %v8456_v8 = vld [vmem:[#allocation2 + $0x78] sm:$0xff]   ;;  %v2240_v28 = vshrl.u32 %v8468_v6, 16  ;;  %v1892_v39 = vrot.slane %v7640_v38, 1 }
  0xd4   : > { %2920 = vmatpush1.bf16.msra.mxu0 %v7426_v52  ;;  %v2214_v50 = vsel %vm1128_vm9, %v2209_v47, %v2213_v48  ;;  %v1884_v52 = vsel %vm1353_vm10, %v1882_v43, %v1883_v45  ;;  %v2230_v12 = vshll.u32 %v8456_v8, 16  ;;  %v2228_v13 = vshrl.u32 %v8456_v8, 16  ;;  %v8480_v45 = vld [vmem:[#allocation2 + $0x90] sm:$0xff]   ;;  %v8484_v48 = vld [vmem:[#allocation2 + $0x98] ss:$0 sps:$4 sm:$0x11]  }
  0xd5   : > { %2921 = vmatprep.subr.bf16.mxu0 %v9941_v11  ;;  %2335 = vrot.lane.b32.xlu0 %v2214_v50, %s7800_s6  ;;  %v2245_v40 = vor.u32 %v2244_v32, %v2240_v28 }
  0xd6   : > { %v2232_v14 = vrot.slane %v2230_v12, 1 }
  0xd7   : > { %2693 = vmatmul.mubr.bf16.gmra.mrb[20].mxu0 %v1919_v60  ;;  %v7636_v60 = vld [vmem:[#allocation2 + $0x8c] ss:$0 sps:$4 sm:$0x11]  }
  0xd8   : > { %6759 = vmatprep.mubr.msk.bf16.mxu0 %vm1402_vm11, %v1875_v2  ;;  %2922 = vmatpush1.bf16.msra.mxu0 %v7429_v63  ;;  %v7635_v63 = vld [vmem:[#allocation2 + $0x84] sm:$0xff]   ;;  %v1886_v62 = vrot.slane %v7636_v60, 1  ;;  %v2221_v2 = vor.u32 %v2220_v56, %v2216_v55  ;;  %v2233_v18 = vor.u32 %v2232_v14, %v2228_v13 }
  0xd9   : > { %2923 = vmatprep.subr.bf16.mxu0 %v9941_v11  ;;  %v1840_v49 = vpop.permute.xlu0 %1839  ;;  %v1885_v59 = vrot.slane %v7635_v63, 1  ;;  %v7641_v55 = vld [vmem:[#allocation2 + $0xa8] sm:$0xff]  }
  0xda   : > { %v1928_v21 = vsel %vm1402_vm11, %v7631_v27, %v1840_v49  ;;  %v2226_v57 = vsel %vm1128_vm9, %v2221_v2, %v2225_v5  ;;  %v2238_v27 = vsel %vm1128_vm9, %v2233_v18, %v2237_v26  ;;  %v2254_v49 = vshll.u32 %v8480_v45, 16  ;;  %v8492_v5 = vld [vmem:[#allocation2 + $0x9c] sm:$0xff]  }
  0xdb   : > { %2337 = vrot.lane.b32.xlu1 %v2226_v57, %s7800_s6  ;;  %2339 = vrot.lane.b32.xlu0 %v2238_v27, %s7800_s6  ;;  %v1894_v56 = vrot.slane %v7641_v55, 1  ;;  %v8496_v57 = vld [vmem:[#allocation2 + $0xa4] ss:$0 sps:$4 sm:$0x11]   ;;  %v8504_v27 = vld [vmem:[#allocation2 + $0xa8] sm:$0xff]  }
  0xdc   : > { %2924 = vmatpush1.bf16.msra.mxu0 %v7434_v1  ;;  %v1887_v1 = vsel %vm1353_vm10, %v1885_v59, %v1886_v62  ;;  %v2256_v53 = vrot.slane %v2254_v49, 1  ;;  %v2271_v14 = vshll.u32 %v8496_v57, 16  ;;  %v7644_v18 = vld [vmem:[#allocation2 + $0xbc] ss:$0 sps:$4 sm:$0x11]   ;;  %v2276_v32 = vshrl.u32 %v8504_v27, 16 }
  0xdd   : > { %3207 = vmatprep.subr.bf16.mxu0 %v9941_v11  ;;  %v1898_v26 = vrot.slane %v7644_v18, 1  ;;  %v8516_v49 = vld [vmem:[#allocation2 + $0xb4] sm:$0xff]  }
  0xdf   : > { %2701 = vmatmul.mubr.bf16.gmra.mrb[24].mxu0 %v1922_v19  ;;  %v1888_v19 = vrot.slane %v7637_v16, 1 }
  0xe0   : > { %6760 = vmatprep.mubr.msk.bf16.mxu0 %vm1402_vm11, %v1878_v24  ;;  %v1889_v24 = vrot.slane %v7638_v23, 1  ;;  %v7643_v23 = vld [vmem:[#allocation2 + $0xb4] sm:$0xff]  }
  0xe2   : > { %v1842_v3 = vpop.permute.xlu1 %1841  ;;  %v1890_v7 = vsel %vm1353_vm10, %v1888_v19, %v1889_v24  ;;  %v1897_v24 = vrot.slane %v7643_v23, 1 }
  0xe3   : > { %v1931_v9 = vsel %vm1402_vm11, %v7633_v42, %v1842_v3 }
  0xe4   : > { %v1899_v28 = vsel %vm1353_vm10, %v1897_v24, %v1898_v26 }
  0xe7   : > { %2709 = vmatmul.mubr.bf16.gmra.mrb[28].mxu0 %v1925_v34  ;;  %v2247_v34 = vshll.u32 %v8472_v30, 16 }
  0xe8   : > { %6761 = vmatprep.mubr.msk.bf16.mxu0 %vm1402_vm11, %v1881_v37  ;;  %v1844_v25 = vpop.permute.xlu0 %1843  ;;  %v1891_v37 = vrot.slane %v7639_v36, 1 }
  0xe9   : > { %v1934_v29 = vsel %vm1402_vm11, %v7635_v63, %v1844_v25  ;;  %v2249_v42 = vrot.slane %v2247_v34, 1  ;;  %v1895_v63 = vrot.slane %v7642_v58, 1 }
  0xea   : > { %v1893_v50 = vsel %vm1353_vm10, %v1891_v37, %v1892_v39 }
  0xeb   : > { %v2250_v44 = vsel %vm1128_vm9, %v2245_v40, %v2249_v42  ;;  %v1896_v12 = vsel %vm1353_vm10, %v1894_v56, %v1895_v63  ;;  %v7645_v40 = vld [vmem:[#allocation2 + $0xc0] sm:$0xff]  }
  0xec   : > { %2341 = vrot.lane.b32.xlu1 %v2250_v44, %s7800_s6  ;;  %v1900_v42 = vrot.slane %v7645_v40, 1 }
  0xed   : > { %v1846_v43 = vpop.permute.xlu1 %1845 }
  0xee   : > { %v1937_v47 = vsel %vm1402_vm11, %v7637_v16, %v1846_v43  ;;  %v2273_v16 = vrot.slane %v2271_v14, 1  ;;  %v7646_v43 = vld [vmem:[#allocation2 + $0xc8] ss:$0 sps:$4 sm:$0x11]  }
  0xef   : > { %2717 = vmatmul.mubr.bf16.gmra.mrb[32].mxu0 %v1928_v21  ;;  %v2252_v21 = vshrl.u32 %v8480_v45, 16  ;;  %v1901_v44 = vrot.slane %v7646_v43, 1  ;;  %v8532_v14 = vld [vmem:[#allocation2 + $0xc8] ss:$0 sps:$4 sm:$0x11]  }
  0xf0   : > { %6762 = vmatprep.mubr.msk.bf16.mxu0 %vm1402_vm11, %v1884_v52  ;;  %v2259_v52 = vshll.u32 %v8484_v48, 16  ;;  %v2307_v24 = vshll.u32 %v8532_v14, 16 }
  0xf1   : > { %v2257_v59 = vor.u32 %v2256_v53, %v2252_v21  ;;  %v8520_v21 = vld [vmem:[#allocation2 + $0xbc] ss:$0 sps:$4 sm:$0x11]   ;;  %v2290_v53 = vshll.u32 %v8516_v49, 16 }
  0xf2   : > { %v2261_v60 = vrot.slane %v2259_v52, 1  ;;  %v1848_v62 = vpop.permute.xlu0 %1847  ;;  %v1902_v52 = vsel %vm1353_vm10, %v1900_v42, %v1901_v44  ;;  %v2295_v58 = vshll.u32 %v8520_v21, 16  ;;  %v2309_v26 = vrot.slane %v2307_v24, 1  ;;  %v7451_v24 = vld [vmem:[%s9938_s1 + $0xe0] sm:$0xff]  }
  0xf3   : > { %v1940_v3 = vsel %vm1402_vm11, %v7639_v36, %v1848_v62  ;;  %v2283_v36 = vshll.u32 %v8508_v31, 16  ;;  %v2292_v56 = vrot.slane %v2290_v53, 1  ;;  %v7647_v62 = vld [vmem:[#allocation2] sm:$0xff]  }
  0xf4   : > { %v2262_v2 = vsel %vm1128_vm9, %v2257_v59, %v2261_v60  ;;  %v2297_v59 = vrot.slane %v2295_v58, 1 }
  0xf5   : > { %2343 = vrot.lane.b32.xlu0 %v2262_v2, %s7800_s6  ;;  %v2285_v38 = vrot.slane %v2283_v36, 1  ;;  %v1354_v2 = vrot.slane %v7647_v62, 1  ;;  %v8540_v36 = vld [vmem:[#allocation2 + $0xcc] sm:$0xff]  }
  0xf6   : > { %v2312_v43 = vshrl.u32 %v8540_v36, 16 }
  0xf7   : > { %2725 = vmatmul.mubr.bf16.gmra.mrb[36].mxu0 %v1931_v9  ;;  %v2266_v9 = vshll.u32 %v8492_v5, 16 }
  0xf8   : > { %6763 = vmatprep.mubr.msk.bf16.mxu0 %vm1402_vm11, %v1887_v1  ;;  %v2264_v1 = vshrl.u32 %v8492_v5, 16 }
  0xf9   : > { %v2268_v13 = vrot.slane %v2266_v9, 1 }
  0xfb   : > { %v2269_v15 = vor.u32 %v2268_v13, %v2264_v1  ;;  %v8528_v1 = vld [vmem:[#allocation2 + $0xc0] sm:$0xff]  }
  0xfc   : > { %v1850_v19 = vpop.permute.xlu1 %1849 }
  0xfd   : > { %v2274_v25 = vsel %vm1128_vm9, %v2269_v15, %v2273_v16  ;;  %v2302_v15 = vshll.u32 %v8528_v1, 16 }
  0xfe   : > { %2345 = vrot.lane.b32.xlu1 %v2274_v25, %s7800_s6 }
  0xff   : > { %2733 = vmatmul.mubr.bf16.gmra.mrb[40].mxu0 %v1934_v29  ;;  %v1943_v29 = vsel %vm1402_vm11, %v7641_v55, %v1850_v19  ;;  %v2288_v55 = vshrl.u32 %v8516_v49, 16  ;;  %v2300_v19 = vshrl.u32 %v8528_v1, 16 }
 0x100   : > { %6764 = vmatprep.mubr.msk.bf16.mxu0 %vm1402_vm11, %v1890_v7  ;;  %v2278_v7 = vshll.u32 %v8504_v27, 16 }
 0x101   : > { %v1852_v39 = vpop.permute.xlu0 %1851  ;;  %v2293_v63 = vor.u32 %v2292_v56, %v2288_v55  ;;  %v7651_v56 = vld [vmem:[#allocation2 + $0x18] sm:$0xff]  }
 0x102   : > { %v2280_v34 = vrot.slane %v2278_v7, 1  ;;  %v1360_v58 = vrot.slane %v7651_v56, 1 }
 0x104   : > { %v2281_v37 = vor.u32 %v2280_v34, %v2276_v32 }
 0x105   : > { %v1322_v25 = vpop.permute.xlu0 %1321 }
 0x107   : > { %2741 = vmatmul.mubr.bf16.gmra.mrb[44].mxu0 %v1937_v47  ;;  %v2286_v47 = vsel %vm1128_vm9, %v2281_v37, %v2285_v38  ;;  %v1404_v37 = vsel %vm1402_vm11, %v7647_v62, %v1322_v25  ;;  %v7437_v38 = vld [vmem:[%s9938_s1 + $0xc0] sm:$0xff]  }
 0x108   : > { %6765 = vmatprep.mubr.msk.bf16.mxu0 %vm1402_vm11, %v1893_v50  ;;  %2347 = vrot.lane.b32.xlu0 %v2286_v47, %s7800_s6  ;;  %v1946_v50 = vsel %vm1402_vm11, %v7643_v23, %v1852_v39  ;;  %v2304_v23 = vrot.slane %v2302_v15, 1  ;;  %v8547_v39 = vld [vmem:[#allocation2 + $0xd4] ss:$0 sps:$4 sm:$0x11]  }
 0x109   : > { %v2319_v47 = vshll.u32 %v8547_v39, 16 }
 0x10a   : > { %v1854_v60 = vpop.permute.xlu1 %1853  ;;  %v2305_v18 = vor.u32 %v2304_v23, %v2300_v19 }
 0x10b   : > { %v1949_v13 = vsel %vm1402_vm11, %v7645_v40, %v1854_v60  ;;  %v2314_v40 = vshll.u32 %v8540_v36, 16 }
 0x10c   : > { %v2310_v34 = vsel %vm1128_vm9, %v2305_v18, %v2309_v26  ;;  %v7456_v26 = vld [vmem:[%s9938_s1 + $0xe8] sm:$0xff]  }
 0x10d   : > { %2351 = vrot.lane.b32.xlu0 %v2310_v34, %s7800_s6  ;;  %v2316_v44 = vrot.slane %v2314_v40, 1  ;;  %v7462_v40 = vld [vmem:[%s9938_s1 + $0xf8] sm:$0xff]  }
 0x10e   : > { %v1324_v55 = vpop.permute.xlu1 %1323 }
 0x10f   : > { %2749 = vmatmul.mubr.bf16.gmra.mrb[48].mxu0 %v1940_v3  ;;  %v7648_v3 = vld [vmem:[#allocation2 + $0x8] ss:$0 sps:$4 sm:$0x11]   ;;  %v2317_v53 = vor.u32 %v2316_v44, %v2312_v43  ;;  %v7657_v43 = vld [vmem:[#allocation2 + $0x3c] sm:$0xff]  }
 0x110   : > { %6766 = vmatprep.mubr.msk.bf16.mxu0 %vm1402_vm11, %v1896_v12  ;;  %v1355_v9 = vrot.slane %v7648_v3, 1  ;;  %v2298_v12 = vsel %vm1128_vm9, %v2293_v63, %v2297_v59  ;;  %v7652_v63 = vld [vmem:[#allocation2 + $0x20] ss:$0 sps:$4 sm:$0x11]   ;;  %v1369_v44 = vrot.slane %v7657_v43, 1 }
 0x111   : > { %2349 = vrot.lane.b32.xlu1 %v2298_v12, %s7800_s6  ;;  %v1361_v59 = vrot.slane %v7652_v63, 1  ;;  %v1326_v12 = vpop.permute.xlu0 %1325  ;;  %v7659_v63 = vld [vmem:[#allocation2 + $0x48] sm:$0xff]  }
 0x112   : > { %v1356_v16 = vsel %vm1353_vm10, %v1354_v2, %v1355_v9  ;;  %v7445_v2 = vld [vmem:[%s9938_s1 + $0xd0] sm:$0xff]   ;;  %v7448_v9 = vld [vmem:[%s9938_s1 + $0xd8] sm:$0xff]   ;;  %v1410_v23 = vsel %vm1402_vm11, %v7651_v56, %v1326_v12  ;;  %v1328_v25 = vpop.permute.xlu1 %1327  ;;  %v7470_v56 = vld [vmem:[%s9938_s1 + $0x108] sm:$0xff]  }
 0x113   : > { %v1362_v3 = vsel %vm1353_vm10, %v1360_v58, %v1361_v59  ;;  %v1372_v59 = vrot.slane %v7659_v63, 1  ;;  %v7478_v12 = vld [vmem:[%s9938_s1 + $0x118] sm:$0xff]  }
 0x116   : > { %v1332_v58 = vpop.permute.xlu1 %1331 }
 0x117   : > { %2757 = vmatmul.mubr.bf16.gmra.mrb[52].mxu0 %v1943_v29  ;;  %v7649_v29 = vld [vmem:[#allocation2 + $0xc] sm:$0xff]  }
 0x118   : > { %6767 = vmatprep.mubr.msk.bf16.mxu0 %vm1402_vm11, %v1899_v28  ;;  %v1357_v7 = vrot.slane %v7649_v29, 1  ;;  %v7650_v28 = vld [vmem:[#allocation2 + $0x14] ss:$0 sps:$4 sm:$0x11]   ;;  %v1407_v62 = vsel %vm1402_vm11, %v7649_v29, %v1324_v55 }
 0x119   : > { %v1358_v32 = vrot.slane %v7650_v28, 1  ;;  %v7655_v29 = vld [vmem:[#allocation2 + $0x30] sm:$0xff]   ;;  %v7656_v28 = vld [vmem:[#allocation2 + $0x38] ss:$0 sps:$4 sm:$0x11]  }
 0x11b   : > { %v1359_v42 = vsel %vm1353_vm10, %v1357_v7, %v1358_v32  ;;  %v1366_v7 = vrot.slane %v7655_v29, 1  ;;  %v1367_v32 = vrot.slane %v7656_v28, 1 }
 0x11f   : > { %2765 = vmatmul.mubr.bf16.gmra.mrb[56].mxu0 %v1946_v50  ;;  %v7440_v50 = vld [vmem:[%s9938_s1 + $0xc8] sm:$0xff]  }
 0x120   : > { %6768 = vmatprep.mubr.msk.bf16.mxu0 %vm1402_vm11, %v1902_v52  ;;  %v2321_v52 = vrot.slane %v2319_v47, 1  ;;  %v7658_v47 = vld [vmem:[#allocation2 + $0x44] ss:$0 sps:$4 sm:$0x11]  }
 0x122   : > { %v2322_v60 = vsel %vm1128_vm9, %v2317_v53, %v2321_v52  ;;  %v7467_v52 = vld [vmem:[%s9938_s1 + $0x100] sm:$0xff]  }
 0x123   : > { %2353 = vrot.lane.b32.xlu1 %v2322_v60, %s7800_s6  ;;  %v7660_v60 = vld [vmem:[#allocation2 + $0x50] ss:$0 sps:$4 sm:$0x11]  }
 0x127   : > { %2773 = vmatmul.mubr.bf16.gmra.mrb[60].mxu0 %v1949_v13  ;;  %v7653_v13 = vld [vmem:[#allocation2 + $0x24] sm:$0xff]  }
 0x128   : > { %6781 = vmatprep.mubr.msk.bf16.mxu0 %vm1402_vm11, %v1356_v16  ;;  %v1363_v15 = vrot.slane %v7653_v13, 1  ;;  %v7654_v16 = vld [vmem:[#allocation2 + $0x2c] ss:$0 sps:$4 sm:$0x11]   ;;  %v1413_v34 = vsel %vm1402_vm11, %v7653_v13, %v1328_v25  ;;  %v7663_v25 = vld [vmem:[#allocation2 + $0x60] sm:$0xff]  }
 0x129   : > { %v1364_v19 = vrot.slane %v7654_v16, 1 }
 0x12b   : > { %v1365_v18 = vsel %vm1353_vm10, %v1363_v15, %v1364_v19  ;;  %v7661_v15 = vld [vmem:[#allocation2 + $0x54] sm:$0xff]   ;;  %v7662_v19 = vld [vmem:[#allocation2 + $0x5c] ss:$0 sps:$4 sm:$0x11]  }
 0x12c   : > { %v1375_v16 = vrot.slane %v7661_v15, 1 }
 0x12f   : > { %2934 = vmatmul.mubr.bf16.vlgmr.msra.gmra.mrb[0].mxu0 %v1404_v37  ;;  %v7459_v37 = vld [vmem:[%s9938_s1 + $0xf0] sm:$0xff]  }
 0x130   : > { %3208 = vmatpush1.bf16.msra.mxu0 %v7437_v38  ;;  %6782 = vmatprep.mubr.msk.bf16.mxu0 %vm1402_vm11, %v1359_v42  ;;  %v1368_v38 = vsel %vm1353_vm10, %v1366_v7, %v1367_v32  ;;  %v1330_v42 = vpop.permute.xlu0 %1329  ;;  %v7664_v7 = vld [vmem:[#allocation2 + $0x68] ss:$0 sps:$4 sm:$0x11]  }
 0x131   : > { %3209 = vmatprep.subr.bf16.mxu0 %v9941_v11  ;;  %v1416_v53 = vsel %vm1402_vm11, %v7655_v29, %v1330_v42  ;;  %v1378_v29 = vrot.slane %v7663_v25, 1  ;;  %v1379_v28 = vrot.slane %v7664_v7, 1  ;;  %v7666_v42 = vld [vmem:[#allocation2 + $0x74] ss:$0 sps:$4 sm:$0x11]  }
 0x132   : > { %v7674_v7 = vld [vmem:[#allocation2 + $0xa4] ss:$0 sps:$4 sm:$0x11]  }
 0x134   : > { %3210 = vmatpush1.bf16.msra.mxu0 %v7440_v50  ;;  %v1370_v50 = vrot.slane %v7658_v47, 1  ;;  %v1334_v13 = vpop.permute.xlu0 %1333 }
 0x135   : > { %3211 = vmatprep.subr.bf16.mxu0 %v9941_v11 }
 0x136   : > { %v1371_v55 = vsel %vm1353_vm10, %v1369_v44, %v1370_v50 }
 0x137   : > { %2942 = vmatmul.mubr.bf16.gmra.mrb[4].mxu0 %v1407_v62  ;;  %v1373_v62 = vrot.slane %v7660_v60, 1  ;;  %v7669_v60 = vld [vmem:[#allocation2 + $0x84] sm:$0xff]  }
 0x138   : > { %6783 = vmatprep.mubr.msk.bf16.mxu0 %vm1402_vm11, %v1362_v3  ;;  %3212 = vmatpush1.bf16.msra.mxu0 %v7445_v2  ;;  %v1419_v2 = vsel %vm1402_vm11, %v7657_v43, %v1332_v58  ;;  %v7473_v3 = vld [vmem:[%s9938_s1 + $0x110] sm:$0xff]   ;;  %v1382_v43 = vrot.slane %v7666_v42, 1 }
 0x139   : > { %3213 = vmatprep.subr.bf16.mxu0 %v9941_v11  ;;  %v7676_v42 = vld [vmem:[#allocation2 + $0xb0] ss:$0 sps:$4 sm:$0x11]  }
 0x13c   : > { %3214 = vmatpush1.bf16.msra.mxu0 %v7448_v9  ;;  %v1374_v9 = vsel %vm1353_vm10, %v1372_v59, %v1373_v62  ;;  %v1387_v62 = vrot.slane %v7669_v60, 1 }
 0x13d   : > { %3215 = vmatprep.subr.bf16.mxu0 %v9941_v11 }
 0x13f   : > { %2950 = vmatmul.mubr.bf16.gmra.mrb[8].mxu0 %v1410_v23  ;;  %v1376_v23 = vrot.slane %v7662_v19, 1  ;;  %v7672_v19 = vld [vmem:[#allocation2 + $0x98] ss:$0 sps:$4 sm:$0x11]  }
 0x140   : > { %6784 = vmatprep.mubr.msk.bf16.mxu0 %vm1402_vm11, %v1365_v18  ;;  %3216 = vmatpush1.bf16.msra.mxu0 %v7451_v24  ;;  %v1422_v24 = vsel %vm1402_vm11, %v7659_v63, %v1334_v13 }
 0x141   : > { %3217 = vmatprep.subr.bf16.mxu0 %v9941_v11  ;;  %v1377_v18 = vsel %vm1353_vm10, %v1375_v16, %v1376_v23  ;;  %v1391_v23 = vrot.slane %v7672_v19, 1  ;;  %v7681_v19 = vld [vmem:[#allocation2 + $0x24] sm:$0xff]  }
 0x144   : > { %3218 = vmatpush1.bf16.msra.mxu0 %v7456_v26  ;;  %v1336_v26 = vpop.permute.xlu1 %1335 }
 0x145   : > { %3219 = vmatprep.subr.bf16.mxu0 %v9941_v11  ;;  %v1425_v32 = vsel %vm1402_vm11, %v7661_v15, %v1336_v26  ;;  %v7671_v15 = vld [vmem:[#allocation2 + $0x90] sm:$0xff]  }
 0x146   : > { %v1390_v16 = vrot.slane %v7671_v15, 1 }
 0x147   : > { %2958 = vmatmul.mubr.bf16.gmra.mrb[12].mxu0 %v1413_v34  ;;  %v1380_v34 = vsel %vm1353_vm10, %v1378_v29, %v1379_v28  ;;  %v1394_v28 = vrot.slane %v7674_v7, 1  ;;  %v7683_v7 = vld [vmem:[#allocation2 + $0x30] sm:$0xff]  }
 0x148   : > { %6785 = vmatprep.mubr.msk.bf16.mxu0 %vm1402_vm11, %v1368_v38  ;;  %3220 = vmatpush1.bf16.msra.mxu0 %v7459_v37  ;;  %v1338_v37 = vpop.permute.xlu0 %1337  ;;  %v7665_v38 = vld [vmem:[#allocation2 + $0x6c] sm:$0xff]   ;;  %v1340_v50 = vpop.permute.xlu1 %1339 }
 0x149   : > { %3221 = vmatprep.subr.bf16.mxu0 %v9941_v11  ;;  %v1428_v44 = vsel %vm1402_vm11, %v7663_v25, %v1338_v37  ;;  %v1431_v58 = vsel %vm1402_vm11, %v7665_v38, %v1340_v50  ;;  %v7673_v25 = vld [vmem:[#allocation2 + $0x9c] sm:$0xff]  }
 0x14a   : > { %v1393_v29 = vrot.slane %v7673_v25, 1 }
 0x14c   : > { %3222 = vmatpush1.bf16.msra.mxu0 %v7462_v40  ;;  %v1381_v40 = vrot.slane %v7665_v38, 1  ;;  %v1342_v59 = vpop.permute.xlu0 %1341  ;;  %v1344_v13 = vpop.permute.xlu1 %1343  ;;  %v7675_v38 = vld [vmem:[#allocation2 + $0xa8] sm:$0xff]  }
 0x14d   : > { %3223 = vmatprep.subr.bf16.mxu0 %v9941_v11 }
 0x14e   : > { %v1383_v47 = vsel %vm1353_vm10, %v1381_v40, %v1382_v43  ;;  %v1396_v40 = vrot.slane %v7675_v38, 1  ;;  %v1397_v43 = vrot.slane %v7676_v42, 1  ;;  %v7685_v42 = vld [vmem:[#allocation2 + $0x3c] sm:$0xff]  }
 0x14f   : > { %2966 = vmatmul.mubr.bf16.gmra.mrb[16].mxu0 %v1416_v53  ;;  %v7667_v53 = vld [vmem:[#allocation2 + $0x78] sm:$0xff]  }
 0x150   : > { %6786 = vmatprep.mubr.msk.bf16.mxu0 %vm1402_vm11, %v1371_v55  ;;  %3224 = vmatpush1.bf16.msra.mxu0 %v7467_v52  ;;  %v1384_v52 = vrot.slane %v7667_v53, 1  ;;  %v7668_v55 = vld [vmem:[#allocation2 + $0x80] ss:$0 sps:$4 sm:$0x11]   ;;  %v1346_v26 = vpop.permute.xlu0 %1345  ;;  %v1348_v37 = vpop.permute.xlu1 %1347 }
 0x151   : > { %3225 = vmatprep.subr.bf16.mxu0 %v9941_v11 }
 0x154   : > { %3226 = vmatpush1.bf16.msra.mxu0 %v7470_v56  ;;  %v1385_v56 = vrot.slane %v7668_v55, 1  ;;  %v1350_v50 = vpop.permute.xlu0 %1349  ;;  %v7678_v55 = vld [vmem:[#allocation2 + $0xbc] ss:$0 sps:$4 sm:$0x11]  }
 0x155   : > { %3227 = vmatprep.subr.bf16.mxu0 %v9941_v11 }
 0x156   : > { %v1386_v63 = vsel %vm1353_vm10, %v1384_v52, %v1385_v56  ;;  %v1400_v56 = vrot.slane %v7678_v55, 1  ;;  %v2367_v55 = vrot.slane %v8402_v22, 1 }
 0x157   : > { %2974 = vmatmul.mubr.bf16.gmra.mrb[20].mxu0 %v1419_v2  ;;  %v7670_v2 = vld [vmem:[#allocation2 + $0x8c] ss:$0 sps:$4 sm:$0x11]  }
 0x158   : > { %6787 = vmatprep.mubr.msk.bf16.mxu0 %vm1402_vm11, %v1374_v9  ;;  %3228 = vmatpush1.bf16.msra.mxu0 %v7473_v3  ;;  %v1388_v3 = vrot.slane %v7670_v2, 1  ;;  %v1434_v9 = vsel %vm1402_vm11, %v7667_v53, %v1342_v59  ;;  %v7677_v53 = vld [vmem:[#allocation2 + $0xb4] sm:$0xff]   ;;  %v1352_v59 = vpop.permute.xlu1 %1351  ;;  %v7680_v2 = vld [vmem:[#allocation2 + $0x20] ss:$0 sps:$4 sm:$0x11]  }
 0x159   : > { %3229 = vmatprep.subr.bf16.mxu0 %v9941_v11  ;;  %v1399_v52 = vrot.slane %v7677_v53, 1 }
 0x15c   : > { %3230 = vmatpush1.bf16.msra.mxu0 %v7478_v12  ;;  %v1389_v12 = vsel %vm1353_vm10, %v1387_v62, %v1388_v3  ;;  %v2356_v3 = vrot.slane %v7680_v2, 1 }
 0x15f   : > { %2982 = vmatmul.mubr.bf16.gmra.mrb[24].mxu0 %v1422_v24  ;;  %v1437_v24 = vsel %vm1402_vm11, %v7669_v60, %v1344_v13  ;;  %v7679_v60 = vld [vmem:[#allocation2 + $0x18] sm:$0xff]   ;;  %v289_v13 = vld [vmem:[#allocation3 + $0xc] sm:$0x1] }
 0x160   : > { %6788 = vmatprep.mubr.msk.bf16.mxu0 %vm1402_vm11, %v1377_v18  ;;  %v1392_v18 = vsel %vm1353_vm10, %v1390_v16, %v1391_v23  ;;  %v2355_v62 = vrot.slane %v7679_v60, 1  ;;  %v2324_v16 = vpop.permute.xlu0 %2323  ;;  %v2358_v23 = vrot.slane %v7681_v19, 1 }
 0x167   : > { %2990 = vmatmul.mubr.bf16.gmra.mrb[28].mxu0 %v1425_v32  ;;  %v1440_v32 = vsel %vm1402_vm11, %v7671_v15, %v1346_v26  ;;  %v290_v15 = vsel %vm7875_vm2, 0, %v289_v13  ;;  %v2404_v26 = vsel %vm1402_vm11, %v7679_v60, %v2324_v16  ;;  %v2370_v60 = vrot.slane %v8419_v17, 1 }
 0x168   : > { %6789 = vmatprep.mubr.msk.bf16.mxu0 %vm1402_vm11, %v1380_v34  ;;  %v1395_v34 = vsel %vm1353_vm10, %v1393_v29, %v1394_v28  ;;  %291 = vst [vmem:[#allocation3 + $0xc] sm:$0x1] %v290_v15  ;;  %v2326_v29 = vpop.permute.xlu1 %2325  ;;  %v2361_v28 = vrot.slane %v7683_v7, 1  ;;  %v2377_v16 = vrot.slane %v8448_v54, 1 }
 0x16f   : > { %2998 = vmatmul.mubr.bf16.gmra.mrb[32].mxu0 %v1428_v44  ;;  %v1443_v44 = vsel %vm1402_vm11, %v7673_v25, %v1348_v37  ;;  %v2407_v37 = vsel %vm1402_vm11, %v7681_v19, %v2326_v29 }
 0x170   : > { %6790 = vmatprep.mubr.msk.bf16.mxu0 %vm1402_vm11, %v1383_v47  ;;  %v1398_v47 = vsel %vm1353_vm10, %v1396_v40, %v1397_v43  ;;  %v2328_v40 = vpop.permute.xlu0 %2327  ;;  %v2364_v43 = vrot.slane %v7685_v42, 1 }
 0x177   : > { %3006 = vmatmul.mubr.bf16.gmra.mrb[36].mxu0 %v1431_v58  ;;  %v1446_v58 = vsel %vm1402_vm11, %v7675_v38, %v1350_v50  ;;  %v2410_v50 = vsel %vm1402_vm11, %v7683_v7, %v2328_v40 }
 0x178   : > { %6791 = vmatprep.mubr.msk.bf16.mxu0 %vm1402_vm11, %v1386_v63  ;;  %v1401_v63 = vsel %vm1353_vm10, %v1399_v52, %v1400_v56  ;;  %v2330_v52 = vpop.permute.xlu1 %2329  ;;  %v2368_v56 = vrot.slane %v8406_v61, 1 }
 0x17c   : > { %v2334_v61 = vpop.permute.xlu1 %2333 }
 0x17d   : > { %v2419_v13 = vsel %vm1402_vm11, %v8419_v17, %v2334_v61  ;;  %v2379_v17 = vrot.slane %v8456_v8, 1 }
 0x17f   : > { %3014 = vmatmul.mubr.bf16.gmra.mrb[40].mxu0 %v1434_v9  ;;  %v1449_v9 = vsel %vm1402_vm11, %v7677_v53, %v1352_v59  ;;  %v2332_v59 = vpop.permute.xlu0 %2331 }
 0x180   : > { %6792 = vmatprep.mubr.msk.bf16.mxu0 %vm1402_vm11, %v1389_v12  ;;  %v2357_v12 = vsel %vm1353_vm10, %v2355_v62, %v2356_v3  ;;  %v2371_v62 = vrot.slane %v8423_v20, 1  ;;  %v2416_v2 = vsel %vm1402_vm11, %v8402_v22, %v2332_v59  ;;  %v2376_v22 = vrot.slane %v8444_v51, 1 }
 0x181   : > { %v2398_v59 = vrot.slane %v8532_v14, 1  ;;  %v2400_v14 = vrot.slane %v8540_v36, 1 }
 0x182   : > { %v2372_v3 = vsel %vm1353_vm10, %v2370_v60, %v2371_v62  ;;  %v295_v60 = vld [vmem:[#allocation3 + $0x24] sm:$0x1] }
 0x183   : > { %v2336_v20 = vpop.permute.xlu0 %2335 }
 0x184   : > { %v2422_v19 = vsel %vm1402_vm11, %v8432_v33, %v2336_v20 }
 0x187   : > { %3022 = vmatmul.mubr.bf16.gmra.mrb[44].mxu0 %v1437_v24  ;;  %v7682_v24 = vld [vmem:[#allocation2 + $0x2c] ss:$0 sps:$4 sm:$0x11]   ;;  %v2340_v54 = vpop.permute.xlu0 %2339 }
 0x188   : > { %6793 = vmatprep.mubr.msk.bf16.mxu0 %vm1402_vm11, %v1392_v18  ;;  %v2359_v18 = vrot.slane %v7682_v24, 1  ;;  %v2380_v24 = vrot.slane %v8460_v10, 1  ;;  %v2428_v29 = vsel %vm1402_vm11, %v8456_v8, %v2340_v54  ;;  %v2388_v8 = vrot.slane %v8492_v5, 1  ;;  %v307_v54 = vld [vmem:[#allocation3 + $0x54] sm:$0x1] }
 0x18a   : > { %v2360_v25 = vsel %vm1353_vm10, %v2358_v23, %v2359_v18  ;;  %v2378_v23 = vsel %vm1353_vm10, %v2376_v22, %v2377_v16  ;;  %v346_v22 = vld [vmem:[#allocation3 + $0x38] sm:$0x1] }
 0x18b   : > { %v347_v16 = vsel %vm7886_vm5, 0, %v346_v22 }
 0x18c   : > { %348 = vst [vmem:[#allocation3 + $0x38] sm:$0x1] %v347_v16  ;;  %v7514_v16 = vld [vmem:[%s9939_s2 + $0x98] sm:$0xff]  }
 0x18f   : > { %3030 = vmatmul.mubr.bf16.gmra.mrb[48].mxu0 %v1440_v32  ;;  %v7684_v32 = vld [vmem:[#allocation2 + $0x38] ss:$0 sps:$4 sm:$0x11]  }
 0x190   : > { %6794 = vmatprep.mubr.msk.bf16.mxu0 %vm1402_vm11, %v1395_v34  ;;  %v2362_v34 = vrot.slane %v7684_v32, 1 }
 0x192   : > { %v2363_v38 = vsel %vm1353_vm10, %v2361_v28, %v2362_v34  ;;  %v2386_v28 = vrot.slane %v8484_v48, 1 }
 0x197   : > { %3038 = vmatmul.mubr.bf16.gmra.mrb[52].mxu0 %v1443_v44  ;;  %v7686_v44 = vld [vmem:[#allocation2 + $0x44] ss:$0 sps:$4 sm:$0x11]  }
 0x198   : > { %6795 = vmatprep.mubr.msk.bf16.mxu0 %vm1402_vm11, %v1398_v47  ;;  %v2365_v47 = vrot.slane %v7686_v44, 1 }
 0x19a   : > { %v2366_v53 = vsel %vm1353_vm10, %v2364_v43, %v2365_v47  ;;  %v337_v47 = vld [vmem:[#allocation3 + $0x14] sm:$0x1] }
 0x19f   : > { %3046 = vmatmul.mubr.bf16.gmra.mrb[56].mxu0 %v1446_v58  ;;  %v2413_v58 = vsel %vm1402_vm11, %v7685_v42, %v2330_v52  ;;  %v2392_v42 = vrot.slane %v8508_v31, 1  ;;  %v292_v52 = vld [vmem:[#allocation3 + $0x18] sm:$0x1] }
 0x1a0   : > { %6796 = vmatprep.mubr.msk.bf16.mxu0 %vm1402_vm11, %v1401_v63  ;;  %v2369_v63 = vsel %vm1353_vm10, %v2367_v55, %v2368_v56  ;;  %v340_v56 = vld [vmem:[#allocation3 + $0x20] sm:$0x1] }
 0x1a7   : > { %3054 = vmatmul.mubr.bf16.gmra.mrb[60].mxu0 %v1449_v9  ;;  %v2373_v9 = vrot.slane %v8432_v33, 1  ;;  %v2382_v33 = vrot.slane %v8468_v6, 1 }
 0x1a8   : > { %6833 = vmatprep.mubr.msk.bf16.mxu0 %vm1402_vm11, %v2357_v12  ;;  %v2374_v12 = vrot.slane %v8436_v35, 1  ;;  %v2338_v35 = vpop.permute.xlu1 %2337 }
 0x1a9   : > { %v2425_v18 = vsel %vm1402_vm11, %v8444_v51, %v2338_v35  ;;  %v2385_v51 = vrot.slane %v8480_v45, 1  ;;  %v349_v35 = vld [vmem:[#allocation3 + $0x44] sm:$0x1] }
 0x1aa   : > { %v2375_v15 = vsel %vm1353_vm10, %v2373_v9, %v2374_v12 }
 0x1ab   : > { %v2387_v34 = vsel %vm1353_vm10, %v2385_v51, %v2386_v28  ;;  %v358_v51 = vld [vmem:[#allocation3 + $0x68] sm:$0x1] }
 0x1ac   : > { %v2342_v10 = vpop.permute.xlu1 %2341  ;;  %v359_v28 = vsel %vm7886_vm5, 0, %v358_v51 }
 0x1ad   : > { %v2431_v32 = vsel %vm1402_vm11, %v8468_v6, %v2342_v10  ;;  %v2391_v6 = vrot.slane %v8504_v27, 1  ;;  %360 = vst [vmem:[#allocation3 + $0x68] sm:$0x1] %v359_v28 }
 0x1af   : > { %3240 = vmatmul.mubr.bf16.vlgmr.msra.gmra.mrb[0].mxu0 %v2404_v26  ;;  %v2381_v26 = vsel %vm1353_vm10, %v2379_v17, %v2380_v24  ;;  %v2393_v44 = vsel %vm1353_vm10, %v2391_v6, %v2392_v42  ;;  %v350_v17 = vsel %vm7886_vm5, 0, %v349_v35  ;;  %v304_v24 = vld [vmem:[#allocation3 + $0x48] sm:$0x1]  ;;  %v319_v6 = vld [vmem:[#allocation3 + $0x84] sm:$0x1] }
 0x1b0   : > { %6834 = vmatprep.mubr.msk.bf16.mxu0 %vm1402_vm11, %v2360_v25  ;;  %v2383_v25 = vrot.slane %v8472_v30, 1  ;;  %v2344_v30 = vpop.permute.xlu0 %2343  ;;  %v2346_v48 = vpop.permute.xlu1 %2345  ;;  %351 = vst [vmem:[#allocation3 + $0x44] sm:$0x1] %v350_v17  ;;  %v320_v42 = vsel %vm7875_vm2, 0, %v319_v6 }
 0x1b1   : > { %v2437_v43 = vsel %vm1402_vm11, %v8492_v5, %v2346_v48  ;;  %v293_v5 = vsel %vm7875_vm2, 0, %v292_v52  ;;  %321 = vst [vmem:[#allocation3 + $0x84] sm:$0x1] %v320_v42  ;;  %v7501_v52 = vld [vmem:[%s9939_s2 + $0x60] sm:$0xff]  }
 0x1b2   : > { %v2384_v7 = vsel %vm1353_vm10, %v2382_v33, %v2383_v25  ;;  %294 = vst [vmem:[#allocation3 + $0x18] sm:$0x1] %v293_v5  ;;  %v308_v33 = vsel %vm7875_vm2, 0, %v307_v54  ;;  %v355_v25 = vld [vmem:[#allocation3 + $0x5c] sm:$0x1]  ;;  %5624 = vmatpush1.bf16.msra.mxu1 %v7501_v52 }
 0x1b3   : > { %309 = vst [vmem:[#allocation3 + $0x54] sm:$0x1] %v308_v33  ;;  %v373_v5 = vld [vmem:[#allocation3 + $0xa4] sm:$0x1]  ;;  %5625 = vmatprep.subr.bf16.mxu1 %v9941_v11  ;;  %v7518_v33 = vld [vmem:[%s9939_s2 + $0xa8] sm:$0xff]  }
 0x1b7   : > { %3248 = vmatmul.mubr.bf16.gmra.mrb[4].mxu0 %v2407_v37  ;;  %v2389_v37 = vrot.slane %v8496_v57, 1  ;;  %v338_v57 = vsel %vm7886_vm5, 0, %v337_v47  ;;  %v322_v47 = vld [vmem:[#allocation3 + $0x90] sm:$0x1] }
 0x1b8   : > { %6835 = vmatprep.mubr.msk.bf16.mxu0 %vm1402_vm11, %v2363_v38  ;;  %v2434_v38 = vsel %vm1402_vm11, %v8480_v45, %v2344_v30  ;;  %339 = vst [vmem:[#allocation3 + $0x14] sm:$0x1] %v338_v57  ;;  %v2348_v45 = vpop.permute.xlu0 %2347  ;;  %v361_v30 = vld [vmem:[#allocation3 + $0x74] sm:$0x1]  ;;  %v323_v57 = vsel %vm7875_vm2, 0, %v322_v47 }
 0x1b9   : > { %v2390_v40 = vsel %vm1353_vm10, %v2388_v8, %v2389_v37  ;;  %v2440_v31 = vsel %vm1402_vm11, %v8504_v27, %v2348_v45  ;;  %v362_v8 = vsel %vm7886_vm5, 0, %v361_v30  ;;  %v316_v37 = vld [vmem:[#allocation3 + $0x78] sm:$0x1]  ;;  %324 = vst [vmem:[#allocation3 + $0x90] sm:$0x1] %v323_v57 }
 0x1ba   : > { %363 = vst [vmem:[#allocation3 + $0x74] sm:$0x1] %v362_v8  ;;  %v370_v45 = vld [vmem:[#allocation3 + $0x98] sm:$0x1] }
 0x1bc   : > { %v2352_v9 = vpop.permute.xlu0 %2351 }
 0x1bd   : > { %v2446_v12 = vsel %vm1402_vm11, %v8528_v1, %v2352_v9 }
 0x1bf   : > { %3256 = vmatmul.mubr.bf16.gmra.mrb[8].mxu0 %v2410_v50  ;;  %v2394_v50 = vrot.slane %v8516_v49, 1  ;;  %v3854_v30 = vld [vmem:[#allocation3 + $0x14] sm:$0x1] }
 0x1c0   : > { %6836 = vmatprep.mubr.msk.bf16.mxu0 %vm1402_vm11, %v2366_v53  ;;  %v2395_v53 = vrot.slane %v8520_v21, 1  ;;  %v2397_v21 = vrot.slane %v8528_v1, 1  ;;  %v301_v1 = vld [vmem:[#allocation3 + $0x3c] sm:$0x1] }
 0x1c2   : > { %v2396_v55 = vsel %vm1353_vm10, %v2394_v50, %v2395_v53  ;;  %v2399_v62 = vsel %vm1353_vm10, %v2397_v21, %v2398_v59  ;;  %v371_v50 = vsel %vm7886_vm5, 0, %v370_v45  ;;  %v325_v53 = vld [vmem:[#allocation3 + $0x9c] sm:$0x1]  ;;  %v376_v59 = vld [vmem:[#allocation3 + $0xb0] sm:$0x1] }
 0x1c3   : > { %372 = vst [vmem:[#allocation3 + $0x98] sm:$0x1] %v371_v50  ;;  %v7522_v50 = vld [vmem:[%s9939_s2 + $0xb8] sm:$0xff]  }
 0x1c7   : > { %3264 = vmatmul.mubr.bf16.gmra.mrb[12].mxu0 %v2413_v58  ;;  %v341_v58 = vsel %vm7886_vm5, 0, %v340_v56  ;;  %v7502_v56 = vld [vmem:[%s9939_s2 + $0x68] sm:$0xff]  }
 0x1c8   : > { %6837 = vmatprep.mubr.msk.bf16.mxu0 %vm1402_vm11, %v2369_v63  ;;  %342 = vst [vmem:[#allocation3 + $0x20] sm:$0x1] %v341_v58  ;;  %v2350_v63 = vpop.permute.xlu1 %2349  ;;  %5626 = vmatpush1.bf16.msra.mxu1 %v7502_v56  ;;  %v328_v58 = vld [vmem:[#allocation3 + $0xa8] sm:$0x1] }
 0x1c9   : > { %v2443_v27 = vsel %vm1402_vm11, %v8516_v49, %v2350_v63  ;;  %v2401_v49 = vrot.slane %v8547_v39, 1  ;;  %5627 = vmatprep.subr.bf16.mxu1 %v9941_v11  ;;  %v7505_v63 = vld [vmem:[%s9939_s2 + $0x70] sm:$0xff]   ;;  %v329_v21 = vsel %vm7875_vm2, 0, %v328_v58 }
 0x1ca   : > { %330 = vst [vmem:[#allocation3 + $0xa8] sm:$0x1] %v329_v21 }
 0x1cc   : > { %5628 = vmatpush1.bf16.msra.mxu1 %v7505_v63 }
 0x1cd   : > { %5629 = vmatprep.subr.bf16.mxu1 %v9941_v11 }
 0x1cf   : > { %3272 = vmatmul.mubr.bf16.gmra.mrb[16].mxu0 %v2416_v2  ;;  %v296_v2 = vsel %vm7875_vm2, 0, %v295_v60  ;;  %v7506_v60 = vld [vmem:[%s9939_s2 + $0x78] sm:$0xff]  }
 0x1d0   : > { %6838 = vmatprep.mubr.msk.bf16.mxu0 %vm1402_vm11, %v2372_v3  ;;  %297 = vst [vmem:[#allocation3 + $0x24] sm:$0x1] %v296_v2  ;;  %v343_v3 = vld [vmem:[#allocation3 + $0x2c] sm:$0x1]  ;;  %5630 = vmatpush1.bf16.msra.mxu1 %v7506_v60 }
 0x1d1   : > { %v344_v61 = vsel %vm7886_vm5, 0, %v343_v3  ;;  %5631 = vmatprep.subr.bf16.mxu1 %v9941_v11  ;;  %v7509_v2 = vld [vmem:[%s9939_s2 + $0x80] sm:$0xff]  }
 0x1d2   : > { %345 = vst [vmem:[#allocation3 + $0x2c] sm:$0x1] %v344_v61  ;;  %v379_v61 = vld [vmem:[#allocation3 + $0xbc] sm:$0x1] }
 0x1d3   : > { %v380_v9 = vsel %vm7886_vm5, 0, %v379_v61 }
 0x1d4   : > { %5632 = vmatpush1.bf16.msra.mxu1 %v7509_v2  ;;  %381 = vst [vmem:[#allocation3 + $0xbc] sm:$0x1] %v380_v9 }
 0x1d5   : > { %5633 = vmatprep.subr.bf16.mxu1 %v9941_v11 }
 0x1d7   : > { %3280 = vmatmul.mubr.bf16.gmra.mrb[20].mxu0 %v2419_v13  ;;  %v298_v13 = vld [vmem:[#allocation3 + $0x30] sm:$0x1] }
 0x1d8   : > { %6839 = vmatprep.mubr.msk.bf16.mxu0 %vm1402_vm11, %v2375_v15  ;;  %v2402_v15 = vsel %vm1353_vm10, %v2400_v14, %v2401_v49  ;;  %v299_v20 = vsel %vm7875_vm2, 0, %v298_v13  ;;  %v7510_v14 = vld [vmem:[%s9939_s2 + $0x88] sm:$0xff]   ;;  %v334_v49 = vld [vmem:[#allocation3 + $0xc0] sm:$0x1] }
 0x1d9   : > { %300 = vst [vmem:[#allocation3 + $0x30] sm:$0x1] %v299_v20  ;;  %5634 = vmatpush1.bf16.msra.mxu1 %v7510_v14  ;;  %v335_v13 = vsel %vm7875_vm2, 0, %v334_v49 }
 0x1da   : > { %5635 = vmatprep.subr.bf16.mxu1 %v9941_v11  ;;  %336 = vst [vmem:[#allocation3 + $0xc0] sm:$0x1] %v335_v13 }
 0x1df   : > { %3288 = vmatmul.mubr.bf16.gmra.mrb[24].mxu0 %v2422_v19  ;;  %v2354_v19 = vpop.permute.xlu1 %2353 }
 0x1e0   : > { %6840 = vmatprep.mubr.msk.bf16.mxu0 %vm1402_vm11, %v2378_v23  ;;  %v2449_v39 = vsel %vm1402_vm11, %v8540_v36, %v2354_v19  ;;  %v302_v23 = vsel %vm7875_vm2, 0, %v301_v1 }
 0x1e1   : > { %303 = vst [vmem:[#allocation3 + $0x3c] sm:$0x1] %v302_v23 }
 0x1e7   : > { %3296 = vmatmul.mubr.bf16.gmra.mrb[28].mxu0 %v2425_v18  ;;  %v305_v18 = vsel %vm7875_vm2, 0, %v304_v24 }
 0x1e8   : > { %6841 = vmatprep.mubr.msk.bf16.mxu0 %vm1402_vm11, %v2381_v26  ;;  %306 = vst [vmem:[#allocation3 + $0x48] sm:$0x1] %v305_v18  ;;  %v352_v26 = vld [vmem:[#allocation3 + $0x50] sm:$0x1] }
 0x1e9   : > { %v353_v36 = vsel %vm7886_vm5, 0, %v352_v26 }
 0x1ea   : > { %354 = vst [vmem:[#allocation3 + $0x50] sm:$0x1] %v353_v36 }
 0x1ef   : > { %3304 = vmatmul.mubr.bf16.gmra.mrb[32].mxu0 %v2428_v29  ;;  %v356_v29 = vsel %vm7886_vm5, 0, %v355_v25  ;;  %v3850_v25 = vld [vmem:[#allocation3 + $0xc] sm:$0xf] }
 0x1f0   : > { %6842 = vmatprep.mubr.msk.bf16.mxu0 %vm1402_vm11, %v2384_v7  ;;  %357 = vst [vmem:[#allocation3 + $0x5c] sm:$0x1] %v356_v29  ;;  %v310_v7 = vld [vmem:[#allocation3 + $0x60] sm:$0x1] }
 0x1f1   : > { %v311_v10 = vsel %vm7875_vm2, 0, %v310_v7 }
 0x1f2   : > { %312 = vst [vmem:[#allocation3 + $0x60] sm:$0x1] %v311_v10 }
 0x1f7   : > { %3312 = vmatmul.mubr.bf16.gmra.mrb[36].mxu0 %v2431_v32  ;;  %v313_v32 = vld [vmem:[#allocation3 + $0x6c] sm:$0x1] }
 0x1f8   : > { %6843 = vmatprep.mubr.msk.bf16.mxu0 %vm1402_vm11, %v2387_v34  ;;  %v314_v34 = vsel %vm7875_vm2, 0, %v313_v32 }
 0x1f9   : > { %315 = vst [vmem:[#allocation3 + $0x6c] sm:$0x1] %v314_v34 }
 0x1ff   : > { %3320 = vmatmul.mubr.bf16.gmra.mrb[40].mxu0 %v2434_v38  ;;  %v317_v38 = vsel %vm7875_vm2, 0, %v316_v37  ;;  %v7521_v37 = vld [vmem:[%s9939_s2 + $0xb0] sm:$0xff]  }
 0x200   : > { %6844 = vmatprep.mubr.msk.bf16.mxu0 %vm1402_vm11, %v2390_v40  ;;  %318 = vst [vmem:[#allocation3 + $0x78] sm:$0x1] %v317_v38  ;;  %v364_v40 = vld [vmem:[#allocation3 + $0x80] sm:$0x1] }
 0x201   : > { %v365_v48 = vsel %vm7886_vm5, 0, %v364_v40 }
 0x202   : > { %366 = vst [vmem:[#allocation3 + $0x80] sm:$0x1] %v365_v48 }
 0x207   : > { %3328 = vmatmul.mubr.bf16.gmra.mrb[44].mxu0 %v2437_v43  ;;  %v367_v43 = vld [vmem:[#allocation3 + $0x8c] sm:$0x1] }
 0x208   : > { %6845 = vmatprep.mubr.msk.bf16.mxu0 %vm1402_vm11, %v2393_v44  ;;  %v368_v44 = vsel %vm7886_vm5, 0, %v367_v43 }
 0x209   : > { %369 = vst [vmem:[#allocation3 + $0x8c] sm:$0x1] %v368_v44 }
 0x20f   : > { %3336 = vmatmul.mubr.bf16.gmra.mrb[48].mxu0 %v2440_v31  ;;  %v326_v31 = vsel %vm7875_vm2, 0, %v325_v53 }
 0x210   : > { %6846 = vmatprep.mubr.msk.bf16.mxu0 %vm1402_vm11, %v2396_v55  ;;  %327 = vst [vmem:[#allocation3 + $0x9c] sm:$0x1] %v326_v31  ;;  %v374_v55 = vsel %vm7886_vm5, 0, %v373_v5  ;;  %v3857_v31 = vld [vmem:[#allocation3 + $0x18] sm:$0xf] }
 0x211   : > { %375 = vst [vmem:[#allocation3 + $0xa4] sm:$0x1] %v374_v55 }
 0x217   : > { %3344 = vmatmul.mubr.bf16.gmra.mrb[52].mxu0 %v2443_v27  ;;  %v377_v27 = vsel %vm7886_vm5, 0, %v376_v59 }
 0x218   : > { %6847 = vmatprep.mubr.msk.bf16.mxu0 %vm1402_vm11, %v2399_v62  ;;  %378 = vst [vmem:[#allocation3 + $0xb0] sm:$0x1] %v377_v27  ;;  %v331_v62 = vld [vmem:[#allocation3 + $0xb4] sm:$0x1] }
 0x219   : > { %v332_v3 = vsel %vm7875_vm2, 0, %v331_v62  ;;  %v3861_v62 = vld [vmem:[#allocation3 + $0x20] sm:$0x1] }
 0x21a   : > { %333 = vst [vmem:[#allocation3 + $0xb4] sm:$0x1] %v332_v3 }
 0x21f   : > { %3352 = vmatmul.mubr.bf16.gmra.mrb[56].mxu0 %v2446_v12  ;;  %v7513_v12 = vld [vmem:[%s9939_s2 + $0x90] sm:$0xff]  }
 0x220   : > { %6848 = vmatprep.mubr.msk.bf16.mxu0 %vm1402_vm11, %v2402_v15  ;;  %v382_v15 = vld [vmem:[#allocation3 + $0xc8] sm:$0x1]  ;;  %5636 = vmatpush1.bf16.msra.mxu1 %v7513_v12 }
 0x221   : > { %v383_v20 = vsel %vm7886_vm5, 0, %v382_v15  ;;  %5637 = vmatprep.subr.bf16.mxu1 %v9941_v11 }
 0x222   : > { %384 = vst [vmem:[#allocation3 + $0xc8] sm:$0x1] %v383_v20 }
 0x224   : > { %5638 = vmatpush1.bf16.msra.mxu1 %v7514_v16 }
 0x225   : > { %5639 = vmatprep.subr.bf16.mxu1 %v9941_v11 }
 0x227   : > { %3360 = vmatmul.mubr.bf16.gmra.mrb[60].mxu0 %v2449_v39 }
 0x228   : > { %5640 = vmatpush1.bf16.msra.mxu1 %v7517_v4 }
 0x229   : > { %5641 = vmatprep.subr.bf16.mxu1 %v9941_v11 }
 0x22c   : > { %5642 = vmatpush1.bf16.msra.mxu1 %v7518_v33 }
 0x22d   : > { %5643 = vmatprep.subr.bf16.mxu1 %v9941_v11 }
 0x230   : > { %5644 = vmatpush1.bf16.msra.mxu1 %v7521_v37 }
 0x231   : > { %5645 = vmatprep.subr.bf16.mxu1 %v9941_v11 }
 0x234   : > { %5646 = vmatpush1.bf16.msra.mxu1 %v7522_v50 }
 0x235   : > { %5904 = vmatprep.subr.bf16.mxu1 %v9941_v11 }
 0x282   : > { %v3241_v22 = vpop.f32.mrb[0].mxu0 }
 0x283   : > { %v3400_v19 = vmax.f32 %v3241_v22, 0.0  ;;  %v3243_v39 = vpop.f32.mrb[1].mxu0  ;;  %v3864_v22 = vld [vmem:[#allocation3 + $0x24] sm:$0xf] }
 0x284   : > { %v3244_v1 = vpop.f32.mrb[2].mxu0 }
 0x285   : > { %v7147_v23 = vpack.c.bf16 %v3400_v19, %v3400_v19  ;;  %v3401_v35 = vmax.f32 %v3244_v1, 0.0  ;;  %v3246_v17 = vpop.f32.mrb[3].mxu0 }
 0x287   : > { %v3529_v24 = vshrl.u32 %v7147_v23, 16  ;;  %v7148_v18 = vpack.c.bf16 %v3401_v35, %v3401_v35  ;;  %v3532_v36 = vshll.u32 %v7147_v23, 16 }
 0x289   : > { %v3531_v26 = vrot.slane %v3529_v24, 7  ;;  %v3537_v54 = vshrl.u32 %v7148_v18, 16  ;;  %v3540_v51 = vshll.u32 %v7148_v18, 16 }
 0x28a   : > { %v3249_v29 = vpop.f32.mrb[4].mxu0 }
 0x28b   : > { %v3534_v7 = vor.u32 %v3532_v36, %v3531_v26  ;;  %v3539_v10 = vrot.slane %v3537_v54, 7  ;;  %v3402_v28 = vmax.f32 %v3249_v29, 0.0  ;;  %v3251_v32 = vpop.f32.mrb[5].mxu0  ;;  %v3535_v34 = vrot.slane %v3531_v26, 4 }
 0x28c   : > { %v3252_v8 = vpop.f32.mrb[6].mxu0 }
 0x28d   : > { %v3851_v38 = vsel %vm7960_vm8, %v3534_v7, %v3850_v25  ;;  %v3542_v40 = vor.u32 %v3540_v51, %v3539_v10  ;;  %v3544_v48 = vrot.slane %v3539_v10, 4  ;;  %v7149_v6 = vpack.c.bf16 %v3402_v28, %v3402_v28  ;;  %v3254_v42 = vpop.f32.mrb[7].mxu0  ;;  %v3868_v7 = vld [vmem:[#allocation3 + $0x2c] sm:$0x1] }
 0x28e   : > { %3852 = vst [vmem:[#allocation3 + $0xc] sm:$0xf] %v3851_v38  ;;  %v3403_v43 = vmax.f32 %v3252_v8, 0.0 }
 0x28f   : > { %v3543_v44 = vsel %vm7953_vm7, %v3535_v34, %v3542_v40  ;;  %v3855_v47 = vsel %vm7875_vm2, %v3544_v48, %v3854_v30  ;;  %v3546_v57 = vshrl.u32 %v7149_v6, 16  ;;  %v3549_v52 = vshll.u32 %v7149_v6, 16 }
 0x290   : > { %3853 = vst.msk [vmem:[#allocation3 + $0x10] sm:$0xf] %vm170_vm4, %v3543_v44  ;;  %3856 = vst [vmem:[#allocation3 + $0x14] sm:$0x1] %v3855_v47  ;;  %v7150_v45 = vpack.c.bf16 %v3403_v43, %v3403_v43 }
 0x291   : > { %v3548_v53 = vrot.slane %v3546_v57, 7 }
 0x292   : > { %v3554_v5 = vshrl.u32 %v7150_v45, 16  ;;  %v3257_v55 = vpop.f32.mrb[8].mxu0  ;;  %v3557_v59 = vshll.u32 %v7150_v45, 16 }
 0x293   : > { %v3551_v56 = vor.u32 %v3549_v52, %v3548_v53  ;;  %v3404_v58 = vmax.f32 %v3257_v55, 0.0  ;;  %v3259_v63 = vpop.f32.mrb[9].mxu0  ;;  %v3552_v9 = vrot.slane %v3548_v53, 4 }
 0x294   : > { %v3556_v21 = vrot.slane %v3554_v5, 7  ;;  %v3260_v27 = vpop.f32.mrb[10].mxu0  ;;  %v3875_v63 = vld [vmem:[#allocation3 + $0x38] sm:$0x1] }
 0x295   : > { %v3858_v60 = vsel %vm7960_vm8, %v3551_v56, %v3857_v31  ;;  %v7151_v2 = vpack.c.bf16 %v3404_v58, %v3404_v58  ;;  %v3405_v3 = vmax.f32 %v3260_v27, 0.0  ;;  %v3262_v61 = vpop.f32.mrb[11].mxu0  ;;  %v3871_v31 = vld [vmem:[#allocation3 + $0x30] sm:$0xf] }
 0x296   : > { %3859 = vst [vmem:[#allocation3 + $0x18] sm:$0xf] %v3858_v60  ;;  %v3559_v14 = vor.u32 %v3557_v59, %v3556_v21  ;;  %v3561_v49 = vrot.slane %v3556_v21, 4 }
 0x297   : > { %v3563_v12 = vshrl.u32 %v7151_v2, 16  ;;  %v7152_v13 = vpack.c.bf16 %v3405_v3, %v3405_v3  ;;  %v7483_v16 = vld [vmem:[#allocation3 + $0xc] sm:$0xff]   ;;  %v7484_v19 = vld [vmem:[#allocation3 + $0x14] ss:$0 sps:$4 sm:$0x11]   ;;  %v3566_v1 = vshll.u32 %v7151_v2, 16 }
 0x298   : > { %v3560_v15 = vsel %vm7953_vm7, %v3552_v9, %v3559_v14  ;;  %v3862_v20 = vsel %vm7875_vm2, %v3561_v49, %v3861_v62  ;;  %v4860_v4 = vrot.slane %v7483_v16, 1  ;;  %v4861_v24 = vrot.slane %v7484_v19, 1 }
 0x299   : > { %3860 = vst.msk [vmem:[#allocation3 + $0x1c] sm:$0xf] %vm170_vm4, %v3560_v15  ;;  %3863 = vst [vmem:[#allocation3 + $0x20] sm:$0x1] %v3862_v20  ;;  %v3565_v39 = vrot.slane %v3563_v12, 7  ;;  %v3571_v23 = vshrl.u32 %v7152_v13, 16 }
 0x29a   : > { %v3574_v35 = vshll.u32 %v7152_v13, 16  ;;  %v3265_v17 = vpop.f32.mrb[12].mxu0  ;;  %v4639_v18 = vshll.u32 %v7483_v16, 16  ;;  %v4637_v25 = vshrl.u32 %v7483_v16, 16  ;;  %v4862_v51 = vsel %vm1353_vm10, %v4860_v4, %v4861_v24 }
 0x29b   : > { %v3568_v26 = vor.u32 %v3566_v1, %v3565_v39  ;;  %v3573_v36 = vrot.slane %v3571_v23, 7  ;;  %v3406_v54 = vmax.f32 %v3265_v17, 0.0  ;;  %v3267_v33 = vpop.f32.mrb[13].mxu0  ;;  %v3569_v29 = vrot.slane %v3565_v39, 4  ;;  %7013 = vmatprep.mubr.msk.bf16.mxu1 %vm1402_vm11, %v4862_v51 }
 0x29c   : > { %v3268_v10 = vpop.f32.mrb[14].mxu0  ;;  %v4641_v28 = vrot.slane %v4639_v18, 1  ;;  %v4644_v32 = vshll.u32 %v7484_v19, 16 }
 0x29d   : > { %v3865_v34 = vsel %vm7960_vm8, %v3568_v26, %v3864_v22  ;;  %v3576_v30 = vor.u32 %v3574_v35, %v3573_v36  ;;  %v3578_v8 = vrot.slane %v3573_v36, 4  ;;  %v7153_v37 = vpack.c.bf16 %v3406_v54, %v3406_v54  ;;  %v3270_v38 = vpop.f32.mrb[15].mxu0  ;;  %v3878_v36 = vld [vmem:[#allocation3 + $0x3c] sm:$0xf] }
 0x29e   : > { %3866 = vst [vmem:[#allocation3 + $0x24] sm:$0xf] %v3865_v34  ;;  %v3407_v40 = vmax.f32 %v3268_v10, 0.0  ;;  %v4642_v48 = vor.u32 %v4641_v28, %v4637_v25  ;;  %v4646_v6 = vrot.slane %v4644_v32, 1  ;;  %v3882_v34 = vld [vmem:[#allocation3 + $0x44] sm:$0x1] }
 0x29f   : > { %v3577_v42 = vsel %vm7953_vm7, %v3569_v29, %v3576_v30  ;;  %v3869_v43 = vsel %vm7875_vm2, %v3578_v8, %v3868_v7  ;;  %v3580_v44 = vshrl.u32 %v7153_v37, 16  ;;  %v3583_v47 = vshll.u32 %v7153_v37, 16 }
 0x2a0   : > { %3867 = vst.msk [vmem:[#allocation3 + $0x28] sm:$0xf] %vm170_vm4, %v3577_v42  ;;  %3870 = vst [vmem:[#allocation3 + $0x2c] sm:$0x1] %v3869_v43  ;;  %v7154_v57 = vpack.c.bf16 %v3407_v40, %v3407_v40  ;;  %v4647_v45 = vsel %vm1128_vm9, %v4642_v48, %v4646_v6  ;;  %v7485_v50 = vld [vmem:[#allocation3 + $0x18] sm:$0xff]  }
 0x2a1   : > { %v3582_v53 = vrot.slane %v3580_v44, 7  ;;  %4828 = vrot.lane.b32.xlu0 %v4647_v45, %s7800_s6  ;;  %v7486_v52 = vld [vmem:[#allocation3 + $0x20] ss:$0 sps:$4 sm:$0x11]   ;;  %v4651_v56 = vshll.u32 %v7485_v50, 16  ;;  %v4649_v3 = vshrl.u32 %v7485_v50, 16 }
 0x2a2   : > { %v3588_v5 = vshrl.u32 %v7154_v57, 16  ;;  %v3273_v55 = vpop.f32.mrb[16].mxu0  ;;  %v4656_v27 = vshll.u32 %v7486_v52, 16  ;;  %v3591_v62 = vshll.u32 %v7154_v57, 16 }
 0x2a3   : > { %v3585_v58 = vor.u32 %v3583_v47, %v3582_v53  ;;  %v3408_v21 = vmax.f32 %v3273_v55, 0.0  ;;  %v3275_v59 = vpop.f32.mrb[17].mxu0  ;;  %v4653_v61 = vrot.slane %v4651_v56, 1  ;;  %v3586_v9 = vrot.slane %v3582_v53, 4 }
 0x2a4   : > { %v3590_v60 = vrot.slane %v3588_v5, 7  ;;  %v3276_v2 = vpop.f32.mrb[18].mxu0  ;;  %v4658_v16 = vrot.slane %v4656_v27, 1 }
 0x2a5   : > { %v3872_v14 = vsel %vm7960_vm8, %v3585_v58, %v3871_v31  ;;  %v7155_v49 = vpack.c.bf16 %v3408_v21, %v3408_v21  ;;  %v3409_v12 = vmax.f32 %v3276_v2, 0.0  ;;  %v3278_v13 = vpop.f32.mrb[19].mxu0  ;;  %v4654_v22 = vor.u32 %v4653_v61, %v4649_v3  ;;  %v3885_v58 = vld [vmem:[#allocation3 + $0x48] sm:$0xf] }
 0x2a6   : > { %3873 = vst [vmem:[#allocation3 + $0x30] sm:$0xf] %v3872_v14  ;;  %v3593_v15 = vor.u32 %v3591_v62, %v3590_v60  ;;  %v3595_v20 = vrot.slane %v3590_v60, 4  ;;  %v3889_v60 = vld [vmem:[#allocation3 + $0x50] sm:$0x1] }
 0x2a7   : > { %v3597_v19 = vshrl.u32 %v7155_v49, 16  ;;  %v7156_v39 = vpack.c.bf16 %v3409_v12, %v3409_v12  ;;  %v4659_v35 = vsel %vm1128_vm9, %v4654_v22, %v4658_v16  ;;  %v7487_v17 = vld [vmem:[#allocation3 + $0x24] sm:$0xff]   ;;  %v7488_v4 = vld [vmem:[#allocation3 + $0x2c] ss:$0 sps:$4 sm:$0x11]   ;;  %v3600_v18 = vshll.u32 %v7155_v49, 16 }
 0x2a8   : > { %v3594_v1 = vsel %vm7953_vm7, %v3586_v9, %v3593_v15  ;;  %v3876_v23 = vsel %vm7875_vm2, %v3595_v20, %v3875_v63  ;;  %4830 = vrot.lane.b32.xlu1 %v4659_v35, %s7800_s6  ;;  %v4663_v33 = vshll.u32 %v7487_v17, 16  ;;  %v4668_v25 = vshll.u32 %v7488_v4, 16 }
 0x2a9   : > { %3874 = vst.msk [vmem:[#allocation3 + $0x34] sm:$0xf] %vm170_vm4, %v3594_v1  ;;  %3877 = vst [vmem:[#allocation3 + $0x38] sm:$0x1] %v3876_v23  ;;  %v3599_v24 = vrot.slane %v3597_v19, 7  ;;  %v3605_v26 = vshrl.u32 %v7156_v39, 16 }
 0x2aa   : > { %v3281_v54 = vpop.f32.mrb[20].mxu0  ;;  %v3608_v10 = vshll.u32 %v7156_v39, 16  ;;  %v4661_v8 = vshrl.u32 %v7487_v17, 16  ;;  %v4665_v37 = vrot.slane %v4663_v33, 1  ;;  %v4670_v47 = vrot.slane %v4668_v25, 1 }
 0x2ab   : > { %v3602_v29 = vor.u32 %v3600_v18, %v3599_v24  ;;  %v3607_v7 = vrot.slane %v3605_v26, 7  ;;  %v3410_v51 = vmax.f32 %v3281_v54, 0.0  ;;  %v3283_v28 = vpop.f32.mrb[21].mxu0  ;;  %v3603_v32 = vrot.slane %v3599_v24, 4  ;;  %v3892_v18 = vld [vmem:[#allocation3 + $0x54] sm:$0xf] }
 0x2ac   : > { %v3284_v30 = vpop.f32.mrb[22].mxu0  ;;  %v4666_v44 = vor.u32 %v4665_v37, %v4661_v8 }
 0x2ad   : > { %v3879_v38 = vsel %vm7960_vm8, %v3602_v29, %v3878_v36  ;;  %v3610_v40 = vor.u32 %v3608_v10, %v3607_v7  ;;  %v3612_v48 = vrot.slane %v3607_v7, 4  ;;  %v7157_v6 = vpack.c.bf16 %v3410_v51, %v3410_v51  ;;  %v3286_v42 = vpop.f32.mrb[23].mxu0  ;;  %v3896_v7 = vld [vmem:[#allocation3 + $0x5c] sm:$0x1] }
 0x2ae   : > { %3880 = vst [vmem:[#allocation3 + $0x3c] sm:$0xf] %v3879_v38  ;;  %v3411_v43 = vmax.f32 %v3284_v30, 0.0  ;;  %v4671_v31 = vsel %vm1128_vm9, %v4666_v44, %v4670_v47 }
 0x2af   : > { %v3611_v57 = vsel %vm7953_vm7, %v3603_v32, %v3610_v40  ;;  %v3883_v45 = vsel %vm7875_vm2, %v3612_v48, %v3882_v34  ;;  %v3614_v50 = vshrl.u32 %v7157_v6, 16  ;;  %v3617_v53 = vshll.u32 %v7157_v6, 16  ;;  %4832 = vrot.lane.b32.xlu0 %v4671_v31, %s7800_s6 }
 0x2b0   : > { %3881 = vst.msk [vmem:[#allocation3 + $0x40] sm:$0xf] %vm170_vm4, %v3611_v57  ;;  %3884 = vst [vmem:[#allocation3 + $0x44] sm:$0x1] %v3883_v45  ;;  %v7158_v52 = vpack.c.bf16 %v3411_v43, %v3411_v43  ;;  %v7489_v5 = vld [vmem:[#allocation3 + $0x30] sm:$0xff]  }
 0x2b1   : > { %v3616_v55 = vrot.slane %v3614_v50, 7  ;;  %v7490_v56 = vld [vmem:[#allocation3 + $0x38] ss:$0 sps:$4 sm:$0x11]   ;;  %v4675_v59 = vshll.u32 %v7489_v5, 16  ;;  %v4673_v49 = vshrl.u32 %v7489_v5, 16 }
 0x2b2   : > { %v3622_v63 = vshrl.u32 %v7158_v52, 16  ;;  %v3289_v21 = vpop.f32.mrb[24].mxu0  ;;  %v4680_v3 = vshll.u32 %v7490_v56, 16  ;;  %v3625_v9 = vshll.u32 %v7158_v52, 16 }
 0x2b3   : > { %v3619_v27 = vor.u32 %v3617_v53, %v3616_v55  ;;  %v3412_v62 = vmax.f32 %v3289_v21, 0.0  ;;  %v3291_v2 = vpop.f32.mrb[25].mxu0  ;;  %v4677_v12 = vrot.slane %v4675_v59, 1  ;;  %v3620_v13 = vrot.slane %v3616_v55, 4 }
 0x2b4   : > { %v3624_v61 = vrot.slane %v3622_v63, 7  ;;  %v3292_v14 = vpop.f32.mrb[26].mxu0  ;;  %v4682_v23 = vrot.slane %v4680_v3, 1 }
 0x2b5   : > { %v3886_v15 = vsel %vm7960_vm8, %v3619_v27, %v3885_v58  ;;  %v7159_v20 = vpack.c.bf16 %v3412_v62, %v3412_v62  ;;  %v3413_v22 = vmax.f32 %v3292_v14, 0.0  ;;  %v3294_v16 = vpop.f32.mrb[27].mxu0  ;;  %v4678_v1 = vor.u32 %v4677_v12, %v4673_v49  ;;  %v3899_v27 = vld [vmem:[#allocation3 + $0x60] sm:$0xf] }
 0x2b6   : > { %3887 = vst [vmem:[#allocation3 + $0x48] sm:$0xf] %v3886_v15  ;;  %v3627_v19 = vor.u32 %v3625_v9, %v3624_v61  ;;  %v3629_v39 = vrot.slane %v3624_v61, 4  ;;  %v3903_v9 = vld [vmem:[#allocation3 + $0x68] sm:$0x1] }
 0x2b7   : > { %v3631_v35 = vshrl.u32 %v7159_v20, 16  ;;  %v7160_v17 = vpack.c.bf16 %v3413_v22, %v3413_v22  ;;  %v4683_v26 = vsel %vm1128_vm9, %v4678_v1, %v4682_v23  ;;  %v7491_v36 = vld [vmem:[#allocation3 + $0x3c] sm:$0xff]   ;;  %v7492_v54 = vld [vmem:[#allocation3 + $0x44] ss:$0 sps:$4 sm:$0x11]   ;;  %v3634_v25 = vshll.u32 %v7159_v20, 16 }
 0x2b8   : > { %v3628_v4 = vsel %vm7953_vm7, %v3620_v13, %v3627_v19  ;;  %v3890_v24 = vsel %vm7875_vm2, %v3629_v39, %v3889_v60  ;;  %4834 = vrot.lane.b32.xlu1 %v4683_v26, %s7800_s6  ;;  %v4687_v51 = vshll.u32 %v7491_v36, 16  ;;  %v4692_v28 = vshll.u32 %v7492_v54, 16 }
 0x2b9   : > { %3888 = vst.msk [vmem:[#allocation3 + $0x4c] sm:$0xf] %vm170_vm4, %v3628_v4  ;;  %3891 = vst [vmem:[#allocation3 + $0x50] sm:$0x1] %v3890_v24  ;;  %v3633_v33 = vrot.slane %v3631_v35, 7  ;;  %v3639_v29 = vshrl.u32 %v7160_v17, 16 }
 0x2ba   : > { %v3297_v10 = vpop.f32.mrb[28].mxu0  ;;  %v3642_v30 = vshll.u32 %v7160_v17, 16  ;;  %v4685_v48 = vshrl.u32 %v7491_v36, 16  ;;  %v4689_v6 = vrot.slane %v4687_v51, 1  ;;  %v4694_v53 = vrot.slane %v4692_v28, 1 }
 0x2bb   : > { %v3636_v32 = vor.u32 %v3634_v25, %v3633_v33  ;;  %v3641_v34 = vrot.slane %v3639_v29, 7  ;;  %v3414_v8 = vmax.f32 %v3297_v10, 0.0  ;;  %v3299_v37 = vpop.f32.mrb[29].mxu0  ;;  %v3637_v38 = vrot.slane %v3633_v33, 4  ;;  %v3906_v33 = vld [vmem:[#allocation3 + $0x6c] sm:$0xf] }
 0x2bc   : > { %v3300_v40 = vpop.f32.mrb[30].mxu0  ;;  %v4690_v50 = vor.u32 %v4689_v6, %v4685_v48 }
 0x2bd   : > { %v3893_v42 = vsel %vm7960_vm8, %v3636_v32, %v3892_v18  ;;  %v3644_v43 = vor.u32 %v3642_v30, %v3641_v34  ;;  %v3646_v44 = vrot.slane %v3641_v34, 4  ;;  %v7161_v47 = vpack.c.bf16 %v3414_v8, %v3414_v8  ;;  %v3302_v57 = vpop.f32.mrb[31].mxu0  ;;  %v3910_v32 = vld [vmem:[#allocation3 + $0x74] sm:$0x1] }
 0x2be   : > { %3894 = vst [vmem:[#allocation3 + $0x54] sm:$0xf] %v3893_v42  ;;  %v3415_v45 = vmax.f32 %v3300_v40, 0.0  ;;  %v4695_v56 = vsel %vm1128_vm9, %v4690_v50, %v4694_v53 }
 0x2bf   : > { %v3645_v52 = vsel %vm7953_vm7, %v3637_v38, %v3644_v43  ;;  %v3897_v31 = vsel %vm7875_vm2, %v3646_v44, %v3896_v7  ;;  %v3648_v5 = vshrl.u32 %v7161_v47, 16  ;;  %v3651_v21 = vshll.u32 %v7161_v47, 16  ;;  %4836 = vrot.lane.b32.xlu0 %v4695_v56, %s7800_s6 }
 0x2c0   : > { %3895 = vst.msk [vmem:[#allocation3 + $0x58] sm:$0xf] %vm170_vm4, %v3645_v52  ;;  %3898 = vst [vmem:[#allocation3 + $0x5c] sm:$0x1] %v3897_v31  ;;  %v7162_v55 = vpack.c.bf16 %v3415_v45, %v3415_v45  ;;  %v7493_v58 = vld [vmem:[#allocation3 + $0x48] sm:$0xff]  }
 0x2c1   : > { %v3650_v63 = vrot.slane %v3648_v5, 7  ;;  %v7494_v59 = vld [vmem:[#allocation3 + $0x50] ss:$0 sps:$4 sm:$0x11]   ;;  %v4699_v2 = vshll.u32 %v7493_v58, 16  ;;  %v4697_v20 = vshrl.u32 %v7493_v58, 16 }
 0x2c2   : > { %v3656_v60 = vshrl.u32 %v7162_v55, 16  ;;  %v3305_v62 = vpop.f32.mrb[32].mxu0  ;;  %v3659_v61 = vshll.u32 %v7162_v55, 16  ;;  %v4704_v12 = vshll.u32 %v7494_v59, 16 }
 0x2c3   : > { %v3653_v3 = vor.u32 %v3651_v21, %v3650_v63  ;;  %v3416_v14 = vmax.f32 %v3305_v62, 0.0  ;;  %v3307_v49 = vpop.f32.mrb[33].mxu0  ;;  %v4701_v22 = vrot.slane %v4699_v2, 1  ;;  %v3654_v16 = vrot.slane %v3650_v63, 4 }
 0x2c4   : > { %v3658_v13 = vrot.slane %v3656_v60, 7  ;;  %v3308_v15 = vpop.f32.mrb[34].mxu0  ;;  %v4706_v24 = vrot.slane %v4704_v12, 1  ;;  %v3917_v12 = vld [vmem:[#allocation3 + $0x80] sm:$0x1] }
 0x2c5   : > { %v3900_v19 = vsel %vm7960_vm8, %v3653_v3, %v3899_v27  ;;  %v7163_v39 = vpack.c.bf16 %v3416_v14, %v3416_v14  ;;  %v3417_v1 = vmax.f32 %v3308_v15, 0.0  ;;  %v3310_v23 = vpop.f32.mrb[35].mxu0  ;;  %v4702_v4 = vor.u32 %v4701_v22, %v4697_v20  ;;  %v3913_v3 = vld [vmem:[#allocation3 + $0x78] sm:$0xf] }
 0x2c6   : > { %3901 = vst [vmem:[#allocation3 + $0x60] sm:$0xf] %v3900_v19  ;;  %v3661_v35 = vor.u32 %v3659_v61, %v3658_v13  ;;  %v3663_v17 = vrot.slane %v3658_v13, 4 }
 0x2c7   : > { %v3665_v18 = vshrl.u32 %v7163_v39, 16  ;;  %v7164_v26 = vpack.c.bf16 %v3417_v1, %v3417_v1  ;;  %v4707_v25 = vsel %vm1128_vm9, %v4702_v4, %v4706_v24  ;;  %v7495_v29 = vld [vmem:[#allocation3 + $0x54] sm:$0xff]   ;;  %v7496_v7 = vld [vmem:[#allocation3 + $0x5c] ss:$0 sps:$4 sm:$0x11]   ;;  %v3668_v51 = vshll.u32 %v7163_v39, 16 }
 0x2c8   : > { %v3662_v36 = vsel %vm7953_vm7, %v3654_v16, %v3661_v35  ;;  %v3904_v54 = vsel %vm7875_vm2, %v3663_v17, %v3903_v9  ;;  %4838 = vrot.lane.b32.xlu1 %v4707_v25, %s7800_s6  ;;  %v4711_v30 = vshll.u32 %v7495_v29, 16  ;;  %v4716_v8 = vshll.u32 %v7496_v7, 16 }
 0x2c9   : > { %3902 = vst.msk [vmem:[#allocation3 + $0x64] sm:$0xf] %vm170_vm4, %v3662_v36  ;;  %3905 = vst [vmem:[#allocation3 + $0x68] sm:$0x1] %v3904_v54  ;;  %v3667_v10 = vrot.slane %v3665_v18, 7  ;;  %v3673_v28 = vshrl.u32 %v7164_v26, 16 }
 0x2ca   : > { %v3313_v34 = vpop.f32.mrb[36].mxu0  ;;  %v3676_v40 = vshll.u32 %v7164_v26, 16  ;;  %v4709_v44 = vshrl.u32 %v7495_v29, 16  ;;  %v4713_v47 = vrot.slane %v4711_v30, 1  ;;  %v4718_v55 = vrot.slane %v4716_v8, 1 }
 0x2cb   : > { %v3670_v37 = vor.u32 %v3668_v51, %v3667_v10  ;;  %v3675_v38 = vrot.slane %v3673_v28, 7  ;;  %v3418_v48 = vmax.f32 %v3313_v34, 0.0  ;;  %v3315_v6 = vpop.f32.mrb[37].mxu0  ;;  %v3671_v42 = vrot.slane %v3667_v10, 4  ;;  %v3920_v8 = vld [vmem:[#allocation3 + $0x84] sm:$0xf] }
 0x2cc   : > { %v3316_v43 = vpop.f32.mrb[38].mxu0  ;;  %v4714_v5 = vor.u32 %v4713_v47, %v4709_v44 }
 0x2cd   : > { %v3907_v57 = vsel %vm7960_vm8, %v3670_v37, %v3906_v33  ;;  %v3678_v45 = vor.u32 %v3676_v40, %v3675_v38  ;;  %v3680_v50 = vrot.slane %v3675_v38, 4  ;;  %v7165_v53 = vpack.c.bf16 %v3418_v48, %v3418_v48  ;;  %v3318_v52 = vpop.f32.mrb[39].mxu0 }
 0x2ce   : > { %3908 = vst [vmem:[#allocation3 + $0x6c] sm:$0xf] %v3907_v57  ;;  %v3419_v31 = vmax.f32 %v3316_v43, 0.0  ;;  %v4719_v59 = vsel %vm1128_vm9, %v4714_v5, %v4718_v55  ;;  %v3924_v57 = vld [vmem:[#allocation3 + $0x8c] sm:$0x1] }
 0x2cf   : > { %v3679_v56 = vsel %vm7953_vm7, %v3671_v42, %v3678_v45  ;;  %v3911_v58 = vsel %vm7875_vm2, %v3680_v50, %v3910_v32  ;;  %v3682_v63 = vshrl.u32 %v7165_v53, 16  ;;  %v3685_v62 = vshll.u32 %v7165_v53, 16  ;;  %4840 = vrot.lane.b32.xlu0 %v4719_v59, %s7800_s6 }
 0x2d0   : > { %3909 = vst.msk [vmem:[#allocation3 + $0x70] sm:$0xf] %vm170_vm4, %v3679_v56  ;;  %3912 = vst [vmem:[#allocation3 + $0x74] sm:$0x1] %v3911_v58  ;;  %v7166_v21 = vpack.c.bf16 %v3419_v31, %v3419_v31  ;;  %v7497_v27 = vld [vmem:[#allocation3 + $0x60] sm:$0xff]  }
 0x2d1   : > { %v3684_v60 = vrot.slane %v3682_v63, 7  ;;  %v7498_v2 = vld [vmem:[#allocation3 + $0x68] ss:$0 sps:$4 sm:$0x11]   ;;  %v4723_v14 = vshll.u32 %v7497_v27, 16  ;;  %v4721_v39 = vshrl.u32 %v7497_v27, 16 }
 0x2d2   : > { %v3690_v61 = vshrl.u32 %v7166_v21, 16  ;;  %v3321_v9 = vpop.f32.mrb[40].mxu0  ;;  %v4728_v20 = vshll.u32 %v7498_v2, 16  ;;  %v3693_v16 = vshll.u32 %v7166_v21, 16 }
 0x2d3   : > { %v3687_v49 = vor.u32 %v3685_v62, %v3684_v60  ;;  %v3420_v13 = vmax.f32 %v3321_v9, 0.0  ;;  %v3323_v15 = vpop.f32.mrb[41].mxu0  ;;  %v4725_v1 = vrot.slane %v4723_v14, 1  ;;  %v3688_v23 = vrot.slane %v3684_v60, 4 }
 0x2d4   : > { %v3692_v22 = vrot.slane %v3690_v61, 7  ;;  %v3324_v19 = vpop.f32.mrb[42].mxu0  ;;  %v4730_v54 = vrot.slane %v4728_v20, 1 }
 0x2d5   : > { %v3914_v35 = vsel %vm7960_vm8, %v3687_v49, %v3913_v3  ;;  %v7167_v17 = vpack.c.bf16 %v3420_v13, %v3420_v13  ;;  %v3421_v4 = vmax.f32 %v3324_v19, 0.0  ;;  %v3326_v24 = vpop.f32.mrb[43].mxu0  ;;  %v4726_v36 = vor.u32 %v4725_v1, %v4721_v39  ;;  %v3927_v49 = vld [vmem:[#allocation3 + $0x90] sm:$0xf] }
 0x2d6   : > { %3915 = vst [vmem:[#allocation3 + $0x78] sm:$0xf] %v3914_v35  ;;  %v3695_v18 = vor.u32 %v3693_v16, %v3692_v22  ;;  %v3697_v26 = vrot.slane %v3692_v22, 4  ;;  %v3931_v22 = vld [vmem:[#allocation3 + $0x98] sm:$0x1] }
 0x2d7   : > { %v3699_v33 = vshrl.u32 %v7167_v17, 16  ;;  %v7168_v25 = vpack.c.bf16 %v3421_v4, %v3421_v4  ;;  %v4731_v10 = vsel %vm1128_vm9, %v4726_v36, %v4730_v54  ;;  %v7499_v51 = vld [vmem:[#allocation3 + $0x6c] sm:$0xff]   ;;  %v7500_v28 = vld [vmem:[#allocation3 + $0x74] ss:$0 sps:$4 sm:$0x11]   ;;  %v3702_v34 = vshll.u32 %v7167_v17, 16 }
 0x2d8   : > { %v3696_v29 = vsel %vm7953_vm7, %v3688_v23, %v3695_v18  ;;  %v3918_v7 = vsel %vm7875_vm2, %v3697_v26, %v3917_v12  ;;  %4842 = vrot.lane.b32.xlu1 %v4731_v10, %s7800_s6  ;;  %v4735_v38 = vshll.u32 %v7499_v51, 16  ;;  %v4740_v40 = vshll.u32 %v7500_v28, 16 }
 0x2d9   : > { %3916 = vst.msk [vmem:[#allocation3 + $0x7c] sm:$0xf] %vm170_vm4, %v3696_v29  ;;  %3919 = vst [vmem:[#allocation3 + $0x80] sm:$0x1] %v3918_v7  ;;  %v3701_v32 = vrot.slane %v3699_v33, 7  ;;  %v3707_v30 = vshrl.u32 %v7168_v25, 16 }
 0x2da   : > { %v3329_v37 = vpop.f32.mrb[44].mxu0  ;;  %v3710_v42 = vshll.u32 %v7168_v25, 16  ;;  %v4733_v50 = vshrl.u32 %v7499_v51, 16  ;;  %v4737_v53 = vrot.slane %v4735_v38, 1  ;;  %v4742_v21 = vrot.slane %v4740_v40, 1 }
 0x2db   : > { %v3704_v48 = vor.u32 %v3702_v34, %v3701_v32  ;;  %v3709_v6 = vrot.slane %v3707_v30, 7  ;;  %v3422_v43 = vmax.f32 %v3329_v37, 0.0  ;;  %v3331_v44 = vpop.f32.mrb[45].mxu0  ;;  %v3705_v47 = vrot.slane %v3701_v32, 4  ;;  %v3934_v34 = vld [vmem:[#allocation3 + $0x9c] sm:$0xf] }
 0x2dc   : > { %v3332_v45 = vpop.f32.mrb[46].mxu0  ;;  %v4738_v63 = vor.u32 %v4737_v53, %v4733_v50 }
 0x2dd   : > { %v3921_v52 = vsel %vm7960_vm8, %v3704_v48, %v3920_v8  ;;  %v3712_v31 = vor.u32 %v3710_v42, %v3709_v6  ;;  %v3714_v5 = vrot.slane %v3709_v6, 4  ;;  %v7169_v55 = vpack.c.bf16 %v3422_v43, %v3422_v43  ;;  %v3334_v56 = vpop.f32.mrb[47].mxu0  ;;  %v3938_v6 = vld [vmem:[#allocation3 + $0xa4] sm:$0x1] }
 0x2de   : > { %3922 = vst [vmem:[#allocation3 + $0x84] sm:$0xf] %v3921_v52  ;;  %v3423_v58 = vmax.f32 %v3332_v45, 0.0  ;;  %v4743_v2 = vsel %vm1128_vm9, %v4738_v63, %v4742_v21 }
 0x2df   : > { %v3713_v59 = vsel %vm7953_vm7, %v3705_v47, %v3712_v31  ;;  %v3925_v27 = vsel %vm7875_vm2, %v3714_v5, %v3924_v57  ;;  %v3716_v60 = vshrl.u32 %v7169_v55, 16  ;;  %v3719_v9 = vshll.u32 %v7169_v55, 16  ;;  %4844 = vrot.lane.b32.xlu0 %v4743_v2, %s7800_s6 }
 0x2e0   : > { %3923 = vst.msk [vmem:[#allocation3 + $0x88] sm:$0xf] %vm170_vm4, %v3713_v59  ;;  %3926 = vst [vmem:[#allocation3 + $0x8c] sm:$0x1] %v3925_v27  ;;  %v7170_v62 = vpack.c.bf16 %v3423_v58, %v3423_v58  ;;  %v7503_v3 = vld [vmem:[#allocation3 + $0x78] sm:$0xff]  }
 0x2e1   : > { %v3718_v61 = vrot.slane %v3716_v60, 7  ;;  %v7504_v14 = vld [vmem:[#allocation3 + $0x80] ss:$0 sps:$4 sm:$0x11]   ;;  %v4747_v15 = vshll.u32 %v7503_v3, 16  ;;  %v4745_v17 = vshrl.u32 %v7503_v3, 16 }
 0x2e2   : > { %v3724_v12 = vshrl.u32 %v7170_v62, 16  ;;  %v3337_v13 = vpop.f32.mrb[48].mxu0  ;;  %v4752_v39 = vshll.u32 %v7504_v14, 16  ;;  %v3727_v23 = vshll.u32 %v7170_v62, 16 }
 0x2e3   : > { %v3721_v20 = vor.u32 %v3719_v9, %v3718_v61  ;;  %v3424_v16 = vmax.f32 %v3337_v13, 0.0  ;;  %v3339_v19 = vpop.f32.mrb[49].mxu0  ;;  %v4749_v4 = vrot.slane %v4747_v15, 1  ;;  %v3722_v24 = vrot.slane %v3718_v61, 4 }
 0x2e4   : > { %v3726_v1 = vrot.slane %v3724_v12, 7  ;;  %v3340_v35 = vpop.f32.mrb[50].mxu0  ;;  %v4754_v7 = vrot.slane %v4752_v39, 1 }
 0x2e5   : > { %v3928_v18 = vsel %vm7960_vm8, %v3721_v20, %v3927_v49  ;;  %v7171_v26 = vpack.c.bf16 %v3424_v16, %v3424_v16  ;;  %v3425_v36 = vmax.f32 %v3340_v35, 0.0  ;;  %v3342_v54 = vpop.f32.mrb[51].mxu0  ;;  %v4750_v29 = vor.u32 %v4749_v4, %v4745_v17  ;;  %v3941_v20 = vld [vmem:[#allocation3 + $0xa8] sm:$0xf] }
 0x2e6   : > { %3929 = vst [vmem:[#allocation3 + $0x90] sm:$0xf] %v3928_v18  ;;  %v3729_v33 = vor.u32 %v3727_v23, %v3726_v1  ;;  %v3731_v25 = vrot.slane %v3726_v1, 4  ;;  %v3945_v23 = vld [vmem:[#allocation3 + $0xb0] sm:$0x1] }
 0x2e7   : > { %v3733_v10 = vshrl.u32 %v7171_v26, 16  ;;  %v7172_v51 = vpack.c.bf16 %v3425_v36, %v3425_v36  ;;  %v4755_v30 = vsel %vm1128_vm9, %v4750_v29, %v4754_v7  ;;  %v7507_v8 = vld [vmem:[#allocation3 + $0x84] sm:$0xff]   ;;  %v7508_v37 = vld [vmem:[#allocation3 + $0x8c] ss:$0 sps:$4 sm:$0x11]   ;;  %v3736_v40 = vshll.u32 %v7171_v26, 16 }
 0x2e8   : > { %v3730_v28 = vsel %vm7953_vm7, %v3722_v24, %v3729_v33  ;;  %v3932_v32 = vsel %vm7875_vm2, %v3731_v25, %v3931_v22  ;;  %4846 = vrot.lane.b32.xlu1 %v4755_v30, %s7800_s6  ;;  %v4759_v43 = vshll.u32 %v7507_v8, 16  ;;  %v4764_v44 = vshll.u32 %v7508_v37, 16 }
 0x2e9   : > { %3930 = vst.msk [vmem:[#allocation3 + $0x94] sm:$0xf] %vm170_vm4, %v3730_v28  ;;  %3933 = vst [vmem:[#allocation3 + $0x98] sm:$0x1] %v3932_v32  ;;  %v3735_v38 = vrot.slane %v3733_v10, 7  ;;  %v3741_v48 = vshrl.u32 %v7172_v51, 16 }
 0x2ea   : > { %v3345_v42 = vpop.f32.mrb[52].mxu0  ;;  %v3744_v45 = vshll.u32 %v7172_v51, 16  ;;  %v4757_v5 = vshrl.u32 %v7507_v8, 16  ;;  %v4761_v55 = vrot.slane %v4759_v43, 1  ;;  %v4766_v62 = vrot.slane %v4764_v44, 1 }
 0x2eb   : > { %v3738_v47 = vor.u32 %v3736_v40, %v3735_v38  ;;  %v3743_v57 = vrot.slane %v3741_v48, 7  ;;  %v3426_v50 = vmax.f32 %v3345_v42, 0.0  ;;  %v3347_v53 = vpop.f32.mrb[53].mxu0  ;;  %v3739_v52 = vrot.slane %v3735_v38, 4  ;;  %v3948_v38 = vld [vmem:[#allocation3 + $0xb4] sm:$0xf] }
 0x2ec   : > { %v3348_v31 = vpop.f32.mrb[54].mxu0  ;;  %v4762_v60 = vor.u32 %v4761_v55, %v4757_v5 }
 0x2ed   : > { %v3935_v56 = vsel %vm7960_vm8, %v3738_v47, %v3934_v34  ;;  %v3746_v58 = vor.u32 %v3744_v45, %v3743_v57  ;;  %v3748_v63 = vrot.slane %v3743_v57, 4  ;;  %v7173_v21 = vpack.c.bf16 %v3426_v50, %v3426_v50  ;;  %v3350_v59 = vpop.f32.mrb[55].mxu0  ;;  %v8963_v50 = vld [vmem:[#allocation3] sm:$0xff]  }
 0x2ee   : > { %3936 = vst [vmem:[#allocation3 + $0x9c] sm:$0xf] %v3935_v56  ;;  %v3427_v27 = vmax.f32 %v3348_v31, 0.0  ;;  %v4767_v14 = vsel %vm1128_vm9, %v4762_v60, %v4766_v62 }
 0x2ef   : > { %v3747_v2 = vsel %vm7953_vm7, %v3739_v52, %v3746_v58  ;;  %v3939_v3 = vsel %vm7875_vm2, %v3748_v63, %v3938_v6  ;;  %v3750_v61 = vshrl.u32 %v7173_v21, 16  ;;  %v3753_v13 = vshll.u32 %v7173_v21, 16  ;;  %4848 = vrot.lane.b32.xlu0 %v4767_v14, %s7800_s6  ;;  %v3952_v58 = vld [vmem:[#allocation3 + $0xbc] sm:$0x1] }
 0x2f0   : > { %3937 = vst.msk [vmem:[#allocation3 + $0xa0] sm:$0xf] %vm170_vm4, %v3747_v2  ;;  %3940 = vst [vmem:[#allocation3 + $0xa4] sm:$0x1] %v3939_v3  ;;  %v7174_v9 = vpack.c.bf16 %v3427_v27, %v3427_v27  ;;  %v7511_v49 = vld [vmem:[#allocation3 + $0x90] sm:$0xff]  }
 0x2f1   : > { %v3752_v12 = vrot.slane %v3750_v61, 7  ;;  %v7512_v15 = vld [vmem:[#allocation3 + $0x98] ss:$0 sps:$4 sm:$0x11]   ;;  %v4771_v19 = vshll.u32 %v7511_v49, 16  ;;  %v4769_v26 = vshrl.u32 %v7511_v49, 16 }
 0x2f2   : > { %v3758_v22 = vshrl.u32 %v7174_v9, 16  ;;  %v3353_v16 = vpop.f32.mrb[56].mxu0  ;;  %v3761_v1 = vshll.u32 %v7174_v9, 16  ;;  %v4776_v4 = vshll.u32 %v7512_v15, 16 }
 0x2f3   : > { %v3755_v39 = vor.u32 %v3753_v13, %v3752_v12  ;;  %v3428_v35 = vmax.f32 %v3353_v16, 0.0  ;;  %v3355_v17 = vpop.f32.mrb[57].mxu0  ;;  %v4773_v36 = vrot.slane %v4771_v19, 1  ;;  %v3756_v54 = vrot.slane %v3752_v12, 4 }
 0x2f4   : > { %v3760_v24 = vrot.slane %v3758_v22, 7  ;;  %v3356_v18 = vpop.f32.mrb[58].mxu0  ;;  %v4778_v32 = vrot.slane %v4776_v4, 1  ;;  %v7527_v15 = vld [vmem:[#allocation3 + $0x8] ss:$0 sps:$4 sm:$0x11]  }
 0x2f5   : > { %v3942_v33 = vsel %vm7960_vm8, %v3755_v39, %v3941_v20  ;;  %v7175_v25 = vpack.c.bf16 %v3428_v35, %v3428_v35  ;;  %v3429_v29 = vmax.f32 %v3356_v18, 0.0  ;;  %v3358_v7 = vpop.f32.mrb[59].mxu0  ;;  %v4774_v28 = vor.u32 %v4773_v36, %v4769_v26  ;;  %v3955_v22 = vld [vmem:[#allocation3 + $0xc0] sm:$0xf]  ;;  %v3959_v26 = vld [vmem:[#allocation3 + $0xc8] sm:$0x1] }
 0x2f6   : > { %3943 = vst [vmem:[#allocation3 + $0xa8] sm:$0xf] %v3942_v33  ;;  %v3763_v10 = vor.u32 %v3761_v1, %v3760_v24  ;;  %v3765_v51 = vrot.slane %v3760_v24, 4  ;;  %v4143_v20 = vshll.u32 %v8963_v50, 16  ;;  %v4141_v24 = vshrl.u32 %v8963_v50, 16 }
 0x2f7   : > { %v3767_v34 = vshrl.u32 %v7175_v25, 16  ;;  %v7176_v30 = vpack.c.bf16 %v3429_v29, %v3429_v29  ;;  %v4779_v40 = vsel %vm1128_vm9, %v4774_v28, %v4778_v32  ;;  %v7515_v48 = vld [vmem:[#allocation3 + $0x9c] sm:$0xff]   ;;  %v7516_v6 = vld [vmem:[#allocation3 + $0xa4] ss:$0 sps:$4 sm:$0x11]   ;;  %v3770_v43 = vshll.u32 %v7175_v25, 16 }
 0x2f8   : > { %v3764_v8 = vsel %vm7953_vm7, %v3756_v54, %v3763_v10  ;;  %v3946_v37 = vsel %vm7875_vm2, %v3765_v51, %v3945_v23  ;;  %4850 = vrot.lane.b32.xlu1 %v4779_v40, %s7800_s6  ;;  %v4783_v57 = vshll.u32 %v7515_v48, 16  ;;  %v4788_v45 = vshll.u32 %v7516_v6, 16  ;;  %v7528_v25 = vld [vmem:[#allocation3 + $0x18] sm:$0xff]   ;;  %v8978_v40 = vld [vmem:[#allocation3 + $0xc] sm:$0xff]  }
 0x2f9   : > { %3944 = vst.msk [vmem:[#allocation3 + $0xac] sm:$0xf] %vm170_vm4, %v3764_v8  ;;  %3947 = vst [vmem:[#allocation3 + $0xb0] sm:$0x1] %v3946_v37  ;;  %v3769_v42 = vrot.slane %v3767_v34, 7  ;;  %v3775_v44 = vshrl.u32 %v7176_v30, 16 }
 0x2fa   : > { %v3361_v47 = vpop.f32.mrb[60].mxu0  ;;  %v3778_v31 = vshll.u32 %v7176_v30, 16  ;;  %v4781_v21 = vshrl.u32 %v7515_v48, 16  ;;  %v4785_v59 = vrot.slane %v4783_v57, 1  ;;  %v4790_v14 = vrot.slane %v4788_v45, 1 }
 0x2fb   : > { %v3772_v53 = vor.u32 %v3770_v43, %v3769_v42  ;;  %v3777_v52 = vrot.slane %v3775_v44, 7  ;;  %v3430_v5 = vmax.f32 %v3361_v47, 0.0  ;;  %v3363_v55 = vpop.f32.mrb[61].mxu0  ;;  %v3773_v56 = vrot.slane %v3769_v42, 4  ;;  %v7532_v47 = vld [vmem:[#allocation3 + $0x30] sm:$0xff]  }
 0x2fc   : > { %v3364_v63 = vpop.f32.mrb[62].mxu0  ;;  %v4786_v9 = vor.u32 %v4785_v59, %v4781_v21  ;;  %v4145_v54 = vrot.slane %v4143_v20, 1  ;;  %v4148_v33 = vshll.u32 %v7527_v15, 16  ;;  %v7529_v34 = vld [vmem:[#allocation3 + $0x20] ss:$0 sps:$4 sm:$0x11]  }
 0x2fd   : > { %v3949_v27 = vsel %vm7960_vm8, %v3772_v53, %v3948_v38  ;;  %v3780_v60 = vor.u32 %v3778_v31, %v3777_v52  ;;  %v3782_v62 = vrot.slane %v3777_v52, 4  ;;  %v7177_v2 = vpack.c.bf16 %v3430_v5, %v3430_v5  ;;  %v3366_v3 = vpop.f32.mrb[63].mxu0  ;;  %v8989_v57 = vld [vmem:[#allocation3 + $0x14] ss:$0 sps:$4 sm:$0x11]   ;;  %v9004_v15 = vld [vmem:[#allocation3 + $0x24] sm:$0xff]  }
 0x2fe   : > { %3950 = vst [vmem:[#allocation3 + $0xb4] sm:$0xf] %v3949_v27  ;;  %v3431_v61 = vmax.f32 %v3364_v63, 0.0  ;;  %v4791_v19 = vsel %vm1128_vm9, %v4786_v9, %v4790_v14  ;;  %v4167_v6 = vshll.u32 %v7528_v25, 16  ;;  %v4146_v53 = vor.u32 %v4145_v54, %v4141_v24  ;;  %v9001_v9 = vld [vmem:[#allocation3 + $0x48] sm:$0xff]  }
 0x2ff   : > { %v3781_v49 = vsel %vm7953_vm7, %v3773_v56, %v3780_v60  ;;  %v3953_v12 = vsel %vm7875_vm2, %v3782_v62, %v3952_v58  ;;  %v3784_v13 = vshrl.u32 %v7177_v2, 16  ;;  %v3787_v23 = vshll.u32 %v7177_v2, 16  ;;  %4852 = vrot.lane.b32.xlu0 %v4791_v19, %s7800_s6  ;;  %v7533_v50 = vld [vmem:[#allocation3 + $0x38] ss:$0 sps:$4 sm:$0x11]  }
 0x300   : > { %3951 = vst.msk [vmem:[#allocation3 + $0xb8] sm:$0xf] %vm170_vm4, %v3781_v49  ;;  %3954 = vst [vmem:[#allocation3 + $0xbc] sm:$0x1] %v3953_v12  ;;  %v7178_v16 = vpack.c.bf16 %v3431_v61, %v3431_v61  ;;  %v7519_v39 = vld [vmem:[#allocation3 + $0xa8] sm:$0xff]   ;;  %v4172_v0 = vshll.u32 %v7529_v34, 16 }
 0x301   : > { %v3786_v1 = vrot.slane %v3784_v13, 7  ;;  %v7520_v35 = vld [vmem:[#allocation3 + $0xb0] ss:$0 sps:$4 sm:$0x11]   ;;  %v4795_v4 = vshll.u32 %v7519_v39, 16  ;;  %v4793_v10 = vshrl.u32 %v7519_v39, 16 }
 0x302   : > { %v3792_v17 = vshrl.u32 %v7178_v16, 16  ;;  %v4800_v36 = vshll.u32 %v7520_v35, 16  ;;  %v3795_v7 = vshll.u32 %v7178_v16, 16  ;;  %v4155_v52 = vshll.u32 %v8978_v40, 16  ;;  %v8997_v58 = vld [vmem:[#allocation3 + $0x18] sm:$0xff]   ;;  %v9009_v39 = vld [vmem:[#allocation3 + $0x60] sm:$0xff]  }
 0x303   : > { %v3789_v18 = vor.u32 %v3787_v23, %v3786_v1  ;;  %v4797_v51 = vrot.slane %v4795_v4, 1  ;;  %v3790_v28 = vrot.slane %v3786_v1, 4  ;;  %v4150_v55 = vrot.slane %v4148_v33, 1  ;;  %v7688_v21 = vld [vmem:[#allocation3 + $0x20] ss:$0 sps:$4 sm:$0x11]  }
 0x304   : > { %v3794_v29 = vrot.slane %v3792_v17, 7  ;;  %v4802_v38 = vrot.slane %v4800_v36, 1  ;;  %v4169_v56 = vrot.slane %v4167_v6, 1  ;;  %v4863_v63 = vrot.slane %v8997_v58, 1  ;;  %v7525_v1 = vld [vmem:[%s9939_s2] sm:$0xff]  }
 0x305   : > { %v3956_v32 = vsel %vm7960_vm8, %v3789_v18, %v3955_v22  ;;  %v4798_v37 = vor.u32 %v4797_v51, %v4793_v10  ;;  %v4864_v59 = vrot.slane %v7688_v21, 1  ;;  %v4191_v27 = vshll.u32 %v7532_v47, 16  ;;  %v7538_v16 = vld [vmem:[#allocation3 + $0x50] ss:$0 sps:$4 sm:$0x11]  }
 0x306   : > { %3957 = vst [vmem:[#allocation3 + $0xc0] sm:$0xf] %v3956_v32  ;;  %v3797_v30 = vor.u32 %v3795_v7, %v3794_v29  ;;  %v3799_v8 = vrot.slane %v3794_v29, 4  ;;  %v4153_v60 = vshrl.u32 %v8978_v40, 16  ;;  %v4165_v3 = vshrl.u32 %v7528_v25, 16  ;;  %v7689_v32 = vld [vmem:[#allocation3 + $0xc] sm:$0xff]  }
 0x307   : > { %v8980_v48 = vld [vmem:[#allocation3 + $0xb4] sm:$0xff]   ;;  %v4803_v46 = vsel %vm1128_vm9, %v4798_v37, %v4802_v38  ;;  %v8987_v44 = vld [vmem:[#allocation3 + $0xbc] ss:$0 sps:$4 sm:$0x11]   ;;  %v4196_v61 = vshll.u32 %v7533_v50, 16  ;;  %v4174_v14 = vrot.slane %v4172_v0, 1  ;;  %v4151_v17 = vsel %vm1128_vm9, %v4146_v53, %v4150_v55 }
 0x308   : > { %v3798_v42 = vsel %vm7953_vm7, %v3790_v28, %v3797_v30  ;;  %v3960_v43 = vsel %vm7875_vm2, %v3799_v8, %v3959_v26  ;;  %4854 = vrot.lane.b32.xlu1 %v4803_v46, %s7800_s6  ;;  %v4807_v45 = vshll.u32 %v8980_v48, 16  ;;  %v4812_v41 = vshll.u32 %v8987_v44, 16  ;;  %v9007_v19 = vld [vmem:[#allocation3 + $0x2c] ss:$0 sps:$4 sm:$0x11]   ;;  %v9021_v26 = vld [vmem:[#allocation3 + $0x3c] sm:$0xff]  }
 0x309   : > { %3958 = vst.msk [vmem:[#allocation3 + $0xc4] sm:$0xf] %vm170_vm4, %v3798_v42  ;;  %3961 = vst [vmem:[#allocation3 + $0xc8] sm:$0x1] %v3960_v43  ;;  %v4805_v31 = vshrl.u32 %v8980_v48, 16  ;;  %v4189_v49 = vshrl.u32 %v7532_v47, 16  ;;  %v4170_v22 = vor.u32 %v4169_v56, %v4165_v3  ;;  %v4865_v7 = vsel %vm1353_vm10, %v4863_v63, %v4864_v59 }
 0x30a   : > { %v4809_v5 = vrot.slane %v4807_v45, 1  ;;  %v4814_v2 = vrot.slane %v4812_v41, 1  ;;  %v4157_v12 = vrot.slane %v4155_v52, 1  ;;  %v4160_v13 = vshll.u32 %v8989_v57, 16  ;;  %v9032_v38 = vld [vmem:[#allocation3 + $0x24] sm:$0xff]   ;;  %v9036_v46 = vld [vmem:[#allocation3 + $0x78] sm:$0xff]  }
 0x30b   : > { %v4193_v35 = vrot.slane %v4191_v27, 1  ;;  %v4198_v24 = vrot.slane %v4196_v61, 1  ;;  %v4215_v18 = vshll.u32 %v9001_v9, 16  ;;  %v4179_v33 = vshll.u32 %v9004_v15, 16  ;;  %v7536_v50 = vld [vmem:[%s9939_s2 + $0x8] sm:$0xff]  }
 0x30c   : > { %v4810_v62 = vor.u32 %v4809_v5, %v4805_v31  ;;  %v4162_v54 = vrot.slane %v4160_v13, 1  ;;  %v7542_v25 = vld [vmem:[#allocation3 + $0x68] ss:$0 sps:$4 sm:$0x11]   ;;  %v4175_v10 = vsel %vm1128_vm9, %v4170_v22, %v4174_v14  ;;  %v4239_v28 = vshll.u32 %v9009_v39, 16  ;;  %v9047_v56 = vld [vmem:[#allocation3 + $0x54] sm:$0xff]  }
 0x30d   : > { %v4194_v37 = vor.u32 %v4193_v35, %v4189_v49  ;;  %v4866_v40 = vrot.slane %v9032_v38, 1  ;;  %v4217_v6 = vrot.slane %v4215_v18, 1  ;;  %v4220_v42 = vshll.u32 %v7538_v16, 16  ;;  %v9042_v0 = vld [vmem:[#allocation3 + $0x44] ss:$0 sps:$4 sm:$0x11]  }
 0x30e   : > { %v4815_v20 = vsel %vm1128_vm9, %v4810_v62, %v4814_v2  ;;  %v4184_v43 = vshll.u32 %v9007_v19, 16  ;;  %v4181_v41 = vrot.slane %v4179_v33, 1  ;;  %v4244_v53 = vshll.u32 %v7542_v25, 16  ;;  %v7691_v21 = vld [vmem:[#allocation3 + $0x2c] ss:$0 sps:$4 sm:$0x11]  }
 0x30f   : > { %4856 = vrot.lane.b32.xlu0 %v4815_v20, %s7800_s6  ;;  %v4158_v52 = vor.u32 %v4157_v12, %v4153_v60  ;;  %v4213_v31 = vshrl.u32 %v9001_v9, 16  ;;  %v4241_v5 = vrot.slane %v4239_v28, 1  ;;  %v4203_v55 = vshll.u32 %v9021_v26, 16  ;;  %v7549_v60 = vld [vmem:[%s9939_s2 + $0x10] sm:$0xff]   ;;  %v9056_v2 = vld [vmem:[#allocation3 + $0x90] sm:$0xff]  }
 0x310   : > { %v9015_v23 = vld [vmem:[#allocation3 + $0xc0] sm:$0xff]   ;;  %v9018_v4 = vld [vmem:[#allocation3 + $0xc8] ss:$0 sps:$4 sm:$0x11]   ;;  %v4867_v59 = vrot.slane %v7691_v21, 1  ;;  %v4177_v27 = vshrl.u32 %v9004_v15, 16  ;;  %v4199_v3 = vsel %vm1128_vm9, %v4194_v37, %v4198_v24 }
 0x311   : > { %v4819_v36 = vshll.u32 %v9015_v23, 16  ;;  %v4824_v51 = vshll.u32 %v9018_v4, 16  ;;  %v4817_v30 = vshrl.u32 %v9015_v23, 16  ;;  %v4237_v62 = vshrl.u32 %v9009_v39, 16  ;;  %v9061_v22 = vld [vmem:[#allocation3 + $0x6c] sm:$0xff]  }
 0x312   : > { %v4218_v61 = vor.u32 %v4217_v6, %v4213_v31  ;;  %v7546_v9 = vld [vmem:[#allocation3 + $0x80] ss:$0 sps:$4 sm:$0x11]   ;;  %v4263_v14 = vshll.u32 %v9036_v46, 16  ;;  %v4222_v49 = vrot.slane %v4220_v42, 1  ;;  %v4182_v12 = vor.u32 %v4181_v41, %v4177_v27  ;;  %v9091_v6 = vld [vmem:[#allocation3 + $0x84] sm:$0xff]  }
 0x313   : > { %v4829_v29 = vpop.permute.xlu0 %4828  ;;  %4332 = vrot.lane.b32.xlu0 %v4151_v17, %s7800_s6  ;;  %v4821_v8 = vrot.slane %v4819_v36, 1  ;;  %v4826_v45 = vrot.slane %v4824_v51, 1  ;;  %v4186_v13 = vrot.slane %v4184_v43, 1  ;;  %v4246_v20 = vrot.slane %v4244_v53, 1  ;;  %v9094_v42 = vld [vmem:[#allocation3 + $0x18] sm:$0xff]  }
 0x314   : > { %v4909_v34 = vsel %vm1402_vm11, %v7689_v32, %v4829_v29  ;;  %v4163_v39 = vsel %vm1128_vm9, %v4158_v52, %v4162_v54  ;;  %v4205_v35 = vrot.slane %v4203_v55, 1  ;;  %v4227_v17 = vshll.u32 %v9047_v56, 16  ;;  %v9071_v33 = vld [vmem:[#allocation3 + $0x5c] ss:$0 sps:$4 sm:$0x11]   ;;  %v7558_v54 = vld [vmem:[%s9939_s2 + $0x18] sm:$0xff]  }
 0x315   : > { %5656 = vmatmul.mubr.bf16.vlgmr.msra.gmra.mrb[0].mxu1 %v4909_v34  ;;  %v4822_v47 = vor.u32 %v4821_v8, %v4817_v30  ;;  %v4201_v18 = vshrl.u32 %v9021_v26, 16  ;;  %v4208_v36 = vshll.u32 %v9042_v0, 16  ;;  %v4287_v25 = vshll.u32 %v9056_v2, 16  ;;  %v9082_v51 = vld [vmem:[#allocation3 + $0x98] ss:$0 sps:$4 sm:$0x11]  }
 0x316   : > { %5905 = vmatpush1.bf16.msra.mxu1 %v7525_v1  ;;  %7014 = vmatprep.mubr.msk.bf16.mxu1 %vm1402_vm11, %v4865_v7  ;;  %v4242_v1 = vor.u32 %v4241_v5, %v4237_v62  ;;  %v4868_v29 = vsel %vm1353_vm10, %v4866_v40, %v4867_v59  ;;  %v4265_v7 = vrot.slane %v4263_v14, 1  ;;  %v4187_v26 = vsel %vm1128_vm9, %v4182_v12, %v4186_v13  ;;  %v9084_v28 = vld [vmem:[#allocation3 + $0x74] ss:$0 sps:$4 sm:$0x11]   ;;  %v9089_v40 = vld [vmem:[#allocation3 + $0xa8] sm:$0xff]   ;;  %v9106_v27 = vld [vmem:[#allocation3 + $0x9c] sm:$0xff]  }
 0x317   : > { %5906 = vmatprep.subr.bf16.mxu1 %v9941_v11  ;;  %4336 = vrot.lane.b32.xlu0 %v4175_v10, %s7800_s6  ;;  %v4827_v63 = vsel %vm1128_vm9, %v4822_v47, %v4826_v45  ;;  %v4268_v10 = vshll.u32 %v7546_v9, 16  ;;  %v4251_v32 = vshll.u32 %v9061_v22, 16  ;;  %v4206_v30 = vor.u32 %v4205_v35, %v4201_v18  ;;  %v9097_v47 = vld [vmem:[#allocation3 + $0x30] sm:$0xff]   ;;  %v7571_v62 = vld [vmem:[%s9939_s2 + $0x20] sm:$0xff]  }
 0x318   : > { %4858 = vrot.lane.b32.xlu1 %v4827_v63, %s7800_s6  ;;  %v4247_v34 = vsel %vm1128_vm9, %v4242_v1, %v4246_v20  ;;  %v4261_v8 = vshrl.u32 %v9036_v46, 16  ;;  %v4229_v37 = vrot.slane %v4227_v17, 1  ;;  %v4210_v43 = vrot.slane %v4208_v36, 1  ;;  %v9113_v14 = vld [vmem:[#allocation3 + $0x8c] ss:$0 sps:$4 sm:$0x11]  }
 0x319   : > { %v4869_v45 = vrot.slane %v9097_v47, 1  ;;  %v4289_v53 = vrot.slane %v4287_v25, 1  ;;  %v4270_v52 = vrot.slane %v4268_v10, 1  ;;  %v4225_v31 = vshrl.u32 %v9047_v56, 16  ;;  %v9131_v36 = vld [vmem:[#allocation3 + $0x30] sm:$0xff]  }
 0x31a   : > { %5907 = vmatpush1.bf16.msra.mxu1 %v7536_v50  ;;  %v4831_v16 = vpop.permute.xlu1 %4830  ;;  %v7693_v50 = vld [vmem:[#allocation3 + $0x38] ss:$0 sps:$4 sm:$0x11]   ;;  %v4266_v46 = vor.u32 %v4265_v7, %v4261_v8  ;;  %v4232_v5 = vshll.u32 %v9071_v33, 16  ;;  %v4285_v55 = vshrl.u32 %v9056_v2, 16  ;;  %v4292_v63 = vshll.u32 %v9082_v51, 16 }
 0x31b   : > { %5908 = vmatprep.subr.bf16.mxu1 %v9941_v11  ;;  %4340 = vrot.lane.b32.xlu0 %v4199_v3, %s7800_s6  ;;  %v4912_v24 = vsel %vm1402_vm11, %v8997_v58, %v4831_v16  ;;  %v4223_v58 = vsel %vm1128_vm9, %v4218_v61, %v4222_v49  ;;  %v4870_v41 = vrot.slane %v7693_v50, 1  ;;  %v4249_v21 = vshrl.u32 %v9061_v22, 16  ;;  %v9121_v20 = vld [vmem:[#allocation3 + $0x20] ss:$0 sps:$4 sm:$0x11]   ;;  %v7584_v25 = vld [vmem:[%s9939_s2 + $0x28] sm:$0xff]  }
 0x31c   : > { %4334 = vrot.lane.b32.xlu1 %v4163_v39, %s7800_s6  ;;  %v4253_v59 = vrot.slane %v4251_v32, 1  ;;  %v4211_v3 = vsel %vm1128_vm9, %v4206_v30, %v4210_v43  ;;  %v4230_v61 = vor.u32 %v4229_v37, %v4225_v31  ;;  %v4311_v9 = vshll.u32 %v9089_v40, 16  ;;  %v9126_v35 = vld [vmem:[#allocation3 + $0xb0] ss:$0 sps:$4 sm:$0x11]   ;;  %v9142_v32 = vld [vmem:[#allocation3 + $0x48] sm:$0xff]  }
 0x31d   : > { %5664 = vmatmul.mubr.bf16.gmra.mrb[4].mxu1 %v4912_v24  ;;  %v4275_v2 = vshll.u32 %v9091_v6, 16  ;;  %v4290_v12 = vor.u32 %v4289_v53, %v4285_v55  ;;  %v4256_v13 = vshll.u32 %v9084_v28, 16  ;;  %v5137_v16 = vshll.u32 %v9094_v42, 16  ;;  %v7695_v8 = vld [vmem:[#allocation3 + $0x44] ss:$0 sps:$4 sm:$0x11]  }
 0x31e   : > { %7015 = vmatprep.mubr.msk.bf16.mxu1 %vm1402_vm11, %v4868_v29  ;;  %5909 = vmatpush1.bf16.msra.mxu1 %v7549_v60  ;;  %v4871_v39 = vsel %vm1353_vm10, %v4869_v45, %v4870_v41  ;;  %v4234_v1 = vrot.slane %v4232_v5, 1  ;;  %v4271_v17 = vsel %vm1128_vm9, %v4266_v46, %v4270_v52  ;;  %v4254_v24 = vor.u32 %v4253_v59, %v4249_v21  ;;  %v9137_v29 = vld [vmem:[#allocation3 + $0x3c] sm:$0xff]   ;;  %v9147_v45 = vld [vmem:[#allocation3 + $0xb4] sm:$0xff]   ;;  %v9149_v50 = vld [vmem:[#allocation3 + $0x24] sm:$0xff]  }
 0x31f   : > { %5910 = vmatprep.subr.bf16.mxu1 %v9941_v11  ;;  %4344 = vrot.lane.b32.xlu0 %v4223_v58, %s7800_s6  ;;  %v4299_v18 = vshll.u32 %v9106_v27, 16  ;;  %v4872_v7 = vrot.slane %v9137_v29, 1  ;;  %v4313_v10 = vrot.slane %v4311_v9, 1  ;;  %v4277_v58 = vrot.slane %v4275_v2, 1  ;;  %v7593_v21 = vld [vmem:[%s9939_s2 + $0x30] sm:$0xff]  }
 0x320   : > { %4338 = vrot.lane.b32.xlu1 %v4187_v26, %s7800_s6  ;;  %v9140_v26 = vld [vmem:[#allocation3 + $0xa4] ss:$0 sps:$4 sm:$0x11]   ;;  %v4258_v30 = vrot.slane %v4256_v13, 1  ;;  %v4873_v37 = vrot.slane %v7695_v8, 1  ;;  %v5139_v43 = vrot.slane %v5137_v16, 1 }
 0x321   : > { %v4833_v60 = vpop.permute.xlu0 %4832  ;;  %v4309_v41 = vshrl.u32 %v9089_v40, 16  ;;  %v4316_v53 = vshll.u32 %v9126_v35, 16  ;;  %v4273_v46 = vshrl.u32 %v9091_v6, 16  ;;  %v4280_v52 = vshll.u32 %v9113_v14, 16 }
 0x322   : > { %5911 = vmatpush1.bf16.msra.mxu1 %v7558_v54  ;;  %v4915_v49 = vsel %vm1402_vm11, %v9032_v38, %v4833_v60  ;;  %v4294_v38 = vrot.slane %v4292_v63, 1  ;;  %v4235_v54 = vsel %vm1128_vm9, %v4230_v61, %v4234_v1  ;;  %v4259_v31 = vsel %vm1128_vm9, %v4254_v24, %v4258_v30  ;;  %v9163_v61 = vld [vmem:[#allocation3 + $0x38] ss:$0 sps:$4 sm:$0x11]  }
 0x323   : > { %5912 = vmatprep.subr.bf16.mxu1 %v9941_v11  ;;  %4348 = vrot.lane.b32.xlu0 %v4247_v34, %s7800_s6  ;;  %v5135_v5 = vshrl.u32 %v9094_v42, 16  ;;  %v5142_v55 = vshll.u32 %v9121_v20, 16  ;;  %v4301_v63 = vrot.slane %v4299_v18, 1  ;;  %v4278_v60 = vor.u32 %v4277_v58, %v4273_v46  ;;  %v9166_v2 = vld [vmem:[#allocation3 + $0xbc] ss:$0 sps:$4 sm:$0x11]  }
 0x324   : > { %4342 = vrot.lane.b32.xlu1 %v4211_v3, %s7800_s6  ;;  %v4295_v34 = vsel %vm1128_vm9, %v4290_v12, %v4294_v38  ;;  %v4297_v3 = vshrl.u32 %v9106_v27, 16  ;;  %v5161_v9 = vshll.u32 %v9131_v36, 16  ;;  %v4304_v12 = vshll.u32 %v9140_v26, 16  ;;  %v9174_v16 = vld [vmem:[#allocation3 + $0x50] ss:$0 sps:$4 sm:$0x11]  }
 0x325   : > { %5672 = vmatmul.mubr.bf16.gmra.mrb[8].mxu1 %v4915_v49  ;;  %v5140_v49 = vor.u32 %v5139_v43, %v5135_v5  ;;  %v4323_v13 = vshll.u32 %v9147_v45, 16  ;;  %v4318_v1 = vrot.slane %v4316_v53, 1  ;;  %v5185_v38 = vshll.u32 %v9142_v32, 16 }
 0x326   : > { %7016 = vmatprep.mubr.msk.bf16.mxu1 %vm1402_vm11, %v4871_v39  ;;  %5913 = vmatpush1.bf16.msra.mxu1 %v7571_v62  ;;  %v4314_v62 = vor.u32 %v4313_v10, %v4309_v41  ;;  %v4874_v39 = vsel %vm1353_vm10, %v4872_v7, %v4873_v37  ;;  %v5144_v24 = vrot.slane %v5142_v55, 1  ;;  %v5149_v18 = vshll.u32 %v9149_v50, 16  ;;  %v7596_v10 = vld [vmem:[%s9939_s2 + $0x38] sm:$0xff]   ;;  %v7697_v41 = vld [vmem:[#allocation3 + $0x50] ss:$0 sps:$4 sm:$0x11]  }
 0x327   : > { %5914 = vmatprep.subr.bf16.mxu1 %v9941_v11  ;;  %4352 = vrot.lane.b32.xlu0 %v4271_v17, %s7800_s6  ;;  %v4282_v17 = vrot.slane %v4280_v52, 1  ;;  %v5163_v8 = vrot.slane %v5161_v9, 1  ;;  %v4306_v43 = vrot.slane %v4304_v12, 1  ;;  %v4876_v53 = vrot.slane %v7697_v41, 1  ;;  %v9207_v9 = vld [vmem:[#allocation3 + $0x54] sm:$0xff]  }
 0x328   : > { %4346 = vrot.lane.b32.xlu1 %v4235_v54, %s7800_s6  ;;  %v9183_v54 = vld [vmem:[#allocation3 + $0x3c] sm:$0xff]   ;;  %v4319_v7 = vsel %vm1128_vm9, %v4314_v62, %v4318_v1  ;;  %v5145_v37 = vsel %vm1128_vm9, %v5140_v49, %v5144_v24  ;;  %v4325_v46 = vrot.slane %v4323_v13, 1  ;;  %v9196_v52 = vld [vmem:[#allocation3 + $0x2c] ss:$0 sps:$4 sm:$0x11]   ;;  %v5166_v5 = vshll.u32 %v9163_v61, 16 }
 0x329   : > { %v4283_v58 = vsel %vm1128_vm9, %v4278_v60, %v4282_v17  ;;  %v4328_v55 = vshll.u32 %v9166_v2, 16  ;;  %v5190_v62 = vshll.u32 %v9174_v16, 16  ;;  %v5151_v60 = vrot.slane %v5149_v18, 1 }
 0x32a   : > { %5915 = vmatpush1.bf16.msra.mxu1 %v7584_v25  ;;  %v4835_v59 = vpop.permute.xlu1 %4834  ;;  %v9181_v25 = vld [vmem:[#allocation3 + $0x60] sm:$0xff]   ;;  %v5183_v13 = vshrl.u32 %v9142_v32, 16  ;;  %v5154_v24 = vshll.u32 %v9196_v52, 16  ;;  %v5173_v18 = vshll.u32 %v9183_v54, 16  ;;  %v5197_v41 = vshll.u32 %v9207_v9, 16 }
 0x32b   : > { %5916 = vmatprep.subr.bf16.mxu1 %v9941_v11  ;;  %4356 = vrot.lane.b32.xlu0 %v4295_v34, %s7800_s6  ;;  %v4918_v42 = vsel %vm1402_vm11, %v9097_v47, %v4835_v59  ;;  %v4302_v47 = vor.u32 %v4301_v63, %v4297_v3  ;;  %9969 = vst [vmem:[#allocation7_spill] sm:$0xff] %v9181_v25  ;;  %v9190_v34 = vld [vmem:[#allocation3 + $0x48] sm:$0xff]   ;;  %v5187_v63 = vrot.slane %v5185_v38, 1  ;;  %v4321_v59 = vshrl.u32 %v9147_v45, 16  ;;  %v9205_v3 = vld [vmem:[#allocation3 + $0x78] sm:$0xff]  }
 0x32c   : > { %4350 = vrot.lane.b32.xlu1 %v4259_v31, %s7800_s6  ;;  %v4875_v30 = vrot.slane %v9190_v34, 1  ;;  %v5159_v31 = vshrl.u32 %v9131_v36, 16  ;;  %9970 = vst [vmem:[#allocation8_spill] sm:$0xff] %v9205_v3  ;;  %v5209_v1 = vshll.u32 %v9181_v25, 16 }
 0x32d   : > { %5680 = vmatmul.mubr.bf16.gmra.mrb[12].mxu1 %v4918_v42  ;;  %v7597_v42 = vld [vmem:[%s9939_s2 + $0x40] sm:$0xff]   ;;  %v4326_v38 = vor.u32 %v4325_v46, %v4321_v59  ;;  %v9230_v46 = vld [vmem:[#allocation3 + $0x90] sm:$0xff]  }
 0x32e   : > { %7017 = vmatprep.mubr.msk.bf16.mxu1 %vm1402_vm11, %v4874_v39  ;;  %5917 = vmatpush1.bf16.msra.mxu1 %v7593_v21  ;;  %v4307_v21 = vsel %vm1128_vm9, %v4302_v47, %v4306_v43  ;;  %v5164_v12 = vor.u32 %v5163_v8, %v5159_v31  ;;  %v5147_v39 = vshrl.u32 %v9149_v50, 16  ;;  %v9220_v47 = vld [vmem:[#allocation3 + $0x68] ss:$0 sps:$4 sm:$0x11]   ;;  %v4877_v32 = vsel %vm1353_vm10, %v4875_v30, %v4876_v53  ;;  %v9232_v31 = vld [vmem:[#allocation3 + $0x6c] sm:$0xff]  }
 0x32f   : > { %5918 = vmatprep.subr.bf16.mxu1 %v9941_v11  ;;  %4360 = vrot.lane.b32.xlu0 %v4319_v7, %s7800_s6  ;;  %9971 = vst [vmem:[#allocation9_spill] sm:$0xff] %v9220_v47  ;;  %v4330_v7 = vrot.slane %v4328_v55, 1  ;;  %v9225_v8 = vld [vmem:[#allocation3 + $0x44] ss:$0 sps:$4 sm:$0x11]   ;;  %v5233_v43 = vshll.u32 %v9205_v3, 16 }
 0x330   : > { %4354 = vrot.lane.b32.xlu1 %v4283_v58, %s7800_s6  ;;  %v5188_v58 = vor.u32 %v5187_v63, %v5183_v13  ;;  %9972 = vst [vmem:[#allocation10_spill] sm:$0xff] %v9230_v46  ;;  %v7598_v30 = vld [vmem:[%s9939_s2 + $0x48] sm:$0xff]   ;;  %v7699_v63 = vld [vmem:[#allocation3 + $0x5c] ss:$0 sps:$4 sm:$0x11]   ;;  %v5211_v59 = vrot.slane %v5209_v1, 1 }
 0x331   : > { %v4837_v49 = vpop.permute.xlu0 %4836  ;;  %v5175_v13 = vrot.slane %v5173_v18, 1  ;;  %v5214_v1 = vshll.u32 %v9220_v47, 16  ;;  %v7599_v18 = vld [vmem:[%s9939_s2 + $0x50] sm:$0xff]  }
 0x332   : > { %5919 = vmatpush1.bf16.msra.mxu1 %v7596_v10  ;;  %v4921_v17 = vsel %vm1402_vm11, %v9137_v29, %v4837_v49  ;;  %v5168_v10 = vrot.slane %v5166_v5, 1  ;;  %v5192_v29 = vrot.slane %v5190_v62, 1  ;;  %v9238_v5 = vld [vmem:[#allocation3 + $0x54] sm:$0xff]   ;;  %v9241_v62 = vld [vmem:[#allocation3 + $0x80] ss:$0 sps:$4 sm:$0x11]  }
 0x333   : > { %5920 = vmatprep.subr.bf16.mxu1 %v9941_v11  ;;  %5326 = vrot.lane.b32.xlu0 %v5145_v37, %s7800_s6  ;;  %v5152_v37 = vor.u32 %v5151_v60, %v5147_v39  ;;  %v4878_v55 = vrot.slane %v9238_v5, 1  ;;  %9973 = vst [vmem:[#allocation11_spill] sm:$0xff] %v9241_v62  ;;  %v4331_v60 = vsel %vm1128_vm9, %v4326_v38, %v4330_v7  ;;  %v5207_v49 = vshrl.u32 %v9181_v25, 16 }
 0x334   : > { %4358 = vrot.lane.b32.xlu1 %v4307_v21, %s7800_s6  ;;  %v5169_v53 = vsel %vm1128_vm9, %v5164_v12, %v5168_v10  ;;  %v4879_v21 = vrot.slane %v7699_v63, 1  ;;  %v9247_v12 = vld [vmem:[#allocation3 + $0x5c] ss:$0 sps:$4 sm:$0x11]   ;;  %v5193_v39 = vsel %vm1128_vm9, %v5188_v58, %v5192_v29  ;;  %v5231_v38 = vshrl.u32 %v9205_v3, 16 }
 0x335   : > { %5688 = vmatmul.mubr.bf16.gmra.mrb[16].mxu1 %v4921_v17  ;;  %9974 = vst [vmem:[#allocation12_spill] sm:$0xff] %v9247_v12  ;;  %v5171_v17 = vshrl.u32 %v9183_v54, 16  ;;  %v5199_v7 = vrot.slane %v5197_v41, 1  ;;  %v5212_v63 = vor.u32 %v5211_v59, %v5207_v49  ;;  %v5238_v58 = vshll.u32 %v9241_v62, 16 }
 0x336   : > { %7018 = vmatprep.mubr.msk.bf16.mxu1 %vm1402_vm11, %v4877_v32  ;;  %5921 = vmatpush1.bf16.msra.mxu1 %v7597_v42  ;;  %v5156_v42 = vrot.slane %v5154_v24, 1  ;;  %v5178_v32 = vshll.u32 %v9225_v8, 16  ;;  %v5235_v24 = vrot.slane %v5233_v43, 1  ;;  %v5195_v29 = vshrl.u32 %v9207_v9, 16 }
 0x337   : > { %5922 = vmatprep.subr.bf16.mxu1 %v9941_v11  ;;  %5330 = vrot.lane.b32.xlu0 %v5169_v53, %s7800_s6  ;;  %v9262_v11 = vld [vmem:[#allocation3 + $0xa8] sm:$0xff]   ;;  %v5176_v41 = vor.u32 %v5175_v13, %v5171_v17  ;;  %v5221_v59 = vshll.u32 %v9232_v31, 16  ;;  %v4880_v49 = vsel %vm1353_vm10, %v4878_v55, %v4879_v21  ;;  %v5216_v62 = vrot.slane %v5214_v1, 1  ;;  %v9274_v3 = vld [vmem:[#allocation3 + $0x98] ss:$0 sps:$4 sm:$0x11]  }
 0x338   : > { %4362 = vrot.lane.b32.xlu1 %v4331_v60, %s7800_s6  ;;  %v5157_v10 = vsel %vm1128_vm9, %v5152_v37, %v5156_v42  ;;  %v5257_v60 = vshll.u32 %v9230_v46, 16  ;;  %9975 = vst [vmem:[#allocation13_spill] sm:$0xff] %v9262_v11  ;;  %v9976_v37 = vmov 0   ;;  %v9270_v42 = vld [vmem:[#allocation3 + $0x84] sm:$0xff]   ;;  %9978 = vst [vmem:[#allocation15_spill] sm:$0xff] %v9274_v3  ;;  %v5236_v47 = vor.u32 %v5235_v24, %v5231_v38 }
 0x339   : > { %9977 = vst [vmem:[#allocation14_spill] sm:$0xff] %v9270_v42  ;;  %v9277_v13 = vld [vmem:[#allocation3 + $0x74] ss:$0 sps:$4 sm:$0x11]   ;;  %v9279_v17 = vld [vmem:[#allocation3 + $0xc0] sm:$0xff]   ;;  %v5240_v55 = vrot.slane %v5238_v58, 1 }
 0x33a   : > { %5923 = vmatpush1.bf16.msra.mxu1 %v7598_v30  ;;  %v4839_v53 = vpop.permute.xlu1 %4838  ;;  %v5202_v30 = vshll.u32 %v9247_v12, 16  ;;  %v5259_v21 = vrot.slane %v5257_v60, 1  ;;  %v9285_v1 = vld [vmem:[#allocation3 + $0xb0] ss:$0 sps:$4 sm:$0x11]   ;;  %v5223_v24 = vrot.slane %v5221_v59, 1 }
 0x33b   : > { %5924 = vmatprep.subr.bf16.mxu1 %v9976_v37  ;;  %5334 = vrot.lane.b32.xlu0 %v5193_v39, %s7800_s6  ;;  %v4924_v43 = vsel %vm1402_vm11, %v9190_v34, %v4839_v53  ;;  %v5180_v39 = vrot.slane %v5178_v32, 1  ;;  %v5200_v34 = vor.u32 %v5199_v7, %v5195_v29  ;;  %v5217_v53 = vsel %vm1128_vm9, %v5212_v63, %v5216_v62  ;;  %v7700_v62 = vld [vmem:[#allocation3 + $0x60] sm:$0xff]   ;;  %v7701_v58 = vld [vmem:[#allocation3 + $0x68] ss:$0 sps:$4 sm:$0x11]  }
 0x33c   : > { %5328 = vrot.lane.b32.xlu1 %v5157_v10, %s7800_s6  ;;  %v7600_v10 = vld [vmem:[%s9939_s2 + $0x58] sm:$0xff]   ;;  %9979 = vst [vmem:[#allocation16_spill] sm:$0xff] %v9285_v1  ;;  %v5204_v38 = vrot.slane %v5202_v30, 1  ;;  %v5245_v7 = vshll.u32 %v9270_v42, 16  ;;  %v4881_v63 = vrot.slane %v7700_v62, 1  ;;  %v4882_v29 = vrot.slane %v7701_v58, 1 }
 0x33d   : > { %5696 = vmatmul.mubr.bf16.gmra.mrb[20].mxu1 %v4924_v43  ;;  %v5281_v43 = vshll.u32 %v9262_v11, 16  ;;  %v5181_v32 = vsel %vm1128_vm9, %v5176_v41, %v5180_v39  ;;  %v5255_v60 = vshrl.u32 %v9230_v46, 16  ;;  %v5219_v30 = vshrl.u32 %v9232_v31, 16  ;;  %v9301_v39 = vld [vmem:[#allocation3 + $0x8c] ss:$0 sps:$4 sm:$0x11]  }
 0x33e   : > { %7019 = vmatprep.mubr.msk.bf16.mxu1 %vm1402_vm11, %v4880_v49  ;;  %5925 = vmatpush1.bf16.msra.mxu1 %v7599_v18  ;;  %v9292_v18 = vld [vmem:[#allocation3 + $0x9c] sm:$0xff]   ;;  %v5262_v49 = vshll.u32 %v9274_v3, 16  ;;  %v5205_v41 = vsel %vm1128_vm9, %v5200_v34, %v5204_v38  ;;  %v5226_v59 = vshll.u32 %v9277_v13, 16  ;;  %9980 = vst [vmem:[#allocation17_spill] sm:$0xff] %v9301_v39  ;;  %v5286_v58 = vshll.u32 %v9285_v1, 16  ;;  %v9310_v3 = vld [vmem:[#allocation3 + $0xb4] sm:$0xff]  }
 0x33f   : > { %5926 = vmatprep.subr.bf16.mxu1 %v9976_v37  ;;  %5338 = vrot.lane.b32.xlu0 %v5217_v53, %s7800_s6  ;;  %v5241_v53 = vsel %vm1128_vm9, %v5236_v47, %v5240_v55  ;;  %v5260_v25 = vor.u32 %v5259_v21, %v5255_v60  ;;  %v5283_v12 = vrot.slane %v5281_v43, 1  ;;  %v5305_v46 = vshll.u32 %v9279_v17, 16  ;;  %v9315_v60 = vld [vmem:[#allocation3 + $0xc8] ss:$0 sps:$4 sm:$0x11]  }
 0x340   : > { %5332 = vrot.lane.b32.xlu1 %v5181_v32, %s7800_s6  ;;  %v5224_v34 = vor.u32 %v5223_v24, %v5219_v30  ;;  %v5247_v55 = vrot.slane %v5245_v7, 1  ;;  %v5269_v38 = vshll.u32 %v9292_v18, 16  ;;  %v5264_v21 = vrot.slane %v5262_v49, 1  ;;  %v9320_v7 = vld [vmem:[#allocation3 + $0xa4] ss:$0 sps:$4 sm:$0x11]  }
 0x341   : > { %v4841_v32 = vpop.permute.xlu0 %4840  ;;  %v5279_v43 = vshrl.u32 %v9262_v11, 16  ;;  %v5250_v24 = vshll.u32 %v9301_v39, 16  ;;  %v7703_v11 = vld [vmem:[#allocation3 + $0x74] ss:$0 sps:$4 sm:$0x11]  }
 0x342   : > { %5927 = vmatpush1.bf16.msra.mxu1 %v7600_v10  ;;  %v4927_v47 = vsel %vm1402_vm11, %v9238_v5, %v4841_v32  ;;  %v4883_v10 = vsel %vm1353_vm10, %v4881_v63, %v4882_v29  ;;  %v5243_v5 = vshrl.u32 %v9270_v42, 16  ;;  %v5265_v30 = vsel %vm1128_vm9, %v5260_v25, %v5264_v21 }
 0x343   : > { %6210 = vmatprep.subr.bf16.mxu1 %v9976_v37  ;;  %5342 = vrot.lane.b32.xlu0 %v5241_v53, %s7800_s6  ;;  %v5228_v53 = vrot.slane %v5226_v59, 1  ;;  %v5288_v32 = vrot.slane %v5286_v58, 1  ;;  %v5271_v49 = vrot.slane %v5269_v38, 1  ;;  %v7702_v59 = vld [vmem:[#allocation3 + $0x6c] sm:$0xff]   ;;  %v4885_v39 = vrot.slane %v7703_v11, 1 }
 0x344   : > { %5336 = vrot.lane.b32.xlu1 %v5205_v41, %s7800_s6  ;;  %v5284_v41 = vor.u32 %v5283_v12, %v5279_v43  ;;  %v5248_v29 = vor.u32 %v5247_v55, %v5243_v5  ;;  %v4884_v1 = vrot.slane %v7702_v59, 1  ;;  %v5303_v42 = vshrl.u32 %v9279_v17, 16 }
 0x345   : > { %5704 = vmatmul.mubr.bf16.gmra.mrb[24].mxu1 %v4927_v47  ;;  %v5307_v47 = vrot.slane %v5305_v46, 1  ;;  %v5229_v63 = vsel %vm1128_vm9, %v5224_v34, %v5228_v53  ;;  %v5310_v25 = vshll.u32 %v9315_v60, 16  ;;  %v5252_v12 = vrot.slane %v5250_v24, 1  ;;  %v9331_v34 = vld [vmem:[#allocation3 + $0xbc] ss:$0 sps:$4 sm:$0x11]  }
 0x346   : > { %7020 = vmatprep.mubr.msk.bf16.mxu1 %vm1402_vm11, %v4883_v10  ;;  %v5293_v10 = vshll.u32 %v9310_v3, 16  ;;  %v5267_v46 = vshrl.u32 %v9292_v18, 16  ;;  %v5274_v58 = vshll.u32 %v9320_v7, 16  ;;  %v5289_v38 = vsel %vm1128_vm9, %v5284_v41, %v5288_v32 }
 0x347   : > { %5346 = vrot.lane.b32.xlu0 %v5265_v30, %s7800_s6  ;;  %v5308_v21 = vor.u32 %v5307_v47, %v5303_v42  ;;  %v5253_v43 = vsel %vm1128_vm9, %v5248_v29, %v5252_v12  ;;  %v4886_v24 = vsel %vm1353_vm10, %v4884_v1, %v4885_v39  ;;  %v5312_v30 = vrot.slane %v5310_v25, 1  ;;  %v7704_v29 = vld [vmem:[#allocation3 + $0x78] sm:$0xff]   ;;  %v7705_v1 = vld [vmem:[#allocation3 + $0x80] ss:$0 sps:$4 sm:$0x11]  }
 0x348   : > { %5340 = vrot.lane.b32.xlu1 %v5229_v63, %s7800_s6  ;;  %v5272_v53 = vor.u32 %v5271_v49, %v5267_v46  ;;  %v5295_v5 = vrot.slane %v5293_v10, 1  ;;  %v5276_v63 = vrot.slane %v5274_v58, 1  ;;  %v5291_v41 = vshrl.u32 %v9310_v3, 16 }
 0x349   : > { %v5298_v42 = vshll.u32 %v9331_v34, 16  ;;  %v5313_v32 = vsel %vm1128_vm9, %v5308_v21, %v5312_v30  ;;  %v4887_v49 = vrot.slane %v7704_v29, 1  ;;  %v4888_v39 = vrot.slane %v7705_v1, 1  ;;  %v7707_v21 = vld [vmem:[#allocation3 + $0x8c] ss:$0 sps:$4 sm:$0x11]  }
 0x34a   : > { %v4843_v55 = vpop.permute.xlu1 %4842  ;;  %v5296_v47 = vor.u32 %v5295_v5, %v5291_v41  ;;  %v7709_v30 = vld [vmem:[#allocation3 + $0x98] ss:$0 sps:$4 sm:$0x11]  }
 0x34b   : > { %5350 = vrot.lane.b32.xlu0 %v5289_v38, %s7800_s6  ;;  %v4930_v11 = vsel %vm1402_vm11, %v7700_v62, %v4843_v55  ;;  %v5277_v62 = vsel %vm1128_vm9, %v5272_v53, %v5276_v63  ;;  %v5300_v10 = vrot.slane %v5298_v42, 1  ;;  %v4889_v58 = vsel %vm1353_vm10, %v4887_v49, %v4888_v39  ;;  %v7706_v55 = vld [vmem:[#allocation3 + $0x84] sm:$0xff]  }
 0x34c   : > { %5344 = vrot.lane.b32.xlu1 %v5253_v43, %s7800_s6  ;;  %v4890_v38 = vrot.slane %v7706_v55, 1  ;;  %v4891_v43 = vrot.slane %v7707_v21, 1  ;;  %v4894_v63 = vrot.slane %v7709_v30, 1  ;;  %v4906_v30 = vrot.slane %v9018_v4, 1 }
 0x34d   : > { %5712 = vmatmul.mubr.bf16.gmra.mrb[28].mxu1 %v4930_v11  ;;  %v5301_v12 = vsel %vm1128_vm9, %v5296_v47, %v5300_v10 }
 0x34e   : > { %7021 = vmatprep.mubr.msk.bf16.mxu1 %vm1402_vm11, %v4886_v24  ;;  %v4892_v5 = vsel %vm1353_vm10, %v4890_v38, %v4891_v43  ;;  %v4902_v43 = vrot.slane %v8980_v48, 1 }
 0x34f   : > { %5354 = vrot.lane.b32.xlu0 %v5313_v32, %s7800_s6 }
 0x350   : > { %5348 = vrot.lane.b32.xlu1 %v5277_v62, %s7800_s6  ;;  %v7710_v62 = vld [vmem:[#allocation3 + $0x9c] sm:$0xff]  }
 0x351   : > { %v4845_v25 = vpop.permute.xlu0 %4844  ;;  %v4896_v47 = vrot.slane %v7710_v62, 1 }
 0x352   : > { %v4933_v46 = vsel %vm1402_vm11, %v7702_v59, %v4845_v25  ;;  %v7708_v59 = vld [vmem:[#allocation3 + $0x90] sm:$0xff]   ;;  %v7712_v25 = vld [vmem:[#allocation3 + $0xa8] sm:$0xff]  }
 0x353   : > { %v4893_v24 = vrot.slane %v7708_v59, 1 }
 0x354   : > { %5352 = vrot.lane.b32.xlu1 %v5301_v12, %s7800_s6  ;;  %v4899_v12 = vrot.slane %v7712_v25, 1 }
 0x355   : > { %5720 = vmatmul.mubr.bf16.gmra.mrb[32].mxu1 %v4933_v46  ;;  %v4895_v32 = vsel %vm1353_vm10, %v4893_v24, %v4894_v63  ;;  %v7713_v46 = vld [vmem:[#allocation3 + $0xb0] ss:$0 sps:$4 sm:$0x11]   ;;  %v4905_v24 = vrot.slane %v9015_v23, 1 }
 0x356   : > { %7022 = vmatprep.mubr.msk.bf16.mxu1 %vm1402_vm11, %v4889_v58  ;;  %v4900_v58 = vrot.slane %v7713_v46, 1 }
 0x358   : > { %v4901_v21 = vsel %vm1353_vm10, %v4899_v12, %v4900_v58  ;;  %v7601_v12 = vld [vmem:[%s9939_s2 + $0xc0] sm:$0xff]  }
 0x359   : > { %v9389_v58 = vld [vmem:[#allocation3 + $0xcc] sm:$0xff]  }
 0x35a   : > { %v4847_v11 = vpop.permute.xlu1 %4846 }
 0x35b   : > { %v4936_v53 = vsel %vm1402_vm11, %v7704_v29, %v4847_v11  ;;  %v7711_v29 = vld [vmem:[#allocation3 + $0xa4] ss:$0 sps:$4 sm:$0x11]   ;;  %v4903_v11 = vrot.slane %v8987_v44, 1 }
 0x35c   : > { %v4897_v49 = vrot.slane %v7711_v29, 1  ;;  %v7714_v44 = vld [vmem:[#allocation3] sm:$0xff]  }
 0x35d   : > { %5728 = vmatmul.mubr.bf16.gmra.mrb[36].mxu1 %v4936_v53 }
 0x35e   : > { %7023 = vmatprep.mubr.msk.bf16.mxu1 %vm1402_vm11, %v4892_v5  ;;  %v4898_v10 = vsel %vm1353_vm10, %v4896_v47, %v4897_v49 }
 0x361   : > { %v4849_v41 = vpop.permute.xlu0 %4848 }
 0x362   : > { %v4939_v42 = vsel %vm1402_vm11, %v7706_v55, %v4849_v41 }
 0x365   : > { %5736 = vmatmul.mubr.bf16.gmra.mrb[40].mxu1 %v4939_v42  ;;  %v4907_v42 = vsel %vm1353_vm10, %v4905_v24, %v4906_v30 }
 0x366   : > { %7024 = vmatprep.mubr.msk.bf16.mxu1 %vm1402_vm11, %v4895_v32  ;;  %v4364_v32 = vrot.slane %v7714_v44, 1 }
 0x36a   : > { %v4851_v1 = vpop.permute.xlu1 %4850 }
 0x36b   : > { %v4942_v39 = vsel %vm1402_vm11, %v7708_v59, %v4851_v1  ;;  %v4904_v59 = vsel %vm1353_vm10, %v4902_v43, %v4903_v11  ;;  %v7718_v43 = vld [vmem:[#allocation3 + $0x20] ss:$0 sps:$4 sm:$0x11]  }
 0x36c   : > { %v4371_v11 = vrot.slane %v7718_v43, 1 }
 0x36d   : > { %5744 = vmatmul.mubr.bf16.gmra.mrb[44].mxu1 %v4942_v39 }
 0x36e   : > { %7025 = vmatprep.mubr.msk.bf16.mxu1 %vm1402_vm11, %v4898_v10  ;;  %v4368_v10 = vrot.slane %v8989_v57, 1  ;;  %v9391_v57 = vld [vmem:[#allocation3 + $0xd4] ss:$0 sps:$4 sm:$0x11]  }
 0x36f   : > { %v5322_v24 = vshll.u32 %v9391_v57, 16 }
 0x371   : > { %v4853_v55 = vpop.permute.xlu0 %4852 }
 0x372   : > { %v4945_v38 = vsel %vm1402_vm11, %v7710_v62, %v4853_v55  ;;  %v7715_v62 = vld [vmem:[#allocation3 + $0x8] ss:$0 sps:$4 sm:$0x11]  }
 0x373   : > { %v4365_v47 = vrot.slane %v7715_v62, 1 }
 0x375   : > { %5752 = vmatmul.mubr.bf16.gmra.mrb[48].mxu1 %v4945_v38  ;;  %v4366_v49 = vsel %vm1353_vm10, %v4364_v32, %v4365_v47  ;;  %v7717_v38 = vld [vmem:[#allocation3 + $0x18] sm:$0xff]  }
 0x376   : > { %7026 = vmatprep.mubr.msk.bf16.mxu1 %vm1402_vm11, %v4901_v21  ;;  %v4370_v21 = vrot.slane %v7717_v38, 1 }
 0x37a   : > { %v4855_v53 = vpop.permute.xlu1 %4854 }
 0x37b   : > { %v4948_v5 = vsel %vm1402_vm11, %v7712_v25, %v4855_v53  ;;  %v7603_v53 = vld [vmem:[%s9939_s2 + $0xd0] sm:$0xff]  }
 0x37d   : > { %5760 = vmatmul.mubr.bf16.gmra.mrb[52].mxu1 %v4948_v5  ;;  %v5315_v5 = vshrl.u32 %v9389_v58, 16 }
 0x37e   : > { %7027 = vmatprep.mubr.msk.bf16.mxu1 %vm1402_vm11, %v4904_v59  ;;  %v5317_v59 = vshll.u32 %v9389_v58, 16 }
 0x381   : > { %v4857_v63 = vpop.permute.xlu0 %4856 }
 0x382   : > { %v4951_v41 = vsel %vm1402_vm11, %v8980_v48, %v4857_v63  ;;  %v7716_v48 = vld [vmem:[#allocation3 + $0xc] sm:$0xff]   ;;  %v5319_v63 = vrot.slane %v5317_v59, 1 }
 0x383   : > { %v4367_v39 = vrot.slane %v7716_v48, 1  ;;  %v7609_v59 = vld [vmem:[%s9939_s2 + $0x100] sm:$0xff]  }
 0x384   : > { %v5320_v32 = vor.u32 %v5319_v63, %v5315_v5  ;;  %v4380_v5 = vrot.slane %v9042_v0, 1  ;;  %v7610_v63 = vld [vmem:[%s9939_s2 + $0x108] sm:$0xff]  }
 0x385   : > { %5768 = vmatmul.mubr.bf16.gmra.mrb[56].mxu1 %v4951_v41  ;;  %v4333_v4 = vpop.permute.xlu0 %4332  ;;  %v4369_v46 = vsel %vm1353_vm10, %v4367_v39, %v4368_v10  ;;  %v5324_v41 = vrot.slane %v5322_v24, 1  ;;  %v7719_v39 = vld [vmem:[#allocation3 + $0x30] sm:$0xff]  }
 0x386   : > { %7028 = vmatprep.mubr.msk.bf16.mxu1 %vm1402_vm11, %v4907_v42  ;;  %v4413_v25 = vsel %vm1402_vm11, %v7714_v44, %v4333_v4  ;;  %v4372_v42 = vsel %vm1353_vm10, %v4370_v21, %v4371_v11  ;;  %v7604_v44 = vld [vmem:[%s9939_s2 + $0xd8] sm:$0xff]   ;;  %v4376_v10 = vrot.slane %v7719_v39, 1 }
 0x387   : > { %v5325_v62 = vsel %vm1128_vm9, %v5320_v32, %v5324_v41  ;;  %v7608_v21 = vld [vmem:[%s9939_s2 + $0xf8] sm:$0xff]   ;;  %v7723_v41 = vld [vmem:[#allocation3 + $0x48] sm:$0xff]  }
 0x388   : > { %5356 = vrot.lane.b32.xlu1 %v5325_v62, %s7800_s6  ;;  %v7722_v11 = vld [vmem:[#allocation3 + $0x3c] sm:$0xff]  }
 0x389   : > { %v4337_v47 = vpop.permute.xlu0 %4336  ;;  %v7611_v62 = vld [vmem:[%s9939_s2 + $0x110] sm:$0xff]  }
 0x38a   : > { %v4859_v29 = vpop.permute.xlu1 %4858  ;;  %v4419_v4 = vsel %vm1402_vm11, %v7717_v38, %v4337_v47 }
 0x38b   : > { %v4954_v1 = vsel %vm1402_vm11, %v9015_v23, %v4859_v29  ;;  %v7602_v23 = vld [vmem:[%s9939_s2 + $0xc8] sm:$0xff]   ;;  %v4373_v29 = vrot.slane %v9004_v15, 1 }
 0x38c   : > { %v7606_v15 = vld [vmem:[%s9939_s2 + $0xe8] sm:$0xff]  }
 0x38d   : > { %5776 = vmatmul.mubr.bf16.gmra.mrb[60].mxu1 %v4954_v1  ;;  %v7605_v1 = vld [vmem:[%s9939_s2 + $0xe0] sm:$0xff]   ;;  %v4341_v43 = vpop.permute.xlu0 %4340 }
 0x38e   : > { %7041 = vmatprep.mubr.msk.bf16.mxu1 %vm1402_vm11, %v4366_v49  ;;  %v4335_v55 = vpop.permute.xlu1 %4334  ;;  %v4374_v49 = vrot.slane %v9007_v19, 1  ;;  %v4425_v24 = vsel %vm1402_vm11, %v7719_v39, %v4341_v43 }
 0x38f   : > { %v4416_v30 = vsel %vm1402_vm11, %v7716_v48, %v4335_v55 }
 0x390   : > { %v4375_v48 = vsel %vm1353_vm10, %v4373_v29, %v4374_v49  ;;  %v7612_v49 = vld [vmem:[%s9939_s2 + $0x118] sm:$0xff]  }
 0x392   : > { %v4339_v19 = vpop.permute.xlu1 %4338 }
 0x395   : > { %5937 = vmatmul.mubr.bf16.vlgmr.msra.gmra.mrb[64].mxu1 %v4413_v25  ;;  %v7720_v25 = vld [vmem:[#allocation3 + $0x38] ss:$0 sps:$4 sm:$0x11]  }
 0x396   : > { %6211 = vmatpush1.bf16.msra.mxu1 %v7601_v12  ;;  %7042 = vmatprep.mubr.msk.bf16.mxu1 %vm1402_vm11, %v4369_v46  ;;  %v4377_v12 = vrot.slane %v7720_v25, 1  ;;  %v7607_v46 = vld [vmem:[%s9939_s2 + $0xf0] sm:$0xff]   ;;  %v4343_v0 = vpop.permute.xlu1 %4342 }
 0x397   : > { %6212 = vmatprep.subr.bf16.mxu1 %v9976_v37  ;;  %v4428_v47 = vsel %vm1402_vm11, %v7722_v11, %v4343_v0  ;;  %v4397_v0 = vrot.slane %v9091_v6, 1 }
 0x398   : > { %v4378_v38 = vsel %vm1353_vm10, %v4376_v10, %v4377_v12  ;;  %v7725_v10 = vld [vmem:[#allocation3 + $0x60] sm:$0xff]   ;;  %v7726_v12 = vld [vmem:[#allocation3 + $0x68] ss:$0 sps:$4 sm:$0x11]  }
 0x399   : > { %v4388_v25 = vrot.slane %v7725_v10, 1 }
 0x39a   : > { %6213 = vmatpush1.bf16.msra.mxu1 %v7602_v23  ;;  %v7721_v23 = vld [vmem:[#allocation3 + $0x24] sm:$0xff]   ;;  %v4347_v39 = vpop.permute.xlu1 %4346 }
 0x39b   : > { %6214 = vmatprep.subr.bf16.mxu1 %v9976_v37  ;;  %v4422_v55 = vsel %vm1402_vm11, %v7721_v23, %v4339_v19  ;;  %v7727_v23 = vld [vmem:[#allocation3 + $0x54] sm:$0xff]  }
 0x39d   : > { %5945 = vmatmul.mubr.bf16.gmra.mrb[68].mxu1 %v4416_v30 }
 0x39e   : > { %7043 = vmatprep.mubr.msk.bf16.mxu1 %vm1402_vm11, %v4372_v42  ;;  %6215 = vmatpush1.bf16.msra.mxu1 %v7603_v53  ;;  %v4379_v53 = vrot.slane %v7722_v11, 1  ;;  %v4382_v42 = vrot.slane %v7723_v41, 1  ;;  %v4351_v11 = vpop.permute.xlu1 %4350 }
 0x39f   : > { %6216 = vmatprep.subr.bf16.mxu1 %v9976_v37 }
 0x3a0   : > { %v4381_v30 = vsel %vm1353_vm10, %v4379_v53, %v4380_v5  ;;  %v7728_v53 = vld [vmem:[#allocation3 + $0x78] sm:$0xff]  }
 0x3a1   : > { %v4394_v5 = vrot.slane %v7728_v53, 1 }
 0x3a2   : > { %6217 = vmatpush1.bf16.msra.mxu1 %v7604_v44  ;;  %v7724_v44 = vld [vmem:[#allocation3 + $0x50] ss:$0 sps:$4 sm:$0x11]  }
 0x3a3   : > { %6218 = vmatprep.subr.bf16.mxu1 %v9976_v37  ;;  %v4383_v32 = vrot.slane %v7724_v44, 1 }
 0x3a5   : > { %5953 = vmatmul.mubr.bf16.gmra.mrb[72].mxu1 %v4419_v4  ;;  %v4384_v29 = vsel %vm1353_vm10, %v4382_v42, %v4383_v32  ;;  %v4385_v4 = vrot.slane %v9047_v56, 1 }
 0x3a6   : > { %7044 = vmatprep.mubr.msk.bf16.mxu1 %vm1402_vm11, %v4375_v48  ;;  %6219 = vmatpush1.bf16.msra.mxu1 %v7605_v1  ;;  %v4345_v1 = vpop.permute.xlu0 %4344  ;;  %v4386_v48 = vrot.slane %v9071_v33, 1 }
 0x3a7   : > { %6220 = vmatprep.subr.bf16.mxu1 %v9976_v37 }
 0x3a8   : > { %v4387_v19 = vsel %vm1353_vm10, %v4385_v4, %v4386_v48 }
 0x3aa   : > { %6221 = vmatpush1.bf16.msra.mxu1 %v7606_v15  ;;  %v4431_v15 = vsel %vm1402_vm11, %v7723_v41, %v4345_v1  ;;  %v4349_v33 = vpop.permute.xlu0 %4348  ;;  %v4398_v41 = vrot.slane %v9113_v14, 1 }
 0x3ab   : > { %6222 = vmatprep.subr.bf16.mxu1 %v9976_v37 }
 0x3ac   : > { %v4399_v44 = vsel %vm1353_vm10, %v4397_v0, %v4398_v41 }
 0x3ad   : > { %5961 = vmatmul.mubr.bf16.gmra.mrb[76].mxu1 %v4422_v55  ;;  %v4391_v55 = vrot.slane %v9061_v22, 1 }
 0x3ae   : > { %7045 = vmatprep.mubr.msk.bf16.mxu1 %vm1402_vm11, %v4378_v38  ;;  %6223 = vmatpush1.bf16.msra.mxu1 %v7607_v46  ;;  %v4389_v46 = vrot.slane %v7726_v12, 1  ;;  %v4392_v38 = vrot.slane %v9084_v28, 1  ;;  %v4353_v28 = vpop.permute.xlu0 %4352 }
 0x3af   : > { %6224 = vmatprep.subr.bf16.mxu1 %v9976_v37  ;;  %v4443_v42 = vsel %vm1402_vm11, %v7728_v53, %v4353_v28 }
 0x3b0   : > { %v4390_v56 = vsel %vm1353_vm10, %v4388_v25, %v4389_v46  ;;  %v4393_v43 = vsel %vm1353_vm10, %v4391_v55, %v4392_v38  ;;  %v4404_v25 = vrot.slane %v9140_v26, 1  ;;  %v4407_v55 = vrot.slane %v9126_v35, 1 }
 0x3b2   : > { %6225 = vmatpush1.bf16.msra.mxu1 %v7608_v21  ;;  %v4437_v21 = vsel %vm1402_vm11, %v7725_v10, %v4349_v33  ;;  %v4403_v10 = vrot.slane %v9106_v27, 1  ;;  %v4406_v33 = vrot.slane %v9089_v40, 1  ;;  %v4410_v40 = vrot.slane %v9166_v2, 1 }
 0x3b3   : > { %6226 = vmatprep.subr.bf16.mxu1 %v9976_v37 }
 0x3b5   : > { %5969 = vmatmul.mubr.bf16.gmra.mrb[80].mxu1 %v4425_v24 }
 0x3b6   : > { %7046 = vmatprep.mubr.msk.bf16.mxu1 %vm1402_vm11, %v4381_v30  ;;  %6227 = vmatpush1.bf16.msra.mxu1 %v7609_v59  ;;  %v7729_v59 = vld [vmem:[#allocation3 + $0x80] ss:$0 sps:$4 sm:$0x11]   ;;  %v4440_v30 = vsel %vm1402_vm11, %v9061_v22, %v4351_v11  ;;  %v4355_v22 = vpop.permute.xlu1 %4354 }
 0x3b7   : > { %6228 = vmatprep.subr.bf16.mxu1 %v9976_v37  ;;  %v4395_v24 = vrot.slane %v7729_v59, 1  ;;  %v4446_v14 = vsel %vm1402_vm11, %v9091_v6, %v4355_v22  ;;  %v4405_v6 = vsel %vm1353_vm10, %v4403_v10, %v4404_v25  ;;  %v4409_v59 = vrot.slane %v9147_v45, 1 }
 0x3b8   : > { %v5359_v22 = vrot.slane %v9121_v20, 1 }
 0x3ba   : > { %6229 = vmatpush1.bf16.msra.mxu1 %v7610_v63  ;;  %v4396_v63 = vsel %vm1353_vm10, %v4394_v5, %v4395_v24 }
 0x3bb   : > { %6230 = vmatprep.subr.bf16.mxu1 %v9976_v37 }
 0x3bd   : > { %5977 = vmatmul.mubr.bf16.gmra.mrb[84].mxu1 %v4428_v47  ;;  %v7730_v47 = vld [vmem:[#allocation3 + $0x90] sm:$0xff]  }
 0x3be   : > { %7047 = vmatprep.mubr.msk.bf16.mxu1 %vm1402_vm11, %v4384_v29  ;;  %6231 = vmatpush1.bf16.msra.mxu1 %v7611_v62  ;;  %v4400_v29 = vrot.slane %v7730_v47, 1 }
 0x3bf   : > { %6232 = vmatprep.subr.bf16.mxu1 %v9976_v37  ;;  %v4434_v37 = vsel %vm1402_vm11, %v7727_v23, %v4347_v39 }
 0x3c2   : > { %6233 = vmatpush1.bf16.msra.mxu1 %v7612_v49  ;;  %v4401_v49 = vrot.slane %v9082_v51, 1 }
 0x3c4   : > { %v4402_v48 = vsel %vm1353_vm10, %v4400_v29, %v4401_v49 }
 0x3c5   : > { %5985 = vmatmul.mubr.bf16.gmra.mrb[88].mxu1 %v4431_v15 }
 0x3c6   : > { %7048 = vmatprep.mubr.msk.bf16.mxu1 %vm1402_vm11, %v4387_v19  ;;  %v4357_v19 = vpop.permute.xlu0 %4356 }
 0x3c7   : > { %v4449_v46 = vsel %vm1402_vm11, %v7730_v47, %v4357_v19  ;;  %v5362_v19 = vrot.slane %v9196_v52, 1 }
 0x3ca   : > { %v4361_v53 = vpop.permute.xlu0 %4360 }
 0x3cd   : > { %5993 = vmatmul.mubr.bf16.gmra.mrb[92].mxu1 %v4434_v37  ;;  %v4359_v37 = vpop.permute.xlu1 %4358 }
 0x3ce   : > { %7049 = vmatprep.mubr.msk.bf16.mxu1 %vm1402_vm11, %v4390_v56 }
 0x3d1   : > { %v4363_v0 = vpop.permute.xlu1 %4362 }
 0x3d2   : > { %v4458_v47 = vsel %vm1402_vm11, %v9147_v45, %v4363_v0 }
 0x3d5   : > { %6001 = vmatmul.mubr.bf16.gmra.mrb[96].mxu1 %v4437_v21  ;;  %v4452_v21 = vsel %vm1402_vm11, %v9106_v27, %v4359_v37  ;;  %v4411_v27 = vsel %vm1353_vm10, %v4409_v59, %v4410_v40  ;;  %v5365_v37 = vrot.slane %v9163_v61, 1  ;;  %v7733_v59 = vld [vmem:[#allocation3 + $0x30] sm:$0xff]  }
 0x3d6   : > { %7050 = vmatprep.mubr.msk.bf16.mxu1 %vm1402_vm11, %v4393_v43  ;;  %v4408_v43 = vsel %vm1353_vm10, %v4406_v33, %v4407_v55 }
 0x3dd   : > { %6009 = vmatmul.mubr.bf16.gmra.mrb[100].mxu1 %v4440_v30  ;;  %v7731_v30 = vld [vmem:[#allocation3 + $0xa8] sm:$0xff]  }
 0x3de   : > { %7051 = vmatprep.mubr.msk.bf16.mxu1 %vm1402_vm11, %v4396_v63  ;;  %v4455_v63 = vsel %vm1402_vm11, %v7731_v30, %v4361_v53  ;;  %v5367_v53 = vrot.slane %v9183_v54, 1 }
 0x3e5   : > { %6017 = vmatmul.mubr.bf16.gmra.mrb[104].mxu1 %v4443_v42  ;;  %v7732_v42 = vld [vmem:[#allocation3 + $0x18] sm:$0xff]  }
 0x3e6   : > { %7052 = vmatprep.mubr.msk.bf16.mxu1 %vm1402_vm11, %v4399_v44  ;;  %v5358_v44 = vrot.slane %v7732_v42, 1 }
 0x3e8   : > { %v9478_v32 = vpop.f32.mrb[0].mxu1  ;;  %v5360_v29 = vsel %vm1353_vm10, %v5358_v44, %v5359_v22 }
 0x3e9   : > { %v5659_v62 = vpop.f32.mrb[1].mxu1 }
 0x3ea   : > { %v9481_v1 = vpop.f32.mrb[2].mxu1 }
 0x3eb   : > { %v5662_v4 = vpop.f32.mrb[3].mxu1 }
 0x3ec   : > { %v5327_v4 = vpop.permute.xlu0 %5326 }
 0x3ed   : > { %6025 = vmatmul.mubr.bf16.gmra.mrb[108].mxu1 %v4446_v14  ;;  %v5407_v10 = vsel %vm1402_vm11, %v7732_v42, %v5327_v4  ;;  %v5373_v4 = vrot.slane %v9207_v9, 1 }
 0x3ee   : > { %7053 = vmatprep.mubr.msk.bf16.mxu1 %vm1402_vm11, %v4402_v48  ;;  %v5361_v48 = vrot.slane %v9149_v50, 1 }
 0x3f0   : > { %v9487_v15 = vpop.f32.mrb[4].mxu1  ;;  %v5363_v45 = vsel %vm1353_vm10, %v5361_v48, %v5362_v19 }
 0x3f1   : > { %v5667_v39 = vpop.f32.mrb[5].mxu1 }
 0x3f2   : > { %v9491_v51 = vpop.f32.mrb[6].mxu1 }
 0x3f3   : > { %v5670_v12 = vpop.f32.mrb[7].mxu1 }
 0x3f4   : > { %v5329_v12 = vpop.permute.xlu1 %5328 }
 0x3f5   : > { %6033 = vmatmul.mubr.bf16.gmra.mrb[112].mxu1 %v4449_v46  ;;  %v5410_v33 = vsel %vm1402_vm11, %v9149_v50, %v5329_v12 }
 0x3f6   : > { %7054 = vmatprep.mubr.msk.bf16.mxu1 %vm1402_vm11, %v4405_v6  ;;  %v5364_v6 = vrot.slane %v9131_v36, 1  ;;  %v5368_v36 = vrot.slane %v9225_v8, 1 }
 0x3f8   : > { %v9496_v23 = vpop.f32.mrb[8].mxu1  ;;  %v5366_v55 = vsel %vm1353_vm10, %v5364_v6, %v5365_v37  ;;  %v5369_v50 = vsel %vm1353_vm10, %v5367_v53, %v5368_v36  ;;  %v5333_v30 = vpop.permute.xlu1 %5332  ;;  %v9983_v37 = vld [vmem:[#allocation9_spill] sm:$0xff] }
 0x3f9   : > { %v5675_v56 = vpop.f32.mrb[9].mxu1  ;;  %v5416_v44 = vsel %vm1402_vm11, %v9183_v54, %v5333_v30 }
 0x3fa   : > { %v9500_v38 = vpop.f32.mrb[10].mxu1 }
 0x3fb   : > { %v5678_v26 = vpop.f32.mrb[11].mxu1 }
 0x3fd   : > { %6041 = vmatmul.mubr.bf16.gmra.mrb[116].mxu1 %v4452_v21  ;;  %v5331_v21 = vpop.permute.xlu0 %5330 }
 0x3fe   : > { %7055 = vmatprep.mubr.msk.bf16.mxu1 %vm1402_vm11, %v4408_v43  ;;  %v5413_v40 = vsel %vm1402_vm11, %v7733_v59, %v5331_v21  ;;  %v5379_v59 = vrot.slane %v9232_v31, 1 }
 0x400   : > { %v9506_v11 = vpop.f32.mrb[12].mxu1 }
 0x401   : > { %v5683_v5 = vpop.f32.mrb[13].mxu1 }
 0x402   : > { %v9510_v35 = vpop.f32.mrb[14].mxu1 }
 0x403   : > { %v5686_v24 = vpop.f32.mrb[15].mxu1 }
 0x405   : > { %6049 = vmatmul.mubr.bf16.gmra.mrb[120].mxu1 %v4455_v63 }
 0x406   : > { %7056 = vmatprep.mubr.msk.bf16.mxu1 %vm1402_vm11, %v4411_v27  ;;  %v7734_v27 = vld [vmem:[#allocation3 + $0x48] sm:$0xff]  }
 0x407   : > { %v5370_v0 = vrot.slane %v7734_v27, 1 }
 0x408   : > { %v9515_v28 = vpop.f32.mrb[16].mxu1 }
 0x409   : > { %v5691_v41 = vpop.f32.mrb[17].mxu1 }
 0x40a   : > { %v9518_v2 = vpop.f32.mrb[18].mxu1  ;;  %v5371_v41 = vrot.slane %v9174_v16, 1 }
 0x40b   : > { %v5694_v62 = vpop.f32.mrb[19].mxu1 }
 0x40c   : > { %v5372_v22 = vsel %vm1353_vm10, %v5370_v0, %v5371_v41 }
 0x40d   : > { %6057 = vmatmul.mubr.bf16.gmra.mrb[124].mxu1 %v4458_v47  ;;  %v5335_v47 = vpop.permute.xlu0 %5334 }
 0x40e   : > { %7093 = vmatprep.mubr.msk.bf16.mxu1 %vm1402_vm11, %v5360_v29 }
 0x410   : > { %v9524_v49 = vpop.f32.mrb[20].mxu1 }
 0x411   : > { %v5699_v14 = vpop.f32.mrb[21].mxu1  ;;  %v5339_v36 = vpop.permute.xlu0 %5338 }
 0x412   : > { %v9528_v20 = vpop.f32.mrb[22].mxu1  ;;  %v9981_v14 = vld [vmem:[#allocation12_spill] sm:$0xff] }
 0x413   : > { %v5702_v39 = vpop.f32.mrb[23].mxu1  ;;  %v5374_v48 = vrot.slane %v9981_v14, 1 }
 0x414   : > { %v5419_v39 = vsel %vm1402_vm11, %v7734_v27, %v5335_v47 }
 0x415   : > { %6243 = vmatmul.mubr.bf16.vlgmr.msra.gmra.mrb[128].mxu1 %v5407_v10  ;;  %v5375_v54 = vsel %vm1353_vm10, %v5373_v4, %v5374_v48 }
 0x416   : > { %7094 = vmatprep.mubr.msk.bf16.mxu1 %vm1402_vm11, %v5363_v45  ;;  %v5337_v45 = vpop.permute.xlu1 %5336 }
 0x417   : > { %v5422_v21 = vsel %vm1402_vm11, %v9207_v9, %v5337_v45 }
 0x418   : > { %v9533_v25 = vpop.f32.mrb[24].mxu1 }
 0x419   : > { %v5707_v46 = vpop.f32.mrb[25].mxu1 }
 0x41a   : > { %v9537_v56 = vpop.f32.mrb[26].mxu1  ;;  %v9982_v46 = vld [vmem:[#allocation7_spill] sm:$0xff]  ;;  %v5341_v0 = vpop.permute.xlu1 %5340 }
 0x41b   : > { %v5710_v52 = vpop.f32.mrb[27].mxu1  ;;  %v5376_v6 = vrot.slane %v9982_v46, 1  ;;  %v5428_v4 = vsel %vm1402_vm11, %v9232_v31, %v5341_v0 }
 0x41c   : > { %v5377_v52 = vrot.slane %v9983_v37, 1 }
 0x41d   : > { %6251 = vmatmul.mubr.bf16.gmra.mrb[132].mxu1 %v5410_v33 }
 0x41e   : > { %7095 = vmatprep.mubr.msk.bf16.mxu1 %vm1402_vm11, %v5366_v55 }
 0x420   : > { %v9543_v26 = vpop.f32.mrb[28].mxu1 }
 0x421   : > { %v5715_v43 = vpop.f32.mrb[29].mxu1 }
 0x422   : > { %v9547_v61 = vpop.f32.mrb[30].mxu1  ;;  %v5378_v43 = vsel %vm1353_vm10, %v5376_v6, %v5377_v52 }
 0x423   : > { %v5718_v5 = vpop.f32.mrb[31].mxu1 }
 0x425   : > { %6259 = vmatmul.mubr.bf16.gmra.mrb[136].mxu1 %v5413_v40  ;;  %v5380_v40 = vrot.slane %v9277_v13, 1 }
 0x426   : > { %7096 = vmatprep.mubr.msk.bf16.mxu1 %vm1402_vm11, %v5369_v50 }
 0x427   : > { %v5381_v9 = vsel %vm1353_vm10, %v5379_v59, %v5380_v40  ;;  %v9989_v59 = vld [vmem:[#allocation15_spill] sm:$0xff] }
 0x428   : > { %v9552_v24 = vpop.f32.mrb[32].mxu1  ;;  %v5389_v40 = vrot.slane %v9989_v59, 1 }
 0x429   : > { %v5723_v63 = vpop.f32.mrb[33].mxu1 }
 0x42a   : > { %v9555_v8 = vpop.f32.mrb[34].mxu1  ;;  %v5425_v63 = vsel %vm1402_vm11, %v9982_v46, %v5339_v36  ;;  %v9988_v36 = vld [vmem:[#allocation10_spill] sm:$0xff] }
 0x42b   : > { %v5726_v42 = vpop.f32.mrb[35].mxu1 }
 0x42c   : > { %v9984_v42 = vld [vmem:[#allocation8_spill] sm:$0xff] }
 0x42d   : > { %6267 = vmatmul.mubr.bf16.gmra.mrb[140].mxu1 %v5416_v44  ;;  %v5382_v44 = vrot.slane %v9984_v42, 1 }
 0x42e   : > { %7097 = vmatprep.mubr.msk.bf16.mxu1 %vm1402_vm11, %v5372_v22  ;;  %v9985_v22 = vld [vmem:[#allocation11_spill] sm:$0xff] }
 0x42f   : > { %v5383_v47 = vrot.slane %v9985_v22, 1  ;;  %v5391_v22 = vrot.slane %v9292_v18, 1 }
 0x430   : > { %v9561_v62 = vpop.f32.mrb[36].mxu1 }
 0x431   : > { %v5731_v29 = vpop.f32.mrb[37].mxu1  ;;  %v5384_v14 = vsel %vm1353_vm10, %v5382_v44, %v5383_v47  ;;  %v5392_v47 = vrot.slane %v9320_v7, 1  ;;  %v9991_v7 = vld [vmem:[#allocation16_spill] sm:$0xff] }
 0x432   : > { %v9565_v16 = vpop.f32.mrb[38].mxu1 }
 0x433   : > { %v5734_v19 = vpop.f32.mrb[39].mxu1 }
 0x434   : > { %v5343_v19 = vpop.permute.xlu0 %5342 }
 0x435   : > { %6275 = vmatmul.mubr.bf16.gmra.mrb[144].mxu1 %v5419_v39  ;;  %v5431_v52 = vsel %vm1402_vm11, %v9984_v42, %v5343_v19  ;;  %v5393_v19 = vsel %vm1353_vm10, %v5391_v22, %v5392_v47 }
 0x436   : > { %7098 = vmatprep.mubr.msk.bf16.mxu1 %vm1402_vm11, %v5375_v54  ;;  %v9986_v54 = vld [vmem:[#allocation14_spill] sm:$0xff] }
 0x437   : > { %v5385_v45 = vrot.slane %v9986_v54, 1 }
 0x438   : > { %v9570_v10 = vpop.f32.mrb[40].mxu1  ;;  %v5347_v42 = vpop.permute.xlu0 %5346 }
 0x439   : > { %v5739_v12 = vpop.f32.mrb[41].mxu1 }
 0x43a   : > { %v9574_v33 = vpop.f32.mrb[42].mxu1  ;;  %v9987_v12 = vld [vmem:[#allocation17_spill] sm:$0xff] }
 0x43b   : > { %v5742_v55 = vpop.f32.mrb[43].mxu1  ;;  %v5386_v46 = vrot.slane %v9987_v12, 1 }
 0x43c   : > { %v5351_v59 = vpop.permute.xlu0 %5350 }
 0x43d   : > { %6283 = vmatmul.mubr.bf16.gmra.mrb[148].mxu1 %v5422_v21  ;;  %v5387_v31 = vsel %vm1353_vm10, %v5385_v45, %v5386_v46  ;;  %v5345_v21 = vpop.permute.xlu1 %5344  ;;  %v9990_v46 = vld [vmem:[#allocation13_spill] sm:$0xff] }
 0x43e   : > { %7099 = vmatprep.mubr.msk.bf16.mxu1 %vm1402_vm11, %v5378_v43 }
 0x440   : > { %v9580_v53 = vpop.f32.mrb[44].mxu1 }
 0x441   : > { %v5747_v5 = vpop.f32.mrb[45].mxu1 }
 0x442   : > { %v9584_v50 = vpop.f32.mrb[46].mxu1  ;;  %v5388_v5 = vrot.slane %v9988_v36, 1 }
 0x443   : > { %v5750_v30 = vpop.f32.mrb[47].mxu1 }
 0x444   : > { %v5390_v0 = vsel %vm1353_vm10, %v5388_v5, %v5389_v40 }
 0x445   : > { %6291 = vmatmul.mubr.bf16.gmra.mrb[152].mxu1 %v5425_v63 }
 0x446   : > { %7100 = vmatprep.mubr.msk.bf16.mxu1 %vm1402_vm11, %v5381_v9  ;;  %v5434_v9 = vsel %vm1402_vm11, %v9986_v54, %v5345_v21  ;;  %v5349_v54 = vpop.permute.xlu1 %5348 }
 0x448   : > { %v9590_v27 = vpop.f32.mrb[48].mxu1 }
 0x449   : > { %v5755_v41 = vpop.f32.mrb[49].mxu1 }
 0x44a   : > { %v9594_v13 = vpop.f32.mrb[50].mxu1  ;;  %v5353_v47 = vpop.permute.xlu1 %5352 }
 0x44b   : > { %v5758_v29 = vpop.f32.mrb[51].mxu1 }
 0x44d   : > { %6299 = vmatmul.mubr.bf16.gmra.mrb[156].mxu1 %v5428_v4 }
 0x44e   : > { %7101 = vmatprep.mubr.msk.bf16.mxu1 %vm1402_vm11, %v5384_v14  ;;  %v5437_v14 = vsel %vm1402_vm11, %v9988_v36, %v5347_v42  ;;  %v5440_v36 = vsel %vm1402_vm11, %v9292_v18, %v5349_v54 }
 0x450   : > { %v9600_v48 = vpop.f32.mrb[52].mxu1 }
 0x451   : > { %v5763_v39 = vpop.f32.mrb[53].mxu1 }
 0x452   : > { %v9604_v6 = vpop.f32.mrb[54].mxu1 }
 0x453   : > { %v5766_v37 = vpop.f32.mrb[55].mxu1 }
 0x454   : > { %v5394_v37 = vrot.slane %v9990_v46, 1 }
 0x455   : > { %6307 = vmatmul.mubr.bf16.gmra.mrb[160].mxu1 %v5431_v52  ;;  %v5395_v52 = vrot.slane %v9991_v7, 1 }
 0x456   : > { %7102 = vmatprep.mubr.msk.bf16.mxu1 %vm1402_vm11, %v5387_v31 }
 0x457   : > { %v5396_v5 = vsel %vm1353_vm10, %v5394_v37, %v5395_v52  ;;  %v5404_v37 = vrot.slane %v9391_v57, 1  ;;  %v5355_v52 = vpop.permute.xlu0 %5354  ;;  %v5357_v57 = vpop.permute.xlu1 %5356 }
 0x458   : > { %v9610_v55 = vpop.f32.mrb[56].mxu1 }
 0x459   : > { %v5771_v43 = vpop.f32.mrb[57].mxu1 }
 0x45a   : > { %v9614_v30 = vpop.f32.mrb[58].mxu1 }
 0x45b   : > { %v5774_v63 = vpop.f32.mrb[59].mxu1 }
 0x45d   : > { %6315 = vmatmul.mubr.bf16.gmra.mrb[164].mxu1 %v5434_v9  ;;  %v5397_v9 = vrot.slane %v9310_v3, 1 }
 0x45e   : > { %7103 = vmatprep.mubr.msk.bf16.mxu1 %vm1402_vm11, %v5390_v0 }
 0x460   : > { %v9620_v41 = vpop.f32.mrb[60].mxu1 }
 0x461   : > { %v5779_v44 = vpop.f32.mrb[61].mxu1 }
 0x462   : > { %v9624_v29 = vpop.f32.mrb[62].mxu1  ;;  %v5443_v44 = vsel %vm1402_vm11, %v9990_v46, %v5351_v59 }
 0x463   : > { %v5782_v4 = vpop.f32.mrb[63].mxu1 }
 0x465   : > { %6323 = vmatmul.mubr.bf16.gmra.mrb[168].mxu1 %v5437_v14 }
 0x466   : > { %7104 = vmatprep.mubr.msk.bf16.mxu1 %vm1402_vm11, %v5393_v19 }
 0x468   : > { %v5938_v39 = vpop.f32.mrb[64].mxu1 }
 0x469   : > { %v9631_v45 = vadd.f32 %v5938_v39, %v9478_v32  ;;  %v5940_v12 = vpop.f32.mrb[65].mxu1 }
 0x46a   : > { %v5941_v31 = vpop.f32.mrb[66].mxu1  ;;  %v5446_v12 = vsel %vm1402_vm11, %v9310_v3, %v5353_v47 }
 0x46b   : > { %v9636_v21 = vadd.f32 %v5941_v31, %v9481_v1  ;;  %v5943_v43 = vpop.f32.mrb[67].mxu1  ;;  %v5398_v1 = vrot.slane %v9331_v34, 1  ;;  %v5400_v34 = vrot.slane %v9279_v17, 1 }
 0x46d   : > { %6331 = vmatmul.mubr.bf16.gmra.mrb[172].mxu1 %v5440_v36  ;;  %v5399_v22 = vsel %vm1353_vm10, %v5397_v9, %v5398_v1 }
 0x46e   : > { %7105 = vmatprep.mubr.msk.bf16.mxu1 %vm1402_vm11, %v5396_v5  ;;  %v5449_v5 = vsel %vm1402_vm11, %v9279_v17, %v5355_v52 }
 0x470   : > { %v5946_v32 = vpop.f32.mrb[68].mxu1 }
 0x471   : > { %v9643_v40 = vadd.f32 %v5946_v32, %v9487_v15  ;;  %v5948_v63 = vpop.f32.mrb[69].mxu1 }
 0x472   : > { %v5949_v0 = vpop.f32.mrb[70].mxu1 }
 0x473   : > { %v9648_v42 = vadd.f32 %v5949_v0, %v9491_v51  ;;  %v5951_v18 = vpop.f32.mrb[71].mxu1  ;;  %v5401_v51 = vrot.slane %v9315_v60, 1 }
 0x475   : > { %6339 = vmatmul.mubr.bf16.gmra.mrb[176].mxu1 %v5443_v44  ;;  %v5402_v46 = vsel %vm1353_vm10, %v5400_v34, %v5401_v51 }
 0x476   : > { %7106 = vmatprep.mubr.msk.bf16.mxu1 %vm1402_vm11, %v5399_v22 }
 0x478   : > { %v5954_v15 = vpop.f32.mrb[72].mxu1 }
 0x479   : > { %v9655_v4 = vadd.f32 %v5954_v15, %v9496_v23  ;;  %v5956_v14 = vpop.f32.mrb[73].mxu1  ;;  %v5403_v23 = vrot.slane %v9389_v58, 1 }
 0x47a   : > { %v5957_v19 = vpop.f32.mrb[74].mxu1 }
 0x47b   : > { %v9660_v39 = vadd.f32 %v5957_v19, %v9500_v38  ;;  %v5959_v54 = vpop.f32.mrb[75].mxu1  ;;  %v5405_v36 = vsel %vm1353_vm10, %v5403_v23, %v5404_v37 }
 0x47d   : > { %6347 = vmatmul.mubr.bf16.gmra.mrb[180].mxu1 %v5446_v12 }
 0x47e   : > { %7107 = vmatprep.mubr.msk.bf16.mxu1 %vm1402_vm11, %v5402_v46 }
 0x480   : > { %v5962_v7 = vpop.f32.mrb[76].mxu1 }
 0x481   : > { %v9669_v60 = vadd.f32 %v5962_v7, %v9506_v11  ;;  %v5964_v38 = vpop.f32.mrb[77].mxu1 }
 0x482   : > { %v5965_v31 = vpop.f32.mrb[78].mxu1 }
 0x483   : > { %v9672_v43 = vadd.f32 %v5965_v31, %v9510_v35  ;;  %v5967_v3 = vpop.f32.mrb[79].mxu1  ;;  %v5452_v35 = vsel %vm1402_vm11, %v9389_v58, %v5357_v57 }
 0x485   : > { %6355 = vmatmul.mubr.bf16.gmra.mrb[184].mxu1 %v5449_v5 }
 0x486   : > { %7108 = vmatprep.mubr.msk.bf16.mxu1 %vm1402_vm11, %v5405_v36 }
 0x488   : > { %v5970_v32 = vpop.f32.mrb[80].mxu1 }
 0x489   : > { %v9679_v59 = vadd.f32 %v5970_v32, %v9515_v28  ;;  %v5972_v11 = vpop.f32.mrb[81].mxu1 }
 0x48a   : > { %v5973_v63 = vpop.f32.mrb[82].mxu1 }
 0x48b   : > { %v9684_v9 = vadd.f32 %v5973_v63, %v9518_v2  ;;  %v5975_v1 = vpop.f32.mrb[83].mxu1 }
 0x48d   : > { %6363 = vmatmul.mubr.bf16.gmra.mrb[188].mxu1 %v5452_v35 }
 0x490   : > { %v5978_v0 = vpop.f32.mrb[84].mxu1 }
 0x491   : > { %v9687_v17 = vadd.f32 %v5978_v0, %v9524_v49  ;;  %v5980_v18 = vpop.f32.mrb[85].mxu1 }
 0x492   : > { %v5981_v44 = vpop.f32.mrb[86].mxu1 }
 0x493   : > { %v9690_v22 = vadd.f32 %v5981_v44, %v9528_v20  ;;  %v5983_v28 = vpop.f32.mrb[87].mxu1 }
 0x498   : > { %v5986_v15 = vpop.f32.mrb[88].mxu1 }
 0x499   : > { %v9693_v47 = vadd.f32 %v5986_v15, %v9533_v25  ;;  %v5988_v58 = vpop.f32.mrb[89].mxu1 }
 0x49a   : > { %v5989_v14 = vpop.f32.mrb[90].mxu1 }
 0x49b   : > { %v9696_v2 = vadd.f32 %v5989_v14, %v9537_v56  ;;  %v5991_v34 = vpop.f32.mrb[91].mxu1 }
 0x4a0   : > { %v5994_v51 = vpop.f32.mrb[92].mxu1 }
 0x4a1   : > { %v9699_v49 = vadd.f32 %v5994_v51, %v9543_v26  ;;  %v5996_v19 = vpop.f32.mrb[93].mxu1 }
 0x4a2   : > { %v5997_v54 = vpop.f32.mrb[94].mxu1 }
 0x4a3   : > { %v9702_v20 = vadd.f32 %v5997_v54, %v9547_v61  ;;  %v5999_v12 = vpop.f32.mrb[95].mxu1 }
 0x4a8   : > { %v6002_v46 = vpop.f32.mrb[96].mxu1 }
 0x4a9   : > { %v9705_v25 = vadd.f32 %v6002_v46, %v9552_v24  ;;  %v6004_v23 = vpop.f32.mrb[97].mxu1 }
 0x4aa   : > { %v6005_v37 = vpop.f32.mrb[98].mxu1 }
 0x4ab   : > { %v9708_v56 = vadd.f32 %v6005_v37, %v9555_v8  ;;  %v6007_v7 = vpop.f32.mrb[99].mxu1 }
 0x4b0   : > { %v6010_v52 = vpop.f32.mrb[100].mxu1 }
 0x4b1   : > { %v9711_v26 = vadd.f32 %v6010_v52, %v9561_v62  ;;  %v6012_v38 = vpop.f32.mrb[101].mxu1  ;;  %v6405_v52 = vld [vmem:[%s7929_s30] sm:$0xff] }
 0x4b2   : > { %v6013_v31 = vpop.f32.mrb[102].mxu1 }
 0x4b3   : > { %v9714_v61 = vadd.f32 %v6013_v31, %v9565_v16  ;;  %v6015_v3 = vpop.f32.mrb[103].mxu1 }
 0x4b4   : > { %v6406_v3 = vld [vmem:[%s7929_s30 + $0x8] sm:$0xff] }
 0x4b8   : > { %v6018_v36 = vpop.f32.mrb[104].mxu1 }
 0x4b9   : > { %v9717_v24 = vadd.f32 %v6018_v36, %v9570_v10  ;;  %v6020_v5 = vpop.f32.mrb[105].mxu1 }
 0x4ba   : > { %v6021_v57 = vpop.f32.mrb[106].mxu1 }
 0x4bb   : > { %v9720_v8 = vadd.f32 %v6021_v57, %v9574_v33  ;;  %v6023_v32 = vpop.f32.mrb[107].mxu1  ;;  %v6407_v57 = vld [vmem:[%s7929_s30 + $0x10] sm:$0xff] }
 0x4c0   : > { %v6026_v11 = vpop.f32.mrb[108].mxu1 }
 0x4c1   : > { %v9723_v62 = vadd.f32 %v6026_v11, %v9580_v53  ;;  %v6028_v63 = vpop.f32.mrb[109].mxu1 }
 0x4c2   : > { %v6029_v35 = vpop.f32.mrb[110].mxu1  ;;  %v6408_v63 = vld [vmem:[%s7929_s30 + $0x18] sm:$0xff] }
 0x4c3   : > { %v9726_v16 = vadd.f32 %v6029_v35, %v9584_v50  ;;  %v6031_v1 = vpop.f32.mrb[111].mxu1 }
 0x4c8   : > { %v6034_v0 = vpop.f32.mrb[112].mxu1 }
 0x4c9   : > { %v9729_v10 = vadd.f32 %v6034_v0, %v9590_v27  ;;  %v6036_v18 = vpop.f32.mrb[113].mxu1 }
 0x4ca   : > { %v6037_v44 = vpop.f32.mrb[114].mxu1 }
 0x4cb   : > { %v9732_v33 = vadd.f32 %v6037_v44, %v9594_v13  ;;  %v6039_v28 = vpop.f32.mrb[115].mxu1 }
 0x4cc   : > { %v6409_v28 = vld [vmem:[%s7929_s30 + $0x20] sm:$0xff] }
 0x4d0   : > { %v6042_v15 = vpop.f32.mrb[116].mxu1 }
 0x4d1   : > { %v9735_v53 = vadd.f32 %v6042_v15, %v9600_v48  ;;  %v6044_v58 = vpop.f32.mrb[117].mxu1 }
 0x4d2   : > { %v6045_v14 = vpop.f32.mrb[118].mxu1 }
 0x4d3   : > { %v9738_v50 = vadd.f32 %v6045_v14, %v9604_v6  ;;  %v6047_v34 = vpop.f32.mrb[119].mxu1  ;;  %v6410_v14 = vld [vmem:[%s7929_s30 + $0x28] sm:$0xff] }
 0x4d8   : > { %v6050_v27 = vpop.f32.mrb[120].mxu1 }
 0x4d9   : > { %v9741_v51 = vadd.f32 %v6050_v27, %v9610_v55  ;;  %v6052_v13 = vpop.f32.mrb[121].mxu1 }
 0x4da   : > { %v6053_v19 = vpop.f32.mrb[122].mxu1 }
 0x4db   : > { %v9744_v54 = vadd.f32 %v6053_v19, %v9614_v30  ;;  %v6055_v48 = vpop.f32.mrb[123].mxu1 }
 0x4dc   : > { %v6411_v48 = vld [vmem:[%s7929_s30 + $0x30] sm:$0xff] }
 0x4e0   : > { %v6058_v12 = vpop.f32.mrb[124].mxu1 }
 0x4e1   : > { %v9747_v46 = vadd.f32 %v6058_v12, %v9620_v41  ;;  %v6060_v23 = vpop.f32.mrb[125].mxu1 }
 0x4e2   : > { %v6061_v6 = vpop.f32.mrb[126].mxu1 }
 0x4e3   : > { %v9750_v37 = vadd.f32 %v6061_v6, %v9624_v29  ;;  %v6063_v7 = vpop.f32.mrb[127].mxu1  ;;  %v6412_v6 = vld [vmem:[%s7929_s30 + $0x38] sm:$0xff] }
 0x4e8   : > { %v6244_v55 = vpop.f32.mrb[128].mxu1 }
 0x4e9   : > { %v6371_v30 = vadd.f32 %v6244_v55, %v9631_v45  ;;  %v6246_v38 = vpop.f32.mrb[129].mxu1 }
 0x4ea   : > { %v6247_v31 = vpop.f32.mrb[130].mxu1  ;;  %v6413_v38 = vld [vmem:[%s7929_s30 + $0x40] sm:$0xff] }
 0x4eb   : > { %v6437_v41 = vadd.f32 %v6405_v52, %v6371_v30  ;;  %v6372_v36 = vadd.f32 %v6247_v31, %v9636_v21  ;;  %v6249_v5 = vpop.f32.mrb[131].mxu1 }
 0x4ed   : > { %6470 = vst.msk [vmem:[%s9759_s29] sm:$0xff] %vm1402_vm11, %v6437_v41  ;;  %v6438_v29 = vadd.f32 %v6406_v3, %v6372_v36  ;;  %v6414_v41 = vld [vmem:[%s7929_s30 + $0x48] sm:$0xff] }
 0x4ef   : > { %6471 = vst.msk [vmem:[%s9759_s29 + $0x8] sm:$0xff] %vm1402_vm11, %v6438_v29 }
 0x4f0   : > { %v6252_v45 = vpop.f32.mrb[132].mxu1 }
 0x4f1   : > { %v6373_v32 = vadd.f32 %v6252_v45, %v9643_v40  ;;  %v6254_v11 = vpop.f32.mrb[133].mxu1 }
 0x4f2   : > { %v6255_v21 = vpop.f32.mrb[134].mxu1 }
 0x4f3   : > { %v6439_v35 = vadd.f32 %v6407_v57, %v6373_v32  ;;  %v6374_v1 = vadd.f32 %v6255_v21, %v9648_v42  ;;  %v6257_v0 = vpop.f32.mrb[135].mxu1  ;;  %v6415_v57 = vld [vmem:[%s7929_s30 + $0x50] sm:$0xff]  ;;  %v6416_v21 = vld [vmem:[%s7929_s30 + $0x58] sm:$0xff] }
 0x4f5   : > { %6472 = vst.msk [vmem:[%s9759_s29 + $0x10] sm:$0xff] %vm1402_vm11, %v6439_v35  ;;  %v6440_v18 = vadd.f32 %v6408_v63, %v6374_v1 }
 0x4f7   : > { %6473 = vst.msk [vmem:[%s9759_s29 + $0x18] sm:$0xff] %vm1402_vm11, %v6440_v18  ;;  %v6417_v18 = vld [vmem:[%s7929_s30 + $0x60] sm:$0xff] }
 0x4f8   : > { %v6260_v44 = vpop.f32.mrb[136].mxu1 }
 0x4f9   : > { %v6375_v40 = vadd.f32 %v6260_v44, %v9655_v4  ;;  %v6262_v15 = vpop.f32.mrb[137].mxu1 }
 0x4fa   : > { %v6263_v58 = vpop.f32.mrb[138].mxu1 }
 0x4fb   : > { %v6441_v34 = vadd.f32 %v6409_v28, %v6375_v40  ;;  %v6376_v42 = vadd.f32 %v6263_v58, %v9660_v39  ;;  %v6265_v27 = vpop.f32.mrb[139].mxu1  ;;  %v6418_v40 = vld [vmem:[%s7929_s30 + $0x68] sm:$0xff] }
 0x4fd   : > { %6474 = vst.msk [vmem:[%s9759_s29 + $0x20] sm:$0xff] %vm1402_vm11, %v6441_v34  ;;  %v6442_v13 = vadd.f32 %v6410_v14, %v6376_v42  ;;  %v6419_v42 = vld [vmem:[%s7929_s30 + $0x70] sm:$0xff] }
 0x4ff   : > { %6475 = vst.msk [vmem:[%s9759_s29 + $0x28] sm:$0xff] %vm1402_vm11, %v6442_v13 }
 0x500   : > { %v6268_v19 = vpop.f32.mrb[140].mxu1 }
 0x501   : > { %v6377_v4 = vadd.f32 %v6268_v19, %v9669_v60  ;;  %v6270_v12 = vpop.f32.mrb[141].mxu1  ;;  %v6420_v19 = vld [vmem:[%s7929_s30 + $0x78] sm:$0xff] }
 0x502   : > { %v6271_v23 = vpop.f32.mrb[142].mxu1 }
 0x503   : > { %v6443_v7 = vadd.f32 %v6411_v48, %v6377_v4  ;;  %v6378_v39 = vadd.f32 %v6271_v23, %v9672_v43  ;;  %v6273_v55 = vpop.f32.mrb[143].mxu1 }
 0x504   : > { %v6422_v55 = vld [vmem:[%s7929_s30 + $0x88] sm:$0xff] }
 0x505   : > { %6476 = vst.msk [vmem:[%s9759_s29 + $0x30] sm:$0xff] %vm1402_vm11, %v6443_v7  ;;  %v6444_v52 = vadd.f32 %v6412_v6, %v6378_v39  ;;  %v6421_v6 = vld [vmem:[%s7929_s30 + $0x80] sm:$0xff] }
 0x507   : > { %6477 = vst.msk [vmem:[%s9759_s29 + $0x38] sm:$0xff] %vm1402_vm11, %v6444_v52 }
 0x508   : > { %v6276_v30 = vpop.f32.mrb[144].mxu1 }
 0x509   : > { %v6379_v60 = vadd.f32 %v6276_v30, %v9679_v59  ;;  %v6278_v31 = vpop.f32.mrb[145].mxu1 }
 0x50a   : > { %v6279_v3 = vpop.f32.mrb[146].mxu1  ;;  %v6423_v31 = vld [vmem:[%s7929_s30 + $0x90] sm:$0xff] }
 0x50b   : > { %v6445_v36 = vadd.f32 %v6413_v38, %v6379_v60  ;;  %v6380_v43 = vadd.f32 %v6279_v3, %v9684_v9  ;;  %v6281_v5 = vpop.f32.mrb[147].mxu1 }
 0x50d   : > { %6478 = vst.msk [vmem:[%s9759_s29 + $0x40] sm:$0xff] %vm1402_vm11, %v6445_v36  ;;  %v6446_v29 = vadd.f32 %v6414_v41, %v6380_v43  ;;  %v6424_v36 = vld [vmem:[%s7929_s30 + $0x98] sm:$0xff] }
 0x50f   : > { %6479 = vst.msk [vmem:[%s9759_s29 + $0x48] sm:$0xff] %vm1402_vm11, %v6446_v29 }
 0x510   : > { %v6284_v45 = vpop.f32.mrb[148].mxu1 }
 0x511   : > { %v6381_v59 = vadd.f32 %v6284_v45, %v9687_v17  ;;  %v6286_v32 = vpop.f32.mrb[149].mxu1 }
 0x512   : > { %v6287_v11 = vpop.f32.mrb[150].mxu1 }
 0x513   : > { %v6447_v63 = vadd.f32 %v6415_v57, %v6381_v59  ;;  %v6382_v9 = vadd.f32 %v6287_v11, %v9690_v22  ;;  %v6289_v35 = vpop.f32.mrb[151].mxu1  ;;  %v6425_v57 = vld [vmem:[%s7929_s30 + $0xa0] sm:$0xff]  ;;  %v6426_v11 = vld [vmem:[%s7929_s30 + $0xa8] sm:$0xff] }
 0x515   : > { %6480 = vst.msk [vmem:[%s9759_s29 + $0x50] sm:$0xff] %vm1402_vm11, %v6447_v63  ;;  %v6448_v1 = vadd.f32 %v6416_v21, %v6382_v9 }
 0x517   : > { %6481 = vst.msk [vmem:[%s9759_s29 + $0x58] sm:$0xff] %vm1402_vm11, %v6448_v1  ;;  %v6427_v1 = vld [vmem:[%s7929_s30 + $0xb0] sm:$0xff] }
 0x518   : > { %v6292_v0 = vpop.f32.mrb[152].mxu1 }
 0x519   : > { %v6383_v17 = vadd.f32 %v6292_v0, %v9693_v47  ;;  %v6294_v44 = vpop.f32.mrb[153].mxu1 }
 0x51a   : > { %v6295_v28 = vpop.f32.mrb[154].mxu1 }
 0x51b   : > { %v6449_v15 = vadd.f32 %v6417_v18, %v6383_v17  ;;  %v6384_v22 = vadd.f32 %v6295_v28, %v9696_v2  ;;  %v6297_v58 = vpop.f32.mrb[155].mxu1  ;;  %v6428_v17 = vld [vmem:[%s7929_s30 + $0xb8] sm:$0xff] }
 0x51d   : > { %6482 = vst.msk [vmem:[%s9759_s29 + $0x60] sm:$0xff] %vm1402_vm11, %v6449_v15  ;;  %v6450_v14 = vadd.f32 %v6418_v40, %v6384_v22  ;;  %v6429_v22 = vld [vmem:[%s7929_s30 + $0xc0] sm:$0xff] }
 0x51f   : > { %6483 = vst.msk [vmem:[%s9759_s29 + $0x68] sm:$0xff] %vm1402_vm11, %v6450_v14 }
 0x520   : > { %v6300_v34 = vpop.f32.mrb[156].mxu1 }
 0x521   : > { %v6385_v47 = vadd.f32 %v6300_v34, %v9699_v49  ;;  %v6302_v27 = vpop.f32.mrb[157].mxu1  ;;  %v6430_v34 = vld [vmem:[%s7929_s30 + $0xc8] sm:$0xff] }
 0x522   : > { %v6303_v13 = vpop.f32.mrb[158].mxu1 }
 0x523   : > { %v6451_v48 = vadd.f32 %v6419_v42, %v6385_v47  ;;  %v6386_v2 = vadd.f32 %v6303_v13, %v9702_v20  ;;  %v6305_v4 = vpop.f32.mrb[159].mxu1 }
 0x524   : > { %v6432_v4 = vld [vmem:[%s7929_s30 + $0xd8] sm:$0xff] }
 0x525   : > { %6484 = vst.msk [vmem:[%s9759_s29 + $0x70] sm:$0xff] %vm1402_vm11, %v6451_v48  ;;  %v6452_v12 = vadd.f32 %v6420_v19, %v6386_v2  ;;  %v6431_v19 = vld [vmem:[%s7929_s30 + $0xd0] sm:$0xff] }
 0x527   : > { %6485 = vst.msk [vmem:[%s9759_s29 + $0x78] sm:$0xff] %vm1402_vm11, %v6452_v12 }
 0x528   : > { %v6308_v23 = vpop.f32.mrb[160].mxu1 }
 0x529   : > { %v6387_v49 = vadd.f32 %v6308_v23, %v9705_v25  ;;  %v6310_v7 = vpop.f32.mrb[161].mxu1 }
 0x52a   : > { %v6311_v39 = vpop.f32.mrb[162].mxu1  ;;  %v6433_v7 = vld [vmem:[%s7929_s30 + $0xe0] sm:$0xff] }
 0x52b   : > { %v6453_v52 = vadd.f32 %v6421_v6, %v6387_v49  ;;  %v6388_v20 = vadd.f32 %v6311_v39, %v9708_v56  ;;  %v6313_v30 = vpop.f32.mrb[163].mxu1 }
 0x52d   : > { %6486 = vst.msk [vmem:[%s9759_s29 + $0x80] sm:$0xff] %vm1402_vm11, %v6453_v52  ;;  %v6454_v38 = vadd.f32 %v6422_v55, %v6388_v20  ;;  %v6434_v52 = vld [vmem:[%s7929_s30 + $0xe8] sm:$0xff] }
 0x52f   : > { %6487 = vst.msk [vmem:[%s9759_s29 + $0x88] sm:$0xff] %vm1402_vm11, %v6454_v38 }
 0x530   : > { %v6316_v60 = vpop.f32.mrb[164].mxu1 }
 0x531   : > { %v6389_v25 = vadd.f32 %v6316_v60, %v9711_v26  ;;  %v6318_v3 = vpop.f32.mrb[165].mxu1 }
 0x532   : > { %v6319_v41 = vpop.f32.mrb[166].mxu1 }
 0x533   : > { %v6455_v43 = vadd.f32 %v6423_v31, %v6389_v25  ;;  %v6390_v56 = vadd.f32 %v6319_v41, %v9714_v61  ;;  %v6321_v5 = vpop.f32.mrb[167].mxu1  ;;  %v6435_v31 = vld [vmem:[%s7929_s30 + $0xf0] sm:$0xff]  ;;  %v6436_v41 = vld [vmem:[%s7929_s30 + $0xf8] sm:$0xff]  ;;  %s7735_s30 = scalar_lea.vmem %s9888_s5, 4096 }
 0x534   : > { %p7736_p11 = scmp.ne.s32.totalorder %s9888_s5, %s7735_s30  ;;  %p7743_p1 = scmp.lt.s32.totalorder %s7741_s11, %s7735_s30 }
 0x535   : > { %6488 = vst.msk [vmem:[%s9759_s29 + $0x90] sm:$0xff] %vm1402_vm11, %v6455_v43  ;;  %v6456_v29 = vadd.f32 %v6424_v36, %v6390_v56 }
 0x536   : > { %p7737_p12 = pnand %p7736_p11, %p7862_p5  ;;  %p7744_p2 = por %p7743_p1, %p7742_p0 }
 0x537   : > { %6489 = vst.msk [vmem:[%s9759_s29 + $0x98] sm:$0xff] %vm1402_vm11, %v6456_v29 }
 0x538   : > { %v6324_v45 = vpop.f32.mrb[168].mxu1  ;;  %p7738_p13 = pneg %p7737_p12 }
 0x539   : > { %v6391_v26 = vadd.f32 %v6324_v45, %v9717_v24  ;;  %v6326_v59 = vpop.f32.mrb[169].mxu1 }
 0x53a   : > { %v6327_v32 = vpop.f32.mrb[170].mxu1  ;;  %p7745_p3 = pnand %p7744_p2, %p7738_p13 }
 0x53b   : > { %v6457_v21 = vadd.f32 %v6425_v57, %v6391_v26  ;;  %v6392_v61 = vadd.f32 %v6327_v32, %v9720_v8  ;;  %v6329_v63 = vpop.f32.mrb[171].mxu1 }
 0x53d   : > { %6490 = vst.msk [vmem:[%s9759_s29 + $0xa0] sm:$0xff] %vm1402_vm11, %v6457_v21  ;;  %v6458_v9 = vadd.f32 %v6426_v11, %v6392_v61 }
 0x53f   : > { %6491 = vst.msk [vmem:[%s9759_s29 + $0xa8] sm:$0xff] %vm1402_vm11, %v6458_v9 }
 0x540   : > { %v6332_v35 = vpop.f32.mrb[172].mxu1 }
 0x541   : > { %v6393_v24 = vadd.f32 %v6332_v35, %v9723_v62  ;;  %v6334_v0 = vpop.f32.mrb[173].mxu1 }
 0x542   : > { %v6335_v18 = vpop.f32.mrb[174].mxu1 }
 0x543   : > { %v6459_v44 = vadd.f32 %v6427_v1, %v6393_v24  ;;  %v6394_v8 = vadd.f32 %v6335_v18, %v9726_v16  ;;  %v6337_v28 = vpop.f32.mrb[175].mxu1 }
 0x545   : > { %6492 = vst.msk [vmem:[%s9759_s29 + $0xb0] sm:$0xff] %vm1402_vm11, %v6459_v44  ;;  %v6460_v40 = vadd.f32 %v6428_v17, %v6394_v8 }
 0x547   : > { %6493 = vst.msk [vmem:[%s9759_s29 + $0xb8] sm:$0xff] %vm1402_vm11, %v6460_v40 }
 0x548   : > { %v6340_v15 = vpop.f32.mrb[176].mxu1 }
 0x549   : > { %v6395_v62 = vadd.f32 %v6340_v15, %v9729_v10  ;;  %v6342_v58 = vpop.f32.mrb[177].mxu1 }
 0x54a   : > { %v6343_v14 = vpop.f32.mrb[178].mxu1 }
 0x54b   : > { %v6461_v42 = vadd.f32 %v6429_v22, %v6395_v62  ;;  %v6396_v16 = vadd.f32 %v6343_v14, %v9732_v33  ;;  %v6345_v47 = vpop.f32.mrb[179].mxu1 }
 0x54d   : > { %6494 = vst.msk [vmem:[%s9759_s29 + $0xc0] sm:$0xff] %vm1402_vm11, %v6461_v42  ;;  %v6462_v27 = vadd.f32 %v6430_v34, %v6396_v16 }
 0x54f   : > { %6495 = vst.msk [vmem:[%s9759_s29 + $0xc8] sm:$0xff] %vm1402_vm11, %v6462_v27 }
 0x550   : > { %v6348_v13 = vpop.f32.mrb[180].mxu1 }
 0x551   : > { %v6397_v10 = vadd.f32 %v6348_v13, %v9735_v53  ;;  %v6350_v48 = vpop.f32.mrb[181].mxu1 }
 0x552   : > { %v6351_v2 = vpop.f32.mrb[182].mxu1 }
 0x553   : > { %v6463_v12 = vadd.f32 %v6431_v19, %v6397_v10  ;;  %v6398_v33 = vadd.f32 %v6351_v2, %v9738_v50  ;;  %v6353_v23 = vpop.f32.mrb[183].mxu1 }
 0x555   : > { %6496 = vst.msk [vmem:[%s9759_s29 + $0xd0] sm:$0xff] %vm1402_vm11, %v6463_v12  ;;  %v6464_v6 = vadd.f32 %v6432_v4, %v6398_v33 }
 0x557   : > { %6497 = vst.msk [vmem:[%s9759_s29 + $0xd8] sm:$0xff] %vm1402_vm11, %v6464_v6 }
 0x558   : > { %v6356_v49 = vpop.f32.mrb[184].mxu1 }
 0x559   : > { %v6399_v53 = vadd.f32 %v6356_v49, %v9741_v51  ;;  %v6358_v39 = vpop.f32.mrb[185].mxu1 }
 0x55a   : > { %v6359_v55 = vpop.f32.mrb[186].mxu1 }
 0x55b   : > { %v6465_v20 = vadd.f32 %v6433_v7, %v6399_v53  ;;  %v6400_v50 = vadd.f32 %v6359_v55, %v9744_v54  ;;  %v6361_v30 = vpop.f32.mrb[187].mxu1 }
 0x55d   : > { %6498 = vst.msk [vmem:[%s9759_s29 + $0xe0] sm:$0xff] %vm1402_vm11, %v6465_v20  ;;  %v6466_v38 = vadd.f32 %v6434_v52, %v6400_v50 }
 0x55f   : > { %6499 = vst.msk [vmem:[%s9759_s29 + $0xe8] sm:$0xff] %vm1402_vm11, %v6466_v38 }
 0x560   : > { %v6364_v60 = vpop.f32.mrb[188].mxu1 }
 0x561   : > { %v6401_v51 = vadd.f32 %v6364_v60, %v9747_v46  ;;  %v6366_v25 = vpop.f32.mrb[189].mxu1 }
 0x562   : > { %v6367_v3 = vpop.f32.mrb[190].mxu1 }
 0x563   : > { %v6467_v54 = vadd.f32 %v6435_v31, %v6401_v51  ;;  %v6402_v36 = vadd.f32 %v6367_v3, %v9750_v37  ;;  %v6369_v43 = vpop.f32.mrb[191].mxu1 }
 0x565   : > { %6500 = vst.msk [vmem:[%s9759_s29 + $0xf0] sm:$0xff] %vm1402_vm11, %v6467_v54  ;;  %v6468_v46 = vadd.f32 %v6436_v41, %v6402_v36 }
 0x567   : > { %6501 = vst.msk [vmem:[%s9759_s29 + $0xf8] sm:$0xff] %vm1402_vm11, %v6468_v46 }
 0x568   : > { %7748 = shalt.err (!%p7745_p3)
}
 0x569   : > { %s7749_s17 = scalar_lea.hbm %s9886_s8, 4096  ;;  %s7753_s24 = scalar_lea.hbm %s9940_s3, 8192 }
 0x56a   : > { %p7750_p4 = scmp.ne.s32.totalorder %s9886_s8, %s7749_s17  ;;  %p7754_p9 = scmp.lt.u32.totalorder %s9886_s8, %s9940_s3 }
 0x56b   : > { %p7755_p10 = scmp.lt.u32.totalorder %s7753_s24, %s7749_s17  ;;  %p7757_p12 = scmp.lt.u32.totalorder %s7749_s17, %s9886_s8 }
 0x56c   : > { %p7751_p7 = pnand %p7750_p4, %p7862_p5 }
 0x56d   : > { %p7756_p11 = por %p7755_p10, %p7754_p9 }
 0x56e   : > { %p7752_p8 = pneg %p7751_p7 }
 0x56f   : > { %p7758_p13 = por %p7757_p12, %p7756_p11 }
 0x571   : > { %p7759_p0 = pnand %p7758_p13, %p7752_p8 }
 0x573   : > { %7762 = shalt.err (!%p7759_p0)
}
 0x574   : > { %s7802_s27 = smov 128   ;;  %s7803_s28 = smov 8  }
 0x575   : > { %7308 = dma.vmem_to_hbm [thread:$0]  (%p7862_p5), %s9888_s5, 4096, %s9886_s8, %s9896_s16, %s7802_s27, %s7802_s27, %s7803_s28  }
 0x576 PF: > { %p7314_p1 = scmp.ge.s32.totalorder %s7797_s15, 2  ;;  %s6531_s29 = sand.u32 1, %s7785_s12  }
 0x577   : > { %s6532_s4 = scalar_lea.sflag [#allocation5], %s6531_s29 }
 0x578   : > { %p7311_p2 = pnand %p7314_p1, %p7866_p6 }
 0x57a   : > { %7780 = dma.done.wait (!%p7311_p2), %s6532_s4, 4096  }
 0x57b   : > { %7782 = vsyncadd (!%p7311_p2), %s6532_s4, 4294963200  ;;  %p13_p3 = scmp.ge.s32.totalorder %s7849_s18, 4   ;;  %s9992_s12 = smov %s7789_s13 }
 0x57c   : > { %s9993_s13 = smov %s7793_s14  ;;  %s9994_s14 = smov %s7860_s21 }
 0x57d   : > { %s9995_s15 = smov %s7849_s18  ;;  %15 = sbr.rel (!%p13_p3) target bundleno = 3 (0x3), region = 83 }
 0x584   :  { %6537 = vsyncpa [#allocation5], 1 }
 0x585   :  { %6539 = vsyncpa [#allocation5 + $0x1], 1 }

</bundles_post_ra>
